<compile_context>
chip_gen: v7x
topology: tpu7x:2x2x1
jax: 0.10.0
libtpu: 0.0.40
codegen_flags: <defaults>
</compile_context>

<pallas_src>
import functools

import jax
import jax.numpy as jnp
from jax import lax
from jax.experimental import pallas as pl
from jax.experimental.pallas import tpu as pltpu


def agnn_kernel(x_row_ref, inv_row_ref, x_col_ref, inv_col_ref, adj_ref,
                beta_ref, out_ref, q_sc, l_sc, acc_sc, *, exp_dtype):
    j = pl.program_id(1)

    @pl.when(j == 0)
    def _init():
        beta = beta_ref[0]
        # Row operand (normalized, beta folded in): computed once per row tile
        # and reused from VMEM for every column step.
        q_sc[...] = (x_row_ref[...] * (inv_row_ref[...] * beta)).astype(jnp.bfloat16)
        l_sc[...] = jnp.zeros_like(l_sc)
        acc_sc[...] = jnp.zeros_like(acc_sc)

    xc = x_col_ref[...]                                   # [Tc, Dp] bf16
    k = (xc * inv_col_ref[...]).astype(jnp.bfloat16)      # one VPU mul + cast

    # s[i, j] = beta * cos(theta_ij)  (bf16 MXU operands, f32 accumulation)
    s = lax.dot_general(q_sc[...], k, (((1,), (1,)), ((), ())),
                        preferred_element_type=jnp.float32)       # [Tr, Tc]

    # |s| <= |beta| for real edges, so exp(s - |beta|) is in (0, 1]: no online
    # max needed.  Masked scores (-1e30) underflow to exactly 0 after exp
    # (bf16 has the same exponent range as f32, so this holds in both paths).
    abs_beta = jnp.abs(beta_ref[0])
    s = jnp.where(adj_ref[...] != 0, s - abs_beta, jnp.float32(-1e30))
    p = jnp.exp(s.astype(exp_dtype))                      # bf16 EUP on v6e/v7x

    l_sc[...] += jnp.sum(p.astype(jnp.float32), axis=-1, keepdims=True)
    acc_sc[...] += jnp.dot(p.astype(jnp.bfloat16), xc,
                           preferred_element_type=jnp.float32)

    @pl.when(j == pl.num_programs(1) - 1)
    def _finalize():
        # Real rows always contain their self-loop, so l >= exp(-2|beta|) > 0;
        # the max() only guards zero-padded rows (sliced off by the wrapper).
        inv_l = pl.reciprocal(jnp.maximum(l_sc[...], jnp.float32(1e-30)),
                              approx=True)
        out_ref[...] = (acc_sc[...] * inv_l).astype(out_ref.dtype)


def _bf16_transcendentals():
    # bf16 EUP/VPU exist on v6e / v7x; keep f32 elementwise math elsewhere.
    try:
        kind = jax.devices()[0].device_kind.lower()
    except Exception:
        return False
    return ("v6" in kind) or ("v7" in kind)


def agnn_prop(x, adj, beta, *, tile_rows=256, tile_cols=512):
    """x: [N, D] float, adj: [N, N] 0/1 (any int/float dtype), beta: [1] float."""
    N, D = x.shape
    assert adj.shape == (N, N)

    # Lane-dense feature dim.  Clamp tiles to the (128-aligned) problem size so
    # tiny graphs don't over-pad, and force Tc to be a multiple of Tr so a
    # single padded size Np divides both grid axes.
    Dp = pl.cdiv(max(D, 1), 128) * 128
    n128 = pl.cdiv(N, 128) * 128
    tr = min(tile_rows, n128)
    tc = min(tile_cols, n128)
    tc = max(tr, (tc // tr) * tr)
    Np = pl.cdiv(N, tc) * tc

    # Zero padding preserves norms / dot products and adds no edges.
    x_f32 = jnp.pad(x.astype(jnp.float32), ((0, Np - N), (0, Dp - D)))
    # Cosine normalization factors: computed ONCE in f32 (O(N*Dp)), streamed as
    # a tiny [Np, 1] side input instead of being recomputed per grid step.
    inv_norm = lax.rsqrt(jnp.sum(x_f32 * x_f32, axis=1, keepdims=True)
                         + jnp.float32(1e-12))
    x_bf = x_f32.astype(jnp.bfloat16)          # halve x HBM traffic; MXU is bf16 anyway
    # TODO(synk): bit-pack adj (1 bit/edge) to shrink the only O(N^2) stream further.
    adj_p = jnp.pad(adj.astype(jnp.int8), ((0, Np - N), (0, Np - N)))
    beta = jnp.asarray(beta, jnp.float32).reshape((1,))

    exp_dtype = jnp.bfloat16 if _bf16_transcendentals() else jnp.float32
    kernel = functools.partial(agnn_kernel, exp_dtype=exp_dtype)

    grid = (Np // tr, Np // tc)   # (row tiles [parallel], col tiles [arbitrary])

    out_p = pl.pallas_call(
        kernel,
        out_shape=jax.ShapeDtypeStruct((Np, Dp), x.dtype),
        grid=grid,
        in_specs=[
            pl.BlockSpec((tr, Dp), lambda i, j: (i, 0)),        # x row tile (targets)
            pl.BlockSpec((tr, 1), lambda i, j: (i, 0)),         # 1/||x|| row
            pl.BlockSpec((tc, Dp), lambda i, j: (j, 0)),        # x col tile (sources)
            pl.BlockSpec((tc, 1), lambda i, j: (j, 0)),         # 1/||x|| col
            pl.BlockSpec((tr, tc), lambda i, j: (i, j)),        # adjacency tile (int8)
            pl.BlockSpec(memory_space=pltpu.MemorySpace.SMEM),  # beta scalar
        ],
        out_specs=pl.BlockSpec((tr, Dp), lambda i, j: (i, 0)),
        scratch_shapes=[
            pltpu.VMEM((tr, Dp), jnp.bfloat16),   # q = beta * x_row / ||x_row||
            pltpu.VMEM((tr, 1), jnp.float32),     # softmax denominator l
            pltpu.VMEM((tr, Dp), jnp.float32),    # output accumulator
        ],
        compiler_params=pltpu.CompilerParams(
            dimension_semantics=("parallel", "arbitrary"),
            vmem_limit_bytes=32 * 1024 * 1024),
    )(x_bf, inv_norm, x_bf, inv_norm, adj_p, beta)

    return out_p[:N, :D]


def agnn_ref(x, adj, beta):
    # Pure-JAX f32 reference for validation.
    norm = jnp.sqrt(jnp.sum(x * x, axis=1, keepdims=True) + 1e-12)
    xn = x / norm
    cos = jnp.dot(xn, xn.T, precision=lax.Precision.HIGHEST)
    s = jnp.where(adj != 0, cos * beta[0], -jnp.inf)
    alpha = jax.nn.softmax(s, axis=-1)
    alpha = jnp.where(adj != 0, alpha, 0.0)
    return jnp.dot(alpha, x, precision=lax.Precision.HIGHEST)


if __name__ == "__main__":
    key = jax.random.PRNGKey(0)
    kx, kb = jax.random.split(key, 2)

    N, D = 384, 48  # small graph: pads to Np=512, Dp=128 -> 2x2 grid

    x = jax.random.normal(kx, (N, D), dtype=jnp.float32)
    # beta parameter ~ Uniform(0, 1), matching reset_parameters().
    beta = jax.random.uniform(kb, (1,), dtype=jnp.float32)

    # Deterministic edge_index: undirected ring graph, shape [2, 2N].
    src = jnp.arange(N, dtype=jnp.int32)
    dst = (src + 1) % N
    edge_index = jnp.stack(
        [jnp.concatenate([src, dst]), jnp.concatenate([dst, src])], axis=0)

    # Glue: edge list -> dense int8 adjacency; remove_self_loops + add_self_loops.
    row, col = edge_index
    adj = jnp.zeros((N, N), jnp.int8).at[row, col].set(1)
    eye = jnp.eye(N, dtype=jnp.int8)
    adj = adj * (1 - eye)              # remove_self_loops
    adj = jnp.maximum(adj, eye)        # add_self_loops

    out = jax.block_until_ready(agnn_prop(x, adj, beta))

    ref = agnn_ref(x, adj.astype(jnp.float32), beta)
    assert out.shape == (N, D)
    max_err = jnp.max(jnp.abs(out - ref))
    mean_err = jnp.mean(jnp.abs(out - ref))
    # Tolerance reflects bf16 MXU operands / bf16 exp (f32 accumulation) in the kernel.
    assert mean_err < 1e-2, f"mean |err|={mean_err}"
    assert jnp.allclose(out, ref, atol=3e-2, rtol=3e-2), (
        f"mismatch vs reference (max |err|={max_err})")

    print("KERNEL_OK")
</pallas_src>

<mosaic_0001>
module attributes {stable_mosaic.version = 11 : i64} {
  func.func @agnn_kernel(%arg0: i32, %arg1: i32, %arg2: memref<256x128xbf16, #tpu.memory_space<vmem>>, %arg3: memref<256x1xf32, #tpu.memory_space<vmem>>, %arg4: memref<256x128xbf16, #tpu.memory_space<vmem>>, %arg5: memref<256x1xf32, #tpu.memory_space<vmem>>, %arg6: memref<256x256xi8, #tpu.memory_space<vmem>>, %arg7: memref<1xf32, #tpu.memory_space<smem>>, %arg8: memref<256x128xf32, #tpu.memory_space<vmem>>, %arg9: memref<256x128xbf16, #tpu.memory_space<vmem>>, %arg10: memref<256x1xf32, #tpu.memory_space<vmem>>, %arg11: memref<256x128xf32, #tpu.memory_space<vmem>>) attributes {dimension_semantics = [#tpu.dimension_semantics<parallel>, #tpu.dimension_semantics<arbitrary>], iteration_bounds = array<i64: 2, 2>, scalar_prefetch = 0 : i64, scratch_operands = 3 : i64, tpu.core_type = #tpu.core_type<tc>, window_params = [{transform_indices = @transform_0, window_bounds = array<i64: 256, 128>}, {transform_indices = @transform_1, window_bounds = array<i64: 256, 1>}, {transform_indices = @transform_2, window_bounds = array<i64: 256, 128>}, {transform_indices = @transform_3, window_bounds = array<i64: 256, 1>}, {transform_indices = @transform_4, window_bounds = array<i64: 256, 256>}, {transform_indices = @transform_5, window_bounds = array<i64: 1>}, {transform_indices = @transform_6, window_bounds = array<i64: 256, 128>}]} {
    %c0_i32 = arith.constant 0 : i32
    %0 = arith.cmpi eq, %arg1, %c0_i32 : i32
    %1 = arith.extui %0 : i1 to i32
    %c0_i32_0 = arith.constant 0 : i32
    %2 = arith.cmpi ne, %1, %c0_i32_0 : i32
    scf.if %2 {
      %c0_21 = arith.constant 0 : index
      %34 = memref.load %arg7[%c0_21] : memref<1xf32, #tpu.memory_space<smem>>
      %c0_22 = arith.constant 0 : index
      %c0_23 = arith.constant 0 : index
      %35 = vector.load %arg2[%c0_22, %c0_23] : memref<256x128xbf16, #tpu.memory_space<vmem>>, vector<256x128xbf16>
      %c0_24 = arith.constant 0 : index
      %c0_25 = arith.constant 0 : index
      %36 = vector.load %arg3[%c0_24, %c0_25] : memref<256x1xf32, #tpu.memory_space<vmem>>, vector<256x1xf32>
      %37 = vector.broadcast %34 : f32 to vector<256x1xf32>
      %38 = arith.mulf %36, %37 : vector<256x1xf32>
      %39 = arith.extf %35 : vector<256x128xbf16> to vector<256x128xf32>
      %40 = vector.broadcast %38 : vector<256x1xf32> to vector<256x128xf32>
      %41 = arith.mulf %39, %40 : vector<256x128xf32>
      %42 = arith.truncf %41 : vector<256x128xf32> to vector<256x128xbf16>
      %c0_26 = arith.constant 0 : index
      %c0_27 = arith.constant 0 : index
      %43 = vector.load %arg9[%c0_26, %c0_27] : memref<256x128xbf16, #tpu.memory_space<vmem>>, vector<256x128xbf16>
      tpu.vector_store %arg9[%c0_26, %c0_27], %42 {strides = array<i32>} : memref<256x128xbf16, #tpu.memory_space<vmem>>, vector<256x128xbf16>,
      %cst_28 = arith.constant 0.000000e+00 : f32
      %44 = vector.broadcast %cst_28 : f32 to vector<256x1xf32>
      %c0_29 = arith.constant 0 : index
      %c0_30 = arith.constant 0 : index
      %45 = vector.load %arg10[%c0_29, %c0_30] : memref<256x1xf32, #tpu.memory_space<vmem>>, vector<256x1xf32>
      tpu.vector_store %arg10[%c0_29, %c0_30], %44 {strides = array<i32>} : memref<256x1xf32, #tpu.memory_space<vmem>>, vector<256x1xf32>,
      %cst_31 = arith.constant 0.000000e+00 : f32
      %46 = vector.broadcast %cst_31 : f32 to vector<256x128xf32>
      %c0_32 = arith.constant 0 : index
      %c0_33 = arith.constant 0 : index
      %47 = vector.load %arg11[%c0_32, %c0_33] : memref<256x128xf32, #tpu.memory_space<vmem>>, vector<256x128xf32>
      tpu.vector_store %arg11[%c0_32, %c0_33], %46 {strides = array<i32>} : memref<256x128xf32, #tpu.memory_space<vmem>>, vector<256x128xf32>,
    } else {
    }
    %c0 = arith.constant 0 : index
    %c0_1 = arith.constant 0 : index
    %3 = vector.load %arg4[%c0, %c0_1] : memref<256x128xbf16, #tpu.memory_space<vmem>>, vector<256x128xbf16>
    %c0_2 = arith.constant 0 : index
    %c0_3 = arith.constant 0 : index
    %4 = vector.load %arg5[%c0_2, %c0_3] : memref<256x1xf32, #tpu.memory_space<vmem>>, vector<256x1xf32>
    %5 = arith.extf %3 : vector<256x128xbf16> to vector<256x128xf32>
    %6 = vector.broadcast %4 : vector<256x1xf32> to vector<256x128xf32>
    %7 = arith.mulf %5, %6 : vector<256x128xf32>
    %8 = arith.truncf %7 : vector<256x128xf32> to vector<256x128xbf16>
    %c0_4 = arith.constant 0 : index
    %c0_5 = arith.constant 0 : index
    %9 = vector.load %arg9[%c0_4, %c0_5] : memref<256x128xbf16, #tpu.memory_space<vmem>>, vector<256x128xbf16>
    %cst = arith.constant dense<0.000000e+00> : vector<256x256xf32>
    %10 = tpu.matmul %9, %8, %cst {dimension_numbers = #tpu.dot_dimension_numbers<[1], [1], [0], [0], [0, 0, 1, 0], [], []>} : vector<256x128xbf16>, vector<256x128xbf16>, vector<256x256xf32> -> vector<256x256xf32>
    %c0_6 = arith.constant 0 : index
    %11 = memref.load %arg7[%c0_6] : memref<1xf32, #tpu.memory_space<smem>>
    %12 = math.absf %11 : f32
    %c0_7 = arith.constant 0 : index
    %c0_8 = arith.constant 0 : index
    %13 = vector.load %arg6[%c0_7, %c0_8] : memref<256x256xi8, #tpu.memory_space<vmem>>, vector<256x256xi8>
    %c0_i8 = arith.constant 0 : i8
    %14 = vector.broadcast %c0_i8 : i8 to vector<256x256xi8>
    %15 = arith.cmpi ne, %13, %14 : vector<256x256xi8>
    %16 = vector.broadcast %12 : f32 to vector<256x256xf32>
    %17 = arith.subf %10, %16 : vector<256x256xf32>
    %cst_9 = arith.constant -1.000000e+30 : f32
    %18 = vector.broadcast %cst_9 : f32 to vector<256x256xf32>
    %19 = arith.select %15, %17, %18 : vector<256x256xi1>, vector<256x256xf32>
    %20 = math.exp %19 : vector<256x256xf32>
    %c0_10 = arith.constant 0 : index
    %c0_11 = arith.constant 0 : index
    %21 = vector.load %arg10[%c0_10, %c0_11] : memref<256x1xf32, #tpu.memory_space<vmem>>, vector<256x1xf32>
    %cst_12 = arith.constant dense<0.000000e+00> : vector<256xf32>
    %22 = vector.multi_reduction <add>, %20, %cst_12 [1] : vector<256x256xf32> to vector<256xf32>
    %23 = vector.shape_cast %22 : vector<256xf32> to vector<256x1xf32>
    %24 = arith.addf %21, %23 : vector<256x1xf32>
    %c0_13 = arith.constant 0 : index
    %c0_14 = arith.constant 0 : index
    %25 = vector.load %arg10[%c0_13, %c0_14] : memref<256x1xf32, #tpu.memory_space<vmem>>, vector<256x1xf32>
    tpu.vector_store %arg10[%c0_13, %c0_14], %24 {strides = array<i32>} : memref<256x1xf32, #tpu.memory_space<vmem>>, vector<256x1xf32>,
    %c0_15 = arith.constant 0 : index
    %c0_16 = arith.constant 0 : index
    %26 = vector.load %arg11[%c0_15, %c0_16] : memref<256x128xf32, #tpu.memory_space<vmem>>, vector<256x128xf32>
    %27 = arith.truncf %20 : vector<256x256xf32> to vector<256x256xbf16>
    %cst_17 = arith.constant dense<0.000000e+00> : vector<256x128xf32>
    %28 = tpu.matmul %27, %3, %cst_17 {dimension_numbers = #tpu.dot_dimension_numbers<[1], [0], [0], [1], [0, 0, 1, 1], [], []>} : vector<256x256xbf16>, vector<256x128xbf16>, vector<256x128xf32> -> vector<256x128xf32>
    %29 = arith.addf %26, %28 : vector<256x128xf32>
    %c0_18 = arith.constant 0 : index
    %c0_19 = arith.constant 0 : index
    %30 = vector.load %arg11[%c0_18, %c0_19] : memref<256x128xf32, #tpu.memory_space<vmem>>, vector<256x128xf32>
    tpu.vector_store %arg11[%c0_18, %c0_19], %29 {strides = array<i32>} : memref<256x128xf32, #tpu.memory_space<vmem>>, vector<256x128xf32>,
    %c1_i32 = arith.constant 1 : i32
    %31 = arith.cmpi eq, %arg1, %c1_i32 : i32
    %32 = arith.extui %31 : i1 to i32
    %c0_i32_20 = arith.constant 0 : i32
    %33 = arith.cmpi ne, %32, %c0_i32_20 : i32
    scf.if %33 {
      %c0_21 = arith.constant 0 : index
      %c0_22 = arith.constant 0 : index
      %34 = vector.load %arg10[%c0_21, %c0_22] : memref<256x1xf32, #tpu.memory_space<vmem>>, vector<256x1xf32>
      %cst_23 = arith.constant 1.000000e-30 : f32
      %35 = vector.broadcast %cst_23 : f32 to vector<256x1xf32>
      %36 = arith.maximumf %34, %35 : vector<256x1xf32>
      %37 = tpu.reciprocal %36 {approx = true} : vector<256x1xf32> -> vector<256x1xf32>
      %c0_24 = arith.constant 0 : index
      %c0_25 = arith.constant 0 : index
      %38 = vector.load %arg11[%c0_24, %c0_25] : memref<256x128xf32, #tpu.memory_space<vmem>>, vector<256x128xf32>
      %39 = vector.broadcast %37 : vector<256x1xf32> to vector<256x128xf32>
      %40 = arith.mulf %38, %39 : vector<256x128xf32>
      %c0_26 = arith.constant 0 : index
      %c0_27 = arith.constant 0 : index
      %41 = vector.load %arg8[%c0_26, %c0_27] : memref<256x128xf32, #tpu.memory_space<vmem>>, vector<256x128xf32>
      tpu.vector_store %arg8[%c0_26, %c0_27], %40 {strides = array<i32>} : memref<256x128xf32, #tpu.memory_space<vmem>>, vector<256x128xf32>,
    } else {
    }
    return
  }
  func.func @transform_0(%arg0: i32, %arg1: i32) -> (i32, i32) {
    %c0_i32 = arith.constant 0 : i32
    %c0_i32_0 = arith.constant 0 : i32
    return %arg0, %c0_i32 : i32, i32
  }
  func.func @transform_1(%arg0: i32, %arg1: i32) -> (i32, i32) {
    %c0_i32 = arith.constant 0 : i32
    %c0_i32_0 = arith.constant 0 : i32
    return %arg0, %c0_i32 : i32, i32
  }
  func.func @transform_2(%arg0: i32, %arg1: i32) -> (i32, i32) {
    %c0_i32 = arith.constant 0 : i32
    %c0_i32_0 = arith.constant 0 : i32
    return %arg1, %c0_i32 : i32, i32
  }
  func.func @transform_3(%arg0: i32, %arg1: i32) -> (i32, i32) {
    %c0_i32 = arith.constant 0 : i32
    %c0_i32_0 = arith.constant 0 : i32
    return %arg1, %c0_i32 : i32, i32
  }
  func.func @transform_4(%arg0: i32, %arg1: i32) -> (i32, i32) {
    %c0_i32 = arith.constant 0 : i32
    return %arg0, %arg1 : i32, i32
  }
  func.func @transform_5(%arg0: i32, %arg1: i32) -> i32 {
    %c0_i32 = arith.constant 0 : i32
    %c0_i32_0 = arith.constant 0 : i32
    return %c0_i32 : i32
  }
  func.func @transform_6(%arg0: i32, %arg1: i32) -> (i32, i32) {
    %c0_i32 = arith.constant 0 : i32
    %c0_i32_0 = arith.constant 0 : i32
    return %arg0, %c0_i32 : i32, i32
  }
}

</mosaic_0001>

<bundles_post_ra>
// kernel: tpu_custom_call.1
= control target key start
LH: loop header
LB: loop body
LE: loop exit
PB: predicated region body
PF: predicated region fallthrough
CT: control target
= control target key end

     0   :  { %s5330_s0 = inlined_call_operand.vmem [shape: bf16[512,128], index: 0, kind: input, shape index: {}]   ;;  %s5331_s1 = inlined_call_operand.vmem [shape: f32[512,1], index: 1, kind: input, shape index: {}]   ;;  %s5332_s2 = inlined_call_operand.vmem [shape: bf16[512,128], index: 2, kind: input, shape index: {}]   ;;  %s5333_s3 = inlined_call_operand.vmem [shape: f32[512,1], index: 3, kind: input, shape index: {}]   ;;  %s5334_s4 = inlined_call_operand.vmem [shape: s8[512,512], index: 4, kind: input, shape index: {}]   ;;  %s5335_s5 = inlined_call_operand.<no memory space> [shape: f32[1], index: 5, kind: input, shape index: {}]   ;;  %s5336_s6 = inlined_call_operand.hbm [shape: f32[512,128], index: 6, kind: output, shape index: {}]  }
   0x1   :  { %5344 = sst [smem:[#allocation18_spill]] %s5334_s4 }
   0x2   :  { %11 = sst [smem:[#allocation5]] %s5335_s5 }
   0x3   :  { %12 = vsyncpa [#allocation8], 0 }
   0x4   :  { %14 = vsyncpa [#allocation8 + $0x1], 0  ;;  %s3817_s23 = smov 0   ;;  %s3819_s24 = smov 0  }
   0x5   :  { %s3821_s25 = smov 0   ;;  %s3823_s26 = smov 0  }
   0x6   :  { %s3825_s27 = smov 0   ;;  %s3827_s28 = smov 0  }
   0x7   :  { %s3829_s29 = smov 0   ;;  %s3831_s30 = smov 0  }
   0x8   :  { %s3833_s7 = smov 0   ;;  %s3835_s5 = smov 0  }
   0x9 LB: > { %5345 = sst [smem:[#allocation10_spill]] %s3742_s25  ;;  %s3053_s8 = sadd.s32 4294967295, %s3770_s5   ;;  %s3770_s5 = sphi %s3835_s5, %s20_s5   ;;  %s3766_s7 = sphi %s3833_s7, %s5531_s7   ;;  %s3762_s30 = sphi %s3831_s30, %s5530_s30   ;;  %s3758_s29 = sphi %s3829_s29, %s5529_s29   ;;  %s3754_s28 = sphi %s3827_s28, %s5528_s28   ;;  %s3750_s27 = sphi %s3825_s27, %s5534_s27   ;;  %s3746_s26 = sphi %s3823_s26, %s5526_s26   ;;  %s3742_s25 = sphi %s3821_s25, %s5525_s25   ;;  %s3738_s24 = sphi %s3819_s24, %s5533_s24   ;;  %s3734_s23 = sphi %s3817_s23, %s5532_s23  }
   0xa   : > { %5346 = sst [smem:[#allocation11_spill]] %s3750_s27  ;;  %s3054_s9 = sadd.s32 4294967294, %s3770_s5  }
   0xb   : > { %5347 = sst [smem:[#allocation12_spill]] %s3762_s30  ;;  %s29_s10 = sadd.s32 1, %s3762_s30 }
   0xc   : > { %5348 = sst [smem:[#allocation13_spill]] %s3766_s7  ;;  %s32_s11 = sadd.s32 1, %s3766_s7 }
   0xd   : > { %p30_p0 = scmp.ge.s32.totalorder %s29_s10, 2  ;;  %s145_s12 = sadd.s32 1, %s3750_s27 }
   0xe   : > { %p152_p1 = scmp.ne.s32.totalorder %s3750_s27, %s3746_s26  ;;  %p153_p2 = scmp.eq.s32.totalorder %s3770_s5, 0 }
   0xf   : > { %s5536_s10 = smov (%p30_p0, %s29_s10), 0  ;;  %s5538_s11 = smov (!%p30_p0, %s32_s11), %s3766_s7 }
  0x10   : > { %5349 = sst [smem:[#allocation14_spill]] %s5536_s10  ;;  %s141_s13 = ssub.s32 %s3762_s30, %s5536_s10 }
  0x11   : > { %p3880_p3 = por %p153_p2, %p152_p1  ;;  %p34_p4 = scmp.ge.s32.totalorder %s5538_s11, 2 }
  0x12   : > { %s192_s15 = sadd.s32 1, %s3742_s25  ;;  %p202_p5 = scmp.ne.s32.totalorder %s3742_s25, %s3738_s24 }
  0x13   : > { %p203_p6 = scmp.eq.s32.totalorder %s3053_s8, 3  ;;  %s5540_s11 = smov (%p34_p4, %s5538_s11), 0 }
  0x14   : > { %5351 = sst [smem:[#allocation15_spill]] %s5540_s11  ;;  %p208_p8 = scmp.ne.s32.totalorder %s3738_s24, %s3734_s23 }
  0x15   : > { %p3889_p7 = por %p203_p6, %p202_p5  ;;  %s140_s17 = ssub.s32 %s3766_s7, %s5540_s11 }
  0x16   : > { %p209_p9 = scmp.eq.s32.totalorder %s3054_s9, 3  ;;  %s142_s18 = sor.u32 %s141_s13, %s140_s17 }
  0x17   : > { %p190_p10 = scmp.eq.s32.totalorder %s140_s17, 0  ;;  %p143_p11 = scmp.eq.s32.totalorder %s142_s18, 0 }
  0x18   : > { %p3897_p12 = por %p209_p9, %p208_p8  ;;  %p3056_p13 = scmp.ge.s32.totalorder %s3770_s5, 4 }
  0x19   : > { %s3902_s20 = scalar_select %p190_p10, %s3742_s25, %s192_s15  }
  0x1a   : > { %s3905_s21 = scalar_select %p143_p11, %s3750_s27, %s145_s12  }
  0x1b   : > { %5354 = sst [smem:[#allocation16_spill]] %s3902_s20  ;;  %228 = sbr.rel (%p3056_p13) target bundleno = 52 (0x34), region = 20 }
  0x1c   : > { %5355 = sst [smem:[#allocation17_spill]] %s3905_s21 }
  0x22   : > { %267 = sbr.rel (!%p3880_p3) target bundleno = 52 (0x34), region = 40  ;;  %s269_s22 = sand.u32 (%p3880_p3), 1, %s3750_s27  }
  0x23   : > { %s3059_s8 = sshll.u32 (%p3880_p3), %s3762_s30, 1  ;;  %s3057_s9 = sshll.u32 (%p3880_p3), %s269_s22, 7 }
  0x24   : > { %s3096_s13 = sshll.u32 (%p3880_p3), %s3766_s7, 5  ;;  %s5356_s4 = sld [smem:[#allocation18_spill]] (%p3880_p3) }
  0x25   : > { %s275_s17 = sadd.s32 (%p3880_p3), %s3096_s13, %s3059_s8  ;;  %s271_s14 = scalar_lea.vmem (%p3880_p3), [#allocation6], %s3057_s9 }
  0x26   : > { %s3061_s18 = sshll.u32 (%p3880_p3), %s275_s17, 3 }
  0x2a   : > { %s3916_s12 = scalar_lea.vmem %s5356_s4, %s3061_s18 }
  0x2b   : > { %v290_v0 = vld [vmem:[%s3916_s12] sm:$0xff]  ;;  %v292_v1 = vld [vmem:[%s3916_s12 + $0x8] sm:$0xff] }
  0x2c   : > { %v294_v2 = vld [vmem:[%s3916_s12 + $0x20] sm:$0xff]  ;;  %291 = vst [vmem:[%s271_s14] sm:$0xff] %v290_v0  ;;  %293 = vst [vmem:[%s271_s14 + $0x8] sm:$0xff] %v292_v1  ;;  %v296_v3 = vld [vmem:[%s3916_s12 + $0x28] sm:$0xff] }
  0x2d   : > { %295 = vst [vmem:[%s271_s14 + $0x10] sm:$0xff] %v294_v2  ;;  %v298_v4 = vld [vmem:[%s3916_s12 + $0x40] sm:$0xff]  ;;  %v300_v5 = vld [vmem:[%s3916_s12 + $0x48] sm:$0xff]  ;;  %297 = vst [vmem:[%s271_s14 + $0x18] sm:$0xff] %v296_v3 }
  0x2e   : > { %299 = vst [vmem:[%s271_s14 + $0x20] sm:$0xff] %v298_v4  ;;  %301 = vst [vmem:[%s271_s14 + $0x28] sm:$0xff] %v300_v5  ;;  %v302_v6 = vld [vmem:[%s3916_s12 + $0x60] sm:$0xff]  ;;  %v304_v7 = vld [vmem:[%s3916_s12 + $0x68] sm:$0xff] }
  0x2f   : > { %v306_v8 = vld [vmem:[%s3916_s12 + $0x80] sm:$0xff]  ;;  %303 = vst [vmem:[%s271_s14 + $0x30] sm:$0xff] %v302_v6  ;;  %305 = vst [vmem:[%s271_s14 + $0x38] sm:$0xff] %v304_v7  ;;  %v308_v9 = vld [vmem:[%s3916_s12 + $0x88] sm:$0xff] }
  0x30   : > { %307 = vst [vmem:[%s271_s14 + $0x40] sm:$0xff] %v306_v8  ;;  %v310_v10 = vld [vmem:[%s3916_s12 + $0xa0] sm:$0xff]  ;;  %v312_v11 = vld [vmem:[%s3916_s12 + $0xa8] sm:$0xff]  ;;  %309 = vst [vmem:[%s271_s14 + $0x48] sm:$0xff] %v308_v9 }
  0x31   : > { %311 = vst [vmem:[%s271_s14 + $0x50] sm:$0xff] %v310_v10  ;;  %313 = vst [vmem:[%s271_s14 + $0x58] sm:$0xff] %v312_v11  ;;  %v314_v12 = vld [vmem:[%s3916_s12 + $0xc0] sm:$0xff]  ;;  %v316_v13 = vld [vmem:[%s3916_s12 + $0xc8] sm:$0xff] }
  0x32   : > { %v318_v14 = vld [vmem:[%s3916_s12 + $0xe0] sm:$0xff]  ;;  %315 = vst [vmem:[%s271_s14 + $0x60] sm:$0xff] %v314_v12  ;;  %317 = vst [vmem:[%s271_s14 + $0x68] sm:$0xff] %v316_v13  ;;  %v320_v15 = vld [vmem:[%s3916_s12 + $0xe8] sm:$0xff] }
  0x33   : > { %319 = vst [vmem:[%s271_s14 + $0x70] sm:$0xff] %v318_v14  ;;  %321 = vst [vmem:[%s271_s14 + $0x78] sm:$0xff] %v320_v15 }
  0x34 PF: > { %p3062_p0 = scmp.ge.s32.totalorder %s3770_s5, 1  ;;  %p326_p1 = scmp.lt.s32.totalorder %s3770_s5, 5 }
  0x36   : > { %p327_p2 = pnand %p3062_p0, %p326_p1 }
  0x37   : > { %s333_s11 = sand.u32 (!%p327_p2), 1, %s3746_s26   ;;  %s5340_s22 = sand.u32 (!%p327_p2), 1, %s3738_s24  }
  0x38   : > { %330 = sbr.rel (%p327_p2) target bundleno = 1239 (0x4d7), region = 63  ;;  %s3063_s8 = sshll.u32 (!%p327_p2), %s333_s11, 7 }
  0x39   : > { %s3064_s9 = sshll.u32 (!%p327_p2), %s5340_s22, 8  ;;  %s3065_s13 = sshll.u32 (!%p327_p2), %s3758_s29, 5 }
  0x3a   : > { %s3069_s17 = sshll.u32 (!%p327_p2), %s3754_s28, 5  ;;  %p383_p3 = scmp.lt.s32.totalorder (!%p327_p2), %s3065_s13, 63 }
  0x3b   : > { %p395_p4 = scmp.lt.s32.totalorder (!%p327_p2), %s3069_s17, 63  ;;  %s3962_s12 = scalar_lea.vmem (!%p327_p2), [#allocation6], %s3063_s8 }
  0x3c   : > { %p3073_p5 = scmp.ne.s32.totalorder (!%p327_p2), %s3754_s28, 0 }
  0x3f   : > { %s5542_s13 = smov (!%p383_p3, %s3065_s13), 63  ;;  %s5544_s17 = smov (!%p395_p4, %s3069_s17), 63 }
  0x40   : > { %s3066_s18 = sshll.u32 %s5542_s13, 2  ;;  %s3068_s15 = sshll.u32 %s5542_s13, 3  ;;  %v3772_v16 = vmov (!%p3073_p5), 0   ;;  %vm770_vm0 = vcmask (!%p3073_p5), 7168  }
  0x41   : > { %s3945_s4 = scalar_lea.vmem %s5330_s0, %s3066_s18  ;;  %s3950_s26 = scalar_lea.vmem %s5331_s1, %s3068_s15  ;;  %3431 = vset.pattern.permute.xlu1 (!%p3073_p5), %v3772_v16  ;;  %3430 = vset.pattern.permute.xlu0 (!%p3073_p5), %v3772_v16 }
  0x42   : > { %s3070_s11 = sshll.u32 %s5544_s17, 2  ;;  %s3072_s22 = sshll.u32 %s5544_s17, 3  ;;  %v451_v17 = vld [vmem:[%s3950_s26 + $0x10] sm:$0xff] (!%p3073_p5)  ;;  %v449_v18 = vld [vmem:[%s3950_s26] sm:$0xff] (!%p3073_p5)  ;;  %v452_v20 = vld [vmem:[%s3950_s26 + $0x18] sm:$0xff] (!%p3073_p5) }
  0x43   : > { %s3955_s27 = scalar_lea.vmem %s5332_s2, %s3070_s11  ;;  %s3960_s13 = scalar_lea.vmem %s5333_s3, %s3072_s22  ;;  %v450_v21 = vld [vmem:[%s3950_s26 + $0x8] sm:$0xff] (!%p3073_p5)  ;;  %v453_v27 = vld [vmem:[%s3950_s26 + $0x20] sm:$0xff] (!%p3073_p5)  ;;  %v456_v30 = vld [vmem:[%s3950_s26 + $0x38] sm:$0xff] (!%p3073_p5) }
  0x44   : > { %s3964_s18 = scalar_lea.vmem [#allocation7], %s3064_s9  ;;  %415 = sbr.rel (%p3073_p5) target bundleno = 271 (0x10f), region = 71  ;;  %v454_v26 = vld [vmem:[%s3950_s26 + $0x28] sm:$0xff] (!%p3073_p5)  ;;  %v455_v31 = vld [vmem:[%s3950_s26 + $0x30] sm:$0xff] (!%p3073_p5)  ;;  %v457_v35 = vld [vmem:[%s3950_s26 + $0x40] sm:$0xff] (!%p3073_p5) }
  0x45   : > { %s416_s7 = sld [smem:[#allocation5]] (!%p3073_p5)  ;;  %v458_v34 = vld [vmem:[%s3950_s26 + $0x48] sm:$0xff] (!%p3073_p5)  ;;  %v460_v38 = vld [vmem:[%s3950_s26 + $0x58] sm:$0xff] (!%p3073_p5)  ;;  %v459_v39 = vld [vmem:[%s3950_s26 + $0x50] sm:$0xff] (!%p3073_p5) }
  0x46   : > { %v462_v42 = vld [vmem:[%s3950_s26 + $0x68] sm:$0xff] (!%p3073_p5)  ;;  %v461_v43 = vld [vmem:[%s3950_s26 + $0x60] sm:$0xff] (!%p3073_p5)  ;;  %v464_v46 = vld [vmem:[%s3950_s26 + $0x78] sm:$0xff] (!%p3073_p5) }
  0x47   : > { %v463_v47 = vld [vmem:[%s3950_s26 + $0x70] sm:$0xff] (!%p3073_p5)  ;;  %v466_v50 = vld [vmem:[%s3950_s26 + $0x88] sm:$0xff] (!%p3073_p5)  ;;  %v465_v51 = vld [vmem:[%s3950_s26 + $0x80] sm:$0xff] (!%p3073_p5) }
  0x48   : > { %v468_v54 = vld [vmem:[%s3950_s26 + $0x98] sm:$0xff] (!%p3073_p5)  ;;  %v467_v55 = vld [vmem:[%s3950_s26 + $0x90] sm:$0xff] (!%p3073_p5)  ;;  %v470_v58 = vld [vmem:[%s3950_s26 + $0xa8] sm:$0xff] (!%p3073_p5) }
  0x49   : > { %v469_v59 = vld [vmem:[%s3950_s26 + $0xa0] sm:$0xff] (!%p3073_p5)  ;;  %v472_v62 = vld [vmem:[%s3950_s26 + $0xb8] sm:$0xff] (!%p3073_p5)  ;;  %v471_v63 = vld [vmem:[%s3950_s26 + $0xb0] sm:$0xff] (!%p3073_p5) }
  0x4a   : > { %v474_v2 = vld [vmem:[%s3950_s26 + $0xc8] sm:$0xff] (!%p3073_p5)  ;;  %v473_v3 = vld [vmem:[%s3950_s26 + $0xc0] sm:$0xff] (!%p3073_p5)  ;;  %v476_v6 = vld [vmem:[%s3950_s26 + $0xd8] sm:$0xff] (!%p3073_p5) }
  0x4b   : > { %v3969_v19 = vstv %s416_s7  ;;  %v475_v7 = vld [vmem:[%s3950_s26 + $0xd0] sm:$0xff]  ;;  %v478_v10 = vld [vmem:[%s3950_s26 + $0xe8] sm:$0xff]  ;;  %v477_v11 = vld [vmem:[%s3950_s26 + $0xe0] sm:$0xff] }
  0x4c   : > { %v484_v22 = vmul.f32 %v3969_v19, %v451_v17  ;;  %v482_v23 = vmul.f32 %v3969_v19, %v449_v18  ;;  %v485_v24 = vmul.f32 %v3969_v19, %v452_v20  ;;  %v483_v25 = vmul.f32 %v3969_v19, %v450_v21  ;;  %v480_v14 = vld [vmem:[%s3950_s26 + $0xf8] sm:$0xff]  ;;  %v479_v15 = vld [vmem:[%s3950_s26 + $0xf0] sm:$0xff]  ;;  %v3099_v20 = vld [vmem:[%s3945_s4] sm:$0xff]  }
  0x4d   : > { %v487_v28 = vmul.f32 %v3969_v19, %v454_v26  ;;  %v486_v29 = vmul.f32 %v3969_v19, %v453_v27  ;;  %v489_v32 = vmul.f32 %v3969_v19, %v456_v30  ;;  %v488_v33 = vmul.f32 %v3969_v19, %v455_v31  ;;  %v3163_v27 = vld [vmem:[%s3945_s4 + $0x10] sm:$0xff]  }
  0x4e   : > { %558 = vperm.xlu1 %3431, %v484_v22   ;;  %548 = vperm.xlu0 %3430, %v482_v23   ;;  %v491_v36 = vmul.f32 %v3969_v19, %v458_v34  ;;  %v490_v37 = vmul.f32 %v3969_v19, %v457_v35  ;;  %v493_v40 = vmul.f32 %v3969_v19, %v460_v38  ;;  %v3773_v18 = vmov 0.0  }
  0x4f   : > { %v492_v41 = vmul.f32 %v3969_v19, %v459_v39  ;;  %v495_v44 = vmul.f32 %v3969_v19, %v462_v42  ;;  %v494_v45 = vmul.f32 %v3969_v19, %v461_v43  ;;  %v497_v48 = vmul.f32 %v3969_v19, %v464_v46  ;;  %771 = vst.msk [vmem:[#allocation3] sm:$0xff] %vm770_vm0, %v3773_v18 }
  0x50   : > { %v496_v49 = vmul.f32 %v3969_v19, %v463_v47  ;;  %v499_v52 = vmul.f32 %v3969_v19, %v466_v50  ;;  %v498_v53 = vmul.f32 %v3969_v19, %v465_v51  ;;  %v501_v56 = vmul.f32 %v3969_v19, %v468_v54  ;;  %772 = vst.msk [vmem:[#allocation3 + $0x8] sm:$0xff] %vm770_vm0, %v3773_v18 }
  0x51   : > { %v500_v57 = vmul.f32 %v3969_v19, %v467_v55  ;;  %v503_v60 = vmul.f32 %v3969_v19, %v470_v58  ;;  %v502_v61 = vmul.f32 %v3969_v19, %v469_v59  ;;  %v505_v0 = vmul.f32 %v3969_v19, %v472_v62  ;;  %773 = vst.msk [vmem:[#allocation3 + $0x10] sm:$0xff] %vm770_vm0, %v3773_v18 }
  0x52   : > { %563 = vperm.xlu1 %3431, %v485_v24   ;;  %553 = vperm.xlu0 %3430, %v483_v25   ;;  %v504_v1 = vmul.f32 %v3969_v19, %v471_v63  ;;  %v507_v4 = vmul.f32 %v3969_v19, %v474_v2  ;;  %v506_v5 = vmul.f32 %v3969_v19, %v473_v3  ;;  %v3100_v24 = vunpack.c.l.bf16 %v3099_v20 }
  0x53   : > { %v509_v8 = vmul.f32 %v3969_v19, %v476_v6  ;;  %v508_v9 = vmul.f32 %v3969_v19, %v475_v7  ;;  %v511_v12 = vmul.f32 %v3969_v19, %v478_v10  ;;  %v510_v13 = vmul.f32 %v3969_v19, %v477_v11  ;;  %774 = vst.msk [vmem:[#allocation3 + $0x18] sm:$0xff] %vm770_vm0, %v3773_v18 }
  0x54   : > { %v513_v16 = vmul.f32 %v3969_v19, %v480_v14  ;;  %v512_v17 = vmul.f32 %v3969_v19, %v479_v15  ;;  %775 = vst.msk [vmem:[#allocation3 + $0x20] sm:$0xff] %vm770_vm0, %v3773_v18  ;;  %776 = vst.msk [vmem:[#allocation3 + $0x28] sm:$0xff] %vm770_vm0, %v3773_v18  ;;  %v3162_v19 = vld [vmem:[%s3945_s4 + $0x8] sm:$0xff]   ;;  %v3101_v26 = vunpack.c.h.bf16 %v3099_v20  ;;  %v3109_v30 = vunpack.c.h.bf16 %v3163_v27 }
  0x55   : > { %777 = vst.msk [vmem:[#allocation3 + $0x30] sm:$0xff] %vm770_vm0, %v3773_v18  ;;  %778 = vst.msk [vmem:[#allocation3 + $0x38] sm:$0xff] %vm770_vm0, %v3773_v18  ;;  %v3104_v23 = vunpack.c.l.bf16 %v3162_v19  ;;  %v3105_v25 = vunpack.c.h.bf16 %v3162_v19  ;;  %v3108_v31 = vunpack.c.l.bf16 %v3163_v27 }
  0x56   : > { %573 = vperm.xlu1 %3431, %v487_v28   ;;  %568 = vperm.xlu0 %3430, %v486_v29   ;;  %779 = vst.msk [vmem:[#allocation3 + $0x40] sm:$0xff] %vm770_vm0, %v3773_v18  ;;  %780 = vst.msk [vmem:[#allocation3 + $0x48] sm:$0xff] %vm770_vm0, %v3773_v18 }
  0x57   : > { %781 = vst.msk [vmem:[#allocation3 + $0x50] sm:$0xff] %vm770_vm0, %v3773_v18  ;;  %782 = vst.msk [vmem:[#allocation3 + $0x58] sm:$0xff] %vm770_vm0, %v3773_v18 }
  0x58   : > { %783 = vst.msk [vmem:[#allocation3 + $0x60] sm:$0xff] %vm770_vm0, %v3773_v18  ;;  %784 = vst.msk [vmem:[#allocation3 + $0x68] sm:$0xff] %vm770_vm0, %v3773_v18 }
  0x59   : > { %785 = vst.msk [vmem:[#allocation3 + $0x70] sm:$0xff] %vm770_vm0, %v3773_v18  ;;  %786 = vst.msk [vmem:[#allocation3 + $0x78] sm:$0xff] %vm770_vm0, %v3773_v18 }
  0x5a   : > { %583 = vperm.xlu1 %3431, %v489_v32   ;;  %578 = vperm.xlu0 %3430, %v488_v33   ;;  %787 = vst.msk [vmem:[#allocation3 + $0x80] sm:$0xff] %vm770_vm0, %v3773_v18  ;;  %788 = vst.msk [vmem:[#allocation3 + $0x88] sm:$0xff] %vm770_vm0, %v3773_v18 }
  0x5b   : > { %789 = vst.msk [vmem:[#allocation3 + $0x90] sm:$0xff] %vm770_vm0, %v3773_v18  ;;  %790 = vst.msk [vmem:[#allocation3 + $0x98] sm:$0xff] %vm770_vm0, %v3773_v18 }
  0x5c   : > { %791 = vst.msk [vmem:[#allocation3 + $0xa0] sm:$0xff] %vm770_vm0, %v3773_v18  ;;  %792 = vst.msk [vmem:[#allocation3 + $0xa8] sm:$0xff] %vm770_vm0, %v3773_v18 }
  0x5d   : > { %793 = vst.msk [vmem:[#allocation3 + $0xb0] sm:$0xff] %vm770_vm0, %v3773_v18  ;;  %794 = vst.msk [vmem:[#allocation3 + $0xb8] sm:$0xff] %vm770_vm0, %v3773_v18 }
  0x5e   : > { %593 = vperm.xlu1 %3431, %v491_v36   ;;  %588 = vperm.xlu0 %3430, %v490_v37   ;;  %795 = vst.msk [vmem:[#allocation3 + $0xc0] sm:$0xff] %vm770_vm0, %v3773_v18  ;;  %796 = vst.msk [vmem:[#allocation3 + $0xc8] sm:$0xff] %vm770_vm0, %v3773_v18  ;;  %v3164_v36 = vld [vmem:[%s3945_s4 + $0x18] sm:$0xff]  }
  0x5f   : > { %797 = vst.msk [vmem:[#allocation3 + $0xd0] sm:$0xff] %vm770_vm0, %v3773_v18  ;;  %798 = vst.msk [vmem:[#allocation3 + $0xd8] sm:$0xff] %vm770_vm0, %v3773_v18  ;;  %v3113_v43 = vunpack.c.h.bf16 %v3164_v36 }
  0x60   : > { %799 = vst.msk [vmem:[#allocation3 + $0xe0] sm:$0xff] %vm770_vm0, %v3773_v18  ;;  %800 = vst.msk [vmem:[#allocation3 + $0xe8] sm:$0xff] %vm770_vm0, %v3773_v18 }
  0x61   : > { %801 = vst.msk [vmem:[#allocation3 + $0xf0] sm:$0xff] %vm770_vm0, %v3773_v18  ;;  %802 = vst.msk [vmem:[#allocation3 + $0xf8] sm:$0xff] %vm770_vm0, %v3773_v18 }
  0x62   : > { %603 = vperm.xlu1 %3431, %v493_v40   ;;  %598 = vperm.xlu0 %3430, %v492_v41   ;;  %803 = vst [vmem:[#allocation4] sm:$0xff] %v3773_v18  ;;  %804 = vst [vmem:[#allocation4 + $0x8] sm:$0xff] %v3773_v18 }
  0x63   : > { %805 = vst [vmem:[#allocation4 + $0x10] sm:$0xff] %v3773_v18  ;;  %806 = vst [vmem:[#allocation4 + $0x18] sm:$0xff] %v3773_v18 }
  0x64   : > { %807 = vst [vmem:[#allocation4 + $0x20] sm:$0xff] %v3773_v18  ;;  %808 = vst [vmem:[#allocation4 + $0x28] sm:$0xff] %v3773_v18 }
  0x65   : > { %809 = vst [vmem:[#allocation4 + $0x30] sm:$0xff] %v3773_v18  ;;  %810 = vst [vmem:[#allocation4 + $0x38] sm:$0xff] %v3773_v18 }
  0x66   : > { %613 = vperm.xlu1 %3431, %v495_v44   ;;  %608 = vperm.xlu0 %3430, %v494_v45   ;;  %811 = vst [vmem:[#allocation4 + $0x40] sm:$0xff] %v3773_v18  ;;  %812 = vst [vmem:[#allocation4 + $0x48] sm:$0xff] %v3773_v18  ;;  %v3112_v44 = vunpack.c.l.bf16 %v3164_v36  ;;  %v3165_v45 = vld [vmem:[%s3945_s4 + $0x20] sm:$0xff]  }
  0x67   : > { %813 = vst [vmem:[#allocation4 + $0x50] sm:$0xff] %v3773_v18  ;;  %814 = vst [vmem:[#allocation4 + $0x58] sm:$0xff] %v3773_v18  ;;  %v3117_v51 = vunpack.c.h.bf16 %v3165_v45 }
  0x68   : > { %815 = vst [vmem:[#allocation4 + $0x60] sm:$0xff] %v3773_v18  ;;  %816 = vst [vmem:[#allocation4 + $0x68] sm:$0xff] %v3773_v18 }
  0x69   : > { %817 = vst [vmem:[#allocation4 + $0x70] sm:$0xff] %v3773_v18  ;;  %818 = vst [vmem:[#allocation4 + $0x78] sm:$0xff] %v3773_v18 }
  0x6a   : > { %623 = vperm.xlu1 %3431, %v497_v48   ;;  %618 = vperm.xlu0 %3430, %v496_v49   ;;  %819 = vst [vmem:[#allocation4 + $0x80] sm:$0xff] %v3773_v18  ;;  %820 = vst [vmem:[#allocation4 + $0x88] sm:$0xff] %v3773_v18 }
  0x6b   : > { %821 = vst [vmem:[#allocation4 + $0x90] sm:$0xff] %v3773_v18  ;;  %822 = vst [vmem:[#allocation4 + $0x98] sm:$0xff] %v3773_v18 }
  0x6c   : > { %823 = vst [vmem:[#allocation4 + $0xa0] sm:$0xff] %v3773_v18  ;;  %824 = vst [vmem:[#allocation4 + $0xa8] sm:$0xff] %v3773_v18 }
  0x6d   : > { %825 = vst [vmem:[#allocation4 + $0xb0] sm:$0xff] %v3773_v18  ;;  %826 = vst [vmem:[#allocation4 + $0xb8] sm:$0xff] %v3773_v18 }
  0x6e   : > { %633 = vperm.xlu1 %3431, %v499_v52   ;;  %628 = vperm.xlu0 %3430, %v498_v53   ;;  %827 = vst [vmem:[#allocation4 + $0xc0] sm:$0xff] %v3773_v18  ;;  %828 = vst [vmem:[#allocation4 + $0xc8] sm:$0xff] %v3773_v18  ;;  %v3116_v52 = vunpack.c.l.bf16 %v3165_v45  ;;  %v3166_v53 = vld [vmem:[%s3945_s4 + $0x28] sm:$0xff]   ;;  %v3173_v45 = vld [vmem:[%s3945_s4 + $0x60] sm:$0xff]  }
  0x6f   : > { %829 = vst [vmem:[#allocation4 + $0xd0] sm:$0xff] %v3773_v18  ;;  %830 = vst [vmem:[#allocation4 + $0xd8] sm:$0xff] %v3773_v18  ;;  %v3121_v59 = vunpack.c.h.bf16 %v3166_v53 }
  0x70   : > { %831 = vst [vmem:[#allocation4 + $0xe0] sm:$0xff] %v3773_v18  ;;  %832 = vst [vmem:[#allocation4 + $0xe8] sm:$0xff] %v3773_v18 }
  0x71   : > { %833 = vst [vmem:[#allocation4 + $0xf0] sm:$0xff] %v3773_v18  ;;  %834 = vst [vmem:[#allocation4 + $0xf8] sm:$0xff] %v3773_v18 }
  0x72   : > { %643 = vperm.xlu1 %3431, %v501_v56   ;;  %638 = vperm.xlu0 %3430, %v500_v57  }
  0x76   : > { %653 = vperm.xlu1 %3431, %v503_v60   ;;  %648 = vperm.xlu0 %3430, %v502_v61   ;;  %v3120_v60 = vunpack.c.l.bf16 %v3166_v53  ;;  %v3167_v61 = vld [vmem:[%s3945_s4 + $0x30] sm:$0xff]   ;;  %v3174_v53 = vld [vmem:[%s3945_s4 + $0x68] sm:$0xff]  }
  0x77   : > { %v3125_v3 = vunpack.c.h.bf16 %v3167_v61 }
  0x7a   : > { %663 = vperm.xlu1 %3431, %v505_v0   ;;  %658 = vperm.xlu0 %3430, %v504_v1  }
  0x7e   : > { %673 = vperm.xlu1 %3431, %v507_v4   ;;  %668 = vperm.xlu0 %3430, %v506_v5   ;;  %v3124_v4 = vunpack.c.l.bf16 %v3167_v61  ;;  %v3168_v5 = vld [vmem:[%s3945_s4 + $0x38] sm:$0xff]   ;;  %v3175_v61 = vld [vmem:[%s3945_s4 + $0x70] sm:$0xff]  }
  0x7f   : > { %v3129_v11 = vunpack.c.h.bf16 %v3168_v5 }
  0x82   : > { %683 = vperm.xlu1 %3431, %v509_v8   ;;  %678 = vperm.xlu0 %3430, %v508_v9  }
  0x86   : > { %693 = vperm.xlu1 %3431, %v511_v12   ;;  %688 = vperm.xlu0 %3430, %v510_v13   ;;  %v3128_v12 = vunpack.c.l.bf16 %v3168_v5  ;;  %v3169_v13 = vld [vmem:[%s3945_s4 + $0x40] sm:$0xff]   ;;  %v3176_v5 = vld [vmem:[%s3945_s4 + $0x78] sm:$0xff]  }
  0x87   : > { %v3133_v19 = vunpack.c.h.bf16 %v3169_v13  ;;  %v3132_v20 = vunpack.c.l.bf16 %v3169_v13 }
  0x8a   : > { %703 = vperm.xlu1 %3431, %v513_v16   ;;  %698 = vperm.xlu0 %3430, %v512_v17  }
  0xcd   : > { %v559_v21 = vpop.permute.xlu1 %558  ;;  %v549_v22 = vpop.permute.xlu0 %548 }
  0xce   : > { %v708_v32 = vmul.f32 %v3104_v23, %v559_v21  ;;  %v706_v33 = vmul.f32 %v3100_v24, %v549_v22  ;;  %v3170_v21 = vld [vmem:[%s3945_s4 + $0x48] sm:$0xff]  }
  0xcf   : > { %v3137_v27 = vunpack.c.h.bf16 %v3170_v21 }
  0xd1   : > { %v564_v28 = vpop.permute.xlu1 %563  ;;  %v554_v29 = vpop.permute.xlu0 %553 }
  0xd2   : > { %v709_v34 = vmul.f32 %v3105_v25, %v564_v28  ;;  %v707_v35 = vmul.f32 %v3101_v26, %v554_v29  ;;  %v3136_v28 = vunpack.c.l.bf16 %v3170_v21  ;;  %v3171_v29 = vld [vmem:[%s3945_s4 + $0x50] sm:$0xff]  }
  0xd3   : > { %v3140_v36 = vunpack.c.l.bf16 %v3171_v29 }
  0xd4   : > { %v739_v37 = vpack.c.bf16 %v709_v34, %v708_v32  ;;  %v738_v38 = vpack.c.bf16 %v707_v35, %v706_v33  ;;  %v3141_v35 = vunpack.c.h.bf16 %v3171_v29 }
  0xd5   : > { %v574_v39 = vpop.permute.xlu1 %573  ;;  %v569_v40 = vpop.permute.xlu0 %568 }
  0xd6   : > { %755 = vst [vmem:[#allocation2 + $0x8] sm:$0xff] %v739_v37  ;;  %754 = vst [vmem:[#allocation2] sm:$0xff] %v738_v38  ;;  %v711_v41 = vmul.f32 %v3109_v30, %v574_v39  ;;  %v710_v42 = vmul.f32 %v3108_v31, %v569_v40  ;;  %v3172_v37 = vld [vmem:[%s3945_s4 + $0x58] sm:$0xff]  }
  0xd8   : > { %v740_v46 = vpack.c.bf16 %v711_v41, %v710_v42 }
  0xd9   : > { %v584_v47 = vpop.permute.xlu1 %583  ;;  %v579_v48 = vpop.permute.xlu0 %578 }
  0xda   : > { %756 = vst [vmem:[#allocation2 + $0x10] sm:$0xff] %v740_v46  ;;  %v713_v49 = vmul.f32 %v3113_v43, %v584_v47  ;;  %v712_v50 = vmul.f32 %v3112_v44, %v579_v48  ;;  %v3145_v43 = vunpack.c.h.bf16 %v3172_v37  ;;  %v3144_v44 = vunpack.c.l.bf16 %v3172_v37 }
  0xdc   : > { %v741_v54 = vpack.c.bf16 %v713_v49, %v712_v50 }
  0xdd   : > { %v594_v55 = vpop.permute.xlu1 %593  ;;  %v589_v56 = vpop.permute.xlu0 %588 }
  0xde   : > { %757 = vst [vmem:[#allocation2 + $0x18] sm:$0xff] %v741_v54  ;;  %v715_v57 = vmul.f32 %v3117_v51, %v594_v55  ;;  %v714_v58 = vmul.f32 %v3116_v52, %v589_v56  ;;  %v3149_v51 = vunpack.c.h.bf16 %v3173_v45  ;;  %v3148_v52 = vunpack.c.l.bf16 %v3173_v45 }
  0xe0   : > { %v742_v62 = vpack.c.bf16 %v715_v57, %v714_v58 }
  0xe1   : > { %v604_v63 = vpop.permute.xlu1 %603  ;;  %v599_v0 = vpop.permute.xlu0 %598 }
  0xe2   : > { %758 = vst [vmem:[#allocation2 + $0x20] sm:$0xff] %v742_v62  ;;  %v717_v1 = vmul.f32 %v3121_v59, %v604_v63  ;;  %v716_v2 = vmul.f32 %v3120_v60, %v599_v0  ;;  %v3153_v59 = vunpack.c.h.bf16 %v3174_v53  ;;  %v3152_v60 = vunpack.c.l.bf16 %v3174_v53 }
  0xe4   : > { %v743_v6 = vpack.c.bf16 %v717_v1, %v716_v2 }
  0xe5   : > { %v614_v7 = vpop.permute.xlu1 %613  ;;  %v609_v8 = vpop.permute.xlu0 %608 }
  0xe6   : > { %759 = vst [vmem:[#allocation2 + $0x28] sm:$0xff] %v743_v6  ;;  %v719_v9 = vmul.f32 %v3125_v3, %v614_v7  ;;  %v718_v10 = vmul.f32 %v3124_v4, %v609_v8  ;;  %v3157_v3 = vunpack.c.h.bf16 %v3175_v61  ;;  %v3156_v4 = vunpack.c.l.bf16 %v3175_v61 }
  0xe8   : > { %v744_v14 = vpack.c.bf16 %v719_v9, %v718_v10 }
  0xe9   : > { %v624_v15 = vpop.permute.xlu1 %623  ;;  %v619_v16 = vpop.permute.xlu0 %618 }
  0xea   : > { %760 = vst [vmem:[#allocation2 + $0x30] sm:$0xff] %v744_v14  ;;  %v721_v17 = vmul.f32 %v3129_v11, %v624_v15  ;;  %v720_v18 = vmul.f32 %v3128_v12, %v619_v16  ;;  %v3161_v11 = vunpack.c.h.bf16 %v3176_v5  ;;  %v3160_v12 = vunpack.c.l.bf16 %v3176_v5 }
  0xec   : > { %v745_v22 = vpack.c.bf16 %v721_v17, %v720_v18 }
  0xed   : > { %v634_v23 = vpop.permute.xlu1 %633  ;;  %v629_v24 = vpop.permute.xlu0 %628 }
  0xee   : > { %761 = vst [vmem:[#allocation2 + $0x38] sm:$0xff] %v745_v22  ;;  %v723_v25 = vmul.f32 %v3133_v19, %v634_v23  ;;  %v722_v26 = vmul.f32 %v3132_v20, %v629_v24 }
  0xf0   : > { %v746_v30 = vpack.c.bf16 %v723_v25, %v722_v26 }
  0xf1   : > { %v644_v31 = vpop.permute.xlu1 %643  ;;  %v639_v32 = vpop.permute.xlu0 %638 }
  0xf2   : > { %762 = vst [vmem:[#allocation2 + $0x40] sm:$0xff] %v746_v30  ;;  %v725_v33 = vmul.f32 %v3137_v27, %v644_v31  ;;  %v724_v34 = vmul.f32 %v3136_v28, %v639_v32 }
  0xf4   : > { %v747_v38 = vpack.c.bf16 %v725_v33, %v724_v34 }
  0xf5   : > { %v654_v39 = vpop.permute.xlu1 %653  ;;  %v649_v40 = vpop.permute.xlu0 %648 }
  0xf6   : > { %763 = vst [vmem:[#allocation2 + $0x48] sm:$0xff] %v747_v38  ;;  %v727_v41 = vmul.f32 %v3141_v35, %v654_v39  ;;  %v726_v42 = vmul.f32 %v3140_v36, %v649_v40 }
  0xf8   : > { %v748_v46 = vpack.c.bf16 %v727_v41, %v726_v42 }
  0xf9   : > { %v664_v47 = vpop.permute.xlu1 %663  ;;  %v659_v48 = vpop.permute.xlu0 %658 }
  0xfa   : > { %764 = vst [vmem:[#allocation2 + $0x50] sm:$0xff] %v748_v46  ;;  %v729_v49 = vmul.f32 %v3145_v43, %v664_v47  ;;  %v728_v50 = vmul.f32 %v3144_v44, %v659_v48 }
  0xfc   : > { %v749_v54 = vpack.c.bf16 %v729_v49, %v728_v50 }
  0xfd   : > { %v674_v55 = vpop.permute.xlu1 %673  ;;  %v669_v56 = vpop.permute.xlu0 %668 }
  0xfe   : > { %765 = vst [vmem:[#allocation2 + $0x58] sm:$0xff] %v749_v54  ;;  %v731_v57 = vmul.f32 %v3149_v51, %v674_v55  ;;  %v730_v58 = vmul.f32 %v3148_v52, %v669_v56 }
 0x100   : > { %v750_v62 = vpack.c.bf16 %v731_v57, %v730_v58 }
 0x101   : > { %v684_v63 = vpop.permute.xlu1 %683  ;;  %v679_v0 = vpop.permute.xlu0 %678 }
 0x102   : > { %766 = vst [vmem:[#allocation2 + $0x60] sm:$0xff] %v750_v62  ;;  %v733_v1 = vmul.f32 %v3153_v59, %v684_v63  ;;  %v732_v2 = vmul.f32 %v3152_v60, %v679_v0 }
 0x104   : > { %v751_v6 = vpack.c.bf16 %v733_v1, %v732_v2 }
 0x105   : > { %v694_v7 = vpop.permute.xlu1 %693  ;;  %v689_v8 = vpop.permute.xlu0 %688 }
 0x106   : > { %767 = vst [vmem:[#allocation2 + $0x68] sm:$0xff] %v751_v6  ;;  %v735_v9 = vmul.f32 %v3157_v3, %v694_v7  ;;  %v734_v10 = vmul.f32 %v3156_v4, %v689_v8 }
 0x108   : > { %v752_v13 = vpack.c.bf16 %v735_v9, %v734_v10 }
 0x109   : > { %v704_v14 = vpop.permute.xlu1 %703  ;;  %v699_v15 = vpop.permute.xlu0 %698 }
 0x10a   : > { %768 = vst [vmem:[#allocation2 + $0x70] sm:$0xff] %v752_v13  ;;  %v737_v16 = vmul.f32 %v3161_v11, %v704_v14  ;;  %v736_v17 = vmul.f32 %v3160_v12, %v699_v15 }
 0x10c   : > { %v753_v18 = vpack.c.bf16 %v737_v16, %v736_v17 }
 0x10e   : > { %769 = vst [vmem:[#allocation2 + $0x78] sm:$0xff] %v753_v18 }
 0x10f PF: > { %v883_v19 = vld [vmem:[%s3960_s13 + $0x80] sm:$0xff]  ;;  %v3774_v21 = vmov 0   ;;  %v884_v22 = vld [vmem:[%s3960_s13 + $0x88] sm:$0xff]  ;;  %v885_v24 = vld [vmem:[%s3960_s13 + $0x90] sm:$0xff]  ;;  %s4289_s4 = sld [smem:[#allocation5]]  ;;  %p3090_p6 = scmp.ne.s32.totalorder %s3754_s28, 1 }
 0x110   : > { %v867_v20 = vld [vmem:[%s3960_s13] sm:$0xff]  ;;  %3433 = vset.pattern.permute.xlu1 %v3774_v21  ;;  %3432 = vset.pattern.permute.xlu0 %v3774_v21  ;;  %v868_v23 = vld [vmem:[%s3960_s13 + $0x8] sm:$0xff]  ;;  %v886_v25 = vld [vmem:[%s3960_s13 + $0x98] sm:$0xff] }
 0x111   : > { %1013 = vperm.xlu0 %3432, %v883_v19   ;;  %933 = vperm.xlu1 %3433, %v867_v20   ;;  %v869_v26 = vld [vmem:[%s3960_s13 + $0x10] sm:$0xff]  ;;  %v870_v27 = vld [vmem:[%s3960_s13 + $0x18] sm:$0xff]  ;;  %v887_v28 = vld [vmem:[%s3960_s13 + $0xa0] sm:$0xff] }
 0x112   : > { %v888_v29 = vld [vmem:[%s3960_s13 + $0xa8] sm:$0xff]  ;;  %v871_v30 = vld [vmem:[%s3960_s13 + $0x20] sm:$0xff]  ;;  %v889_v32 = vld [vmem:[%s3960_s13 + $0xb0] sm:$0xff] }
 0x113   : > { %v872_v31 = vld [vmem:[%s3960_s13 + $0x28] sm:$0xff]  ;;  %v890_v33 = vld [vmem:[%s3960_s13 + $0xb8] sm:$0xff]  ;;  %v873_v34 = vld [vmem:[%s3960_s13 + $0x30] sm:$0xff] }
 0x114   : > { %v874_v35 = vld [vmem:[%s3960_s13 + $0x38] sm:$0xff]  ;;  %v891_v36 = vld [vmem:[%s3960_s13 + $0xc0] sm:$0xff]  ;;  %v892_v37 = vld [vmem:[%s3960_s13 + $0xc8] sm:$0xff] }
 0x115   : > { %1018 = vperm.xlu0 %3432, %v884_v22   ;;  %938 = vperm.xlu1 %3433, %v868_v23   ;;  %v875_v38 = vld [vmem:[%s3960_s13 + $0x40] sm:$0xff]  ;;  %v876_v39 = vld [vmem:[%s3960_s13 + $0x48] sm:$0xff]  ;;  %v893_v40 = vld [vmem:[%s3960_s13 + $0xd0] sm:$0xff]  ;;  %s1349_s25 = sand.u32 2147483647, %s4289_s4 }
 0x116   : > { %v894_v41 = vld [vmem:[%s3960_s13 + $0xd8] sm:$0xff]  ;;  %v877_v42 = vld [vmem:[%s3960_s13 + $0x50] sm:$0xff]  ;;  %v895_v44 = vld [vmem:[%s3960_s13 + $0xe0] sm:$0xff] }
 0x117   : > { %v878_v43 = vld [vmem:[%s3960_s13 + $0x58] sm:$0xff]  ;;  %v896_v45 = vld [vmem:[%s3960_s13 + $0xe8] sm:$0xff]  ;;  %v879_v46 = vld [vmem:[%s3960_s13 + $0x60] sm:$0xff] }
 0x118   : > { %v880_v47 = vld [vmem:[%s3960_s13 + $0x68] sm:$0xff]  ;;  %v897_v48 = vld [vmem:[%s3960_s13 + $0xf0] sm:$0xff]  ;;  %v898_v49 = vld [vmem:[%s3960_s13 + $0xf8] sm:$0xff] }
 0x119   : > { %1023 = vperm.xlu0 %3432, %v885_v24   ;;  %1028 = vperm.xlu1 %3433, %v886_v25   ;;  %v881_v50 = vld [vmem:[%s3960_s13 + $0x70] sm:$0xff]  ;;  %v882_v51 = vld [vmem:[%s3960_s13 + $0x78] sm:$0xff]  ;;  %v4179_v52 = vld [vmem:[#allocation2] sm:$0xff] }
 0x11a   : > { %3193 = vmatprep.mubr.bf16.mxu0 %v4179_v52  ;;  %v4183_v53 = vld [vmem:[%s3955_s27 + $0x40] sm:$0xff]   ;;  %v4193_v61 = vld [vmem:[%s3955_s27 + $0x48] sm:$0xff]   ;;  %v4203_v15 = vld [vmem:[%s3955_s27 + $0x50] sm:$0xff]  }
 0x11b   : > { %v4186_v54 = vld [vmem:[%s3955_s27] sm:$0xff]   ;;  %v915_v57 = vunpack.c.l.bf16 %v4183_v53  ;;  %v916_v59 = vunpack.c.h.bf16 %v4183_v53  ;;  %v917_v0 = vunpack.c.l.bf16 %v4193_v61  ;;  %v918_v1 = vunpack.c.h.bf16 %v4193_v61  ;;  %v4198_v6 = vld [vmem:[%s3955_s27 + $0x8] sm:$0xff]   ;;  %v4208_v24 = vld [vmem:[%s3955_s27 + $0x10] sm:$0xff]   ;;  %3225 = vmatprep.subr.bf16.mxu1 %v4183_v53 }
 0x11c   : > { %v899_v58 = vunpack.c.l.bf16 %v4186_v54  ;;  %v900_v60 = vunpack.c.h.bf16 %v4186_v54  ;;  %v901_v13 = vunpack.c.l.bf16 %v4198_v6  ;;  %v902_v14 = vunpack.c.h.bf16 %v4198_v6  ;;  %3226 = vmatpush3.bf16.msra.mxu1 %v4186_v54  ;;  %v1144_v53 = vld [vmem:[#allocation2 + $0x28] sm:$0xff]  ;;  %v1145_v54 = vld [vmem:[#allocation2 + $0x30] sm:$0xff] }
 0x11d   : > { %943 = vperm.xlu0 %3432, %v869_v26   ;;  %948 = vperm.xlu1 %3433, %v870_v27   ;;  %v919_v22 = vunpack.c.l.bf16 %v4203_v15  ;;  %v920_v23 = vunpack.c.h.bf16 %v4203_v15 }
 0x11e   : > { %3227 = vmatprep.subr.bf16.mxu1 %v4193_v61  ;;  %v1146_v61 = vld [vmem:[#allocation2 + $0x38] sm:$0xff] }
 0x120   : > { %3228 = vmatpush3.bf16.msra.mxu1 %v4198_v6  ;;  %v1148_v6 = vld [vmem:[#allocation2 + $0x48] sm:$0xff] }
 0x121   : > { %1033 = vperm.xlu0 %3432, %v887_v28   ;;  %1038 = vperm.xlu1 %3433, %v888_v29  }
 0x122   : > { %3229 = vmatprep.subr.bf16.mxu1 %v4203_v15  ;;  %v1149_v15 = vld [vmem:[#allocation2 + $0x50] sm:$0xff] }
 0x124   : > { %3230 = vmatpush3.bf16.msra.mxu1 %v4208_v24 }
 0x125   : > { %953 = vperm.xlu0 %3432, %v871_v30   ;;  %958 = vperm.xlu1 %3433, %v872_v31   ;;  %v903_v30 = vunpack.c.l.bf16 %v4208_v24  ;;  %v904_v31 = vunpack.c.h.bf16 %v4208_v24  ;;  %v1153_v24 = vld [vmem:[#allocation2 + $0x70] sm:$0xff] }
 0x129   : > { %1043 = vperm.xlu0 %3432, %v889_v32   ;;  %1048 = vperm.xlu1 %3433, %v890_v33   ;;  %v4213_v32 = vld [vmem:[%s3955_s27 + $0x58] sm:$0xff]  }
 0x12a   : > { %3231 = vmatprep.subr.bf16.mxu1 %v4213_v32 }
 0x12d   : > { %963 = vperm.xlu0 %3432, %v873_v34   ;;  %968 = vperm.xlu1 %3433, %v874_v35  }
 0x131   : > { %1053 = vperm.xlu0 %3432, %v891_v36   ;;  %1058 = vperm.xlu1 %3433, %v892_v37  }
 0x135   : > { %973 = vperm.xlu0 %3432, %v875_v38   ;;  %978 = vperm.xlu1 %3433, %v876_v39   ;;  %v921_v38 = vunpack.c.l.bf16 %v4213_v32  ;;  %v922_v39 = vunpack.c.h.bf16 %v4213_v32  ;;  %v1154_v32 = vld [vmem:[#allocation2 + $0x78] sm:$0xff] }
 0x139   : > { %1063 = vperm.xlu0 %3432, %v893_v40   ;;  %1068 = vperm.xlu1 %3433, %v894_v41   ;;  %v4218_v40 = vld [vmem:[%s3955_s27 + $0x18] sm:$0xff]  }
 0x13a   : > { %3232 = vmatpush3.bf16.msra.mxu1 %v4218_v40 }
 0x13d   : > { %983 = vperm.xlu0 %3432, %v877_v42   ;;  %988 = vperm.xlu1 %3433, %v878_v43  }
 0x141   : > { %1073 = vperm.xlu0 %3432, %v895_v44   ;;  %1078 = vperm.xlu1 %3433, %v896_v45  }
 0x145   : > { %993 = vperm.xlu0 %3432, %v879_v46   ;;  %998 = vperm.xlu1 %3433, %v880_v47   ;;  %v905_v46 = vunpack.c.l.bf16 %v4218_v40  ;;  %v906_v47 = vunpack.c.h.bf16 %v4218_v40  ;;  %v1350_v40 = vld [vmem:[%s3962_s12] sm:$0xff] }
 0x146   : > { %vm1366_vm1 = vnez %v1350_v40 }
 0x149   : > { %1083 = vperm.xlu0 %3432, %v897_v48   ;;  %1088 = vperm.xlu1 %3433, %v898_v49   ;;  %v4223_v48 = vld [vmem:[%s3955_s27 + $0x60] sm:$0xff]  }
 0x14a   : > { %3233 = vmatprep.subr.bf16.mxu1 %v4223_v48 }
 0x14d   : > { %1003 = vperm.xlu0 %3432, %v881_v50   ;;  %1008 = vperm.xlu1 %3433, %v882_v51  }
 0x190   : > { %v1014_v55 = vpop.permute.xlu0 %1013  ;;  %v934_v56 = vpop.permute.xlu1 %933 }
 0x191   : > { %v1107_v2 = vmul.f32 %v1014_v55, %v915_v57  ;;  %v1091_v3 = vmul.f32 %v934_v56, %v899_v58  ;;  %v923_v57 = vunpack.c.l.bf16 %v4223_v48  ;;  %v924_v58 = vunpack.c.h.bf16 %v4223_v48  ;;  %v1351_v48 = vld [vmem:[%s3962_s12 + $0x8] sm:$0xff] }
 0x192   : > { %vm1367_vm2 = vnez %v1351_v48 }
 0x194   : > { %v1019_v62 = vpop.permute.xlu0 %1018  ;;  %v939_v63 = vpop.permute.xlu1 %938 }
 0x195   : > { %v1108_v4 = vmul.f32 %v1019_v62, %v916_v59  ;;  %v1092_v5 = vmul.f32 %v939_v63, %v900_v60  ;;  %v4228_v59 = vld [vmem:[%s3955_s27 + $0x20] sm:$0xff]  }
 0x196   : > { %3234 = vmatpush3.bf16.msra.mxu1 %v4228_v59 }
 0x197   : > { %v1131_v7 = vpack.c.bf16 %v1108_v4, %v1107_v2  ;;  %v1123_v8 = vpack.c.bf16 %v1092_v5, %v1091_v3  ;;  %v907_v2 = vunpack.c.l.bf16 %v4228_v59  ;;  %v908_v3 = vunpack.c.h.bf16 %v4228_v59  ;;  %v4233_v4 = vld [vmem:[%s3955_s27 + $0x68] sm:$0xff]   ;;  %v1352_v59 = vld [vmem:[%s3962_s12 + $0x10] sm:$0xff] }
 0x198   : > { %v1024_v9 = vpop.permute.xlu0 %1023  ;;  %v1029_v10 = vpop.permute.xlu1 %1028  ;;  %3235 = vmatprep.subr.bf16.mxu1 %v4233_v4  ;;  %vm1368_vm3 = vnez %v1352_v59 }
 0x199   : > { %v1109_v11 = vmul.f32 %v1024_v9, %v917_v0  ;;  %v1110_v12 = vmul.f32 %v1029_v10, %v918_v1  ;;  %3177 = vmatprep.subr.bf16.mxu0 %v1131_v7 }
 0x19a   : > { %3178 = vmatpush3.bf16.xpose.msra.mxu0 %v1123_v8 }
 0x19b   : > { %v1132_v16 = vpack.c.bf16 %v1110_v12, %v1109_v11  ;;  %v925_v11 = vunpack.c.l.bf16 %v4233_v4  ;;  %v926_v12 = vunpack.c.h.bf16 %v4233_v4  ;;  %v1353_v4 = vld [vmem:[%s3962_s12 + $0x18] sm:$0xff] }
 0x19c   : > { %v944_v17 = vpop.permute.xlu0 %943  ;;  %v949_v18 = vpop.permute.xlu1 %948  ;;  %vm1369_vm4 = vnez %v1353_v4 }
 0x19d   : > { %v1093_v19 = vmul.f32 %v944_v17, %v901_v13  ;;  %v1094_v20 = vmul.f32 %v949_v18, %v902_v14  ;;  %3179 = vmatprep.subr.bf16.mxu0 %v1132_v16  ;;  %v4238_v13 = vld [vmem:[%s3955_s27 + $0x28] sm:$0xff]  }
 0x19e   : > { %3236 = vmatpush3.bf16.msra.mxu1 %v4238_v13 }
 0x19f   : > { %v1124_v25 = vpack.c.bf16 %v1094_v20, %v1093_v19  ;;  %v909_v20 = vunpack.c.l.bf16 %v4238_v13 }
 0x1a0   : > { %v1034_v26 = vpop.permute.xlu0 %1033  ;;  %v1039_v27 = vpop.permute.xlu1 %1038 }
 0x1a1   : > { %v1111_v28 = vmul.f32 %v1034_v26, %v919_v22  ;;  %v1112_v29 = vmul.f32 %v1039_v27, %v920_v23  ;;  %v910_v22 = vunpack.c.h.bf16 %v4238_v13  ;;  %v4243_v23 = vld [vmem:[%s3955_s27 + $0x70] sm:$0xff]   ;;  %v1447_v13 = vsel %vm1366_vm1, 16843009, %v3774_v21 }
 0x1a2   : > { %3180 = vmatpush3.bf16.xpose.msra.mxu0 %v1124_v25  ;;  %3237 = vmatprep.subr.bf16.mxu1 %v4243_v23 }
 0x1a3   : > { %v1133_v33 = vpack.c.bf16 %v1112_v29, %v1111_v28 }
 0x1a4   : > { %v954_v34 = vpop.permute.xlu0 %953  ;;  %v959_v35 = vpop.permute.xlu1 %958 }
 0x1a5   : > { %v1095_v36 = vmul.f32 %v954_v34, %v903_v30  ;;  %v1096_v37 = vmul.f32 %v959_v35, %v904_v31  ;;  %3181 = vmatprep.subr.bf16.mxu0 %v1133_v33  ;;  %v927_v30 = vunpack.c.l.bf16 %v4243_v23  ;;  %v928_v31 = vunpack.c.h.bf16 %v4243_v23  ;;  %v4248_v33 = vld [vmem:[%s3955_s27 + $0x30] sm:$0xff]  }
 0x1a6   : > { %3238 = vmatpush3.bf16.msra.mxu1 %v4248_v33  ;;  %v1449_v23 = vsel %vm1368_vm3, 16843009, %v3774_v21 }
 0x1a7   : > { %v1125_v41 = vpack.c.bf16 %v1096_v37, %v1095_v36 }
 0x1a8   : > { %v1044_v42 = vpop.permute.xlu0 %1043  ;;  %v1049_v43 = vpop.permute.xlu1 %1048 }
 0x1a9   : > { %v1113_v44 = vmul.f32 %v1044_v42, %v921_v38  ;;  %v1114_v45 = vmul.f32 %v1049_v43, %v922_v39  ;;  %v911_v39 = vunpack.c.l.bf16 %v4248_v33  ;;  %v4253_v42 = vld [vmem:[%s3955_s27 + $0x78] sm:$0xff]  }
 0x1aa   : > { %3182 = vmatpush3.bf16.xpose.msra.mxu0 %v1125_v41  ;;  %v912_v41 = vunpack.c.h.bf16 %v4248_v33  ;;  %3239 = vmatprep.subr.bf16.mxu1 %v4253_v42  ;;  %v1471_v33 = vunpack.c.0.s8 %v1449_v23 }
 0x1ab   : > { %v1134_v49 = vpack.c.bf16 %v1114_v45, %v1113_v44 }
 0x1ac   : > { %v964_v50 = vpop.permute.xlu0 %963  ;;  %v969_v51 = vpop.permute.xlu1 %968 }
 0x1ad   : > { %v1097_v55 = vmul.f32 %v964_v50, %v905_v46  ;;  %v1098_v56 = vmul.f32 %v969_v51, %v906_v47  ;;  %3183 = vmatprep.subr.bf16.mxu0 %v1134_v49  ;;  %v929_v49 = vunpack.c.l.bf16 %v4253_v42  ;;  %v930_v50 = vunpack.c.h.bf16 %v4253_v42  ;;  %v4258_v51 = vld [vmem:[%s3955_s27 + $0x38] sm:$0xff]  }
 0x1ae   : > { %3240 = vmatpush3.bf16.msra.mxu1 %v4258_v51 }
 0x1af   : > { %v1126_v60 = vpack.c.bf16 %v1098_v56, %v1097_v55 }
 0x1b0   : > { %v1054_v62 = vpop.permute.xlu0 %1053  ;;  %v1059_v63 = vpop.permute.xlu1 %1058 }
 0x1b1   : > { %v1115_v0 = vmul.f32 %v1054_v62, %v923_v57  ;;  %v1116_v1 = vmul.f32 %v1059_v63, %v924_v58  ;;  %v913_v62 = vunpack.c.l.bf16 %v4258_v51  ;;  %v914_v63 = vunpack.c.h.bf16 %v4258_v51 }
 0x1b2   : > { %3184 = vmatpush3.bf16.xpose.msra.mxu0 %v1126_v60  ;;  %v1477_v51 = vunpack.c.3.s8 %v1449_v23 }
 0x1b3   : > { %v1135_v5 = vpack.c.bf16 %v1116_v1, %v1115_v0 }
 0x1b4   : > { %v974_v7 = vpop.permute.xlu0 %973  ;;  %v979_v8 = vpop.permute.xlu1 %978 }
 0x1b5   : > { %v1099_v9 = vmul.f32 %v974_v7, %v907_v2  ;;  %v1100_v10 = vmul.f32 %v979_v8, %v908_v3  ;;  %3185 = vmatprep.subr.bf16.mxu0 %v1135_v5  ;;  %v1140_v8 = vld [vmem:[#allocation2 + $0x8] sm:$0xff] }
 0x1b7   : > { %v1127_v14 = vpack.c.bf16 %v1100_v10, %v1099_v9  ;;  %v1141_v9 = vld [vmem:[#allocation2 + $0x10] sm:$0xff]  ;;  %v1142_v10 = vld [vmem:[#allocation2 + $0x18] sm:$0xff] }
 0x1b8   : > { %v1064_v16 = vpop.permute.xlu0 %1063  ;;  %v1069_v17 = vpop.permute.xlu1 %1068 }
 0x1b9   : > { %v1117_v18 = vmul.f32 %v1064_v16, %v925_v11  ;;  %v1118_v19 = vmul.f32 %v1069_v17, %v926_v12  ;;  %v1143_v11 = vld [vmem:[#allocation2 + $0x20] sm:$0xff]  ;;  %v1150_v12 = vld [vmem:[#allocation2 + $0x58] sm:$0xff]  ;;  %v1152_v16 = vld [vmem:[#allocation2 + $0x68] sm:$0xff]  ;;  %v1448_v17 = vsel %vm1367_vm2, 16843009, %v3774_v21 }
 0x1ba   : > { %3186 = vmatpush3.bf16.xpose.msra.mxu0 %v1127_v14  ;;  %v1151_v14 = vld [vmem:[#allocation2 + $0x60] sm:$0xff] }
 0x1bb   : > { %v1136_v25 = vpack.c.bf16 %v1118_v19, %v1117_v18  ;;  %v1463_v18 = vunpack.c.0.s8 %v1447_v13  ;;  %v1464_v19 = vunpack.c.0.s8 %v1448_v17 }
 0x1bc   : > { %v984_v26 = vpop.permute.xlu0 %983  ;;  %v989_v27 = vpop.permute.xlu1 %988 }
 0x1bd   : > { %v1101_v28 = vmul.f32 %v984_v26, %v909_v20  ;;  %v1102_v29 = vmul.f32 %v989_v27, %v910_v22  ;;  %3187 = vmatprep.subr.bf16.mxu0 %v1136_v25  ;;  %v1465_v20 = vunpack.c.1.s8 %v1447_v13  ;;  %v1466_v22 = vunpack.c.1.s8 %v1448_v17 }
 0x1be   : > { %v1450_v25 = vsel %vm1369_vm4, 16843009, %v3774_v21  ;;  %v1527_v26 = vpack.c.b16 %v1464_v19, %v1463_v18 }
 0x1bf   : > { %v1128_v34 = vpack.c.bf16 %v1102_v29, %v1101_v28  ;;  %v1529_v27 = vpack.c.b16 %v1466_v22, %v1465_v20  ;;  %v1467_v28 = vunpack.c.2.s8 %v1447_v13  ;;  %v1468_v29 = vunpack.c.2.s8 %v1448_v17 }
 0x1c0   : > { %v1074_v35 = vpop.permute.xlu0 %1073  ;;  %v1079_v36 = vpop.permute.xlu1 %1078 }
 0x1c1   : > { %v1119_v37 = vmul.f32 %v1074_v35, %v927_v30  ;;  %v1120_v38 = vmul.f32 %v1079_v36, %v928_v31  ;;  %v1469_v30 = vunpack.c.3.s8 %v1447_v13  ;;  %v1470_v31 = vunpack.c.3.s8 %v1448_v17  ;;  %v1354_v35 = vld [vmem:[%s3962_s12 + $0x20] sm:$0xff]  ;;  %v1355_v36 = vld [vmem:[%s3962_s12 + $0x28] sm:$0xff] }
 0x1c2   : > { %3188 = vmatpush3.bf16.xpose.msra.mxu0 %v1128_v34  ;;  %v1472_v34 = vunpack.c.0.s8 %v1450_v25  ;;  %vm1370_vm5 = vnez %v1354_v35  ;;  %vm1371_vm6 = vnez %v1355_v36 }
 0x1c3   : > { %v1137_v43 = vpack.c.bf16 %v1120_v38, %v1119_v37  ;;  %v1528_v37 = vpack.c.b8 %v1527_v26, %v1527_v26  ;;  %v1530_v38 = vpack.c.b8 %v1529_v27, %v1529_v27 }
 0x1c4   : > { %v994_v44 = vpop.permute.xlu0 %993  ;;  %v999_v45 = vpop.permute.xlu1 %998  ;;  %v1535_v42 = vpack.c.b16 %v1472_v34, %v1471_v33 }
 0x1c5   : > { %v1103_v46 = vmul.f32 %v994_v44, %v911_v39  ;;  %v1104_v47 = vmul.f32 %v999_v45, %v912_v41  ;;  %3189 = vmatprep.subr.bf16.mxu0 %v1137_v43  ;;  %v1531_v39 = vpack.c.b16 %v1468_v29, %v1467_v28  ;;  %v1533_v41 = vpack.c.b16 %v1470_v31, %v1469_v30 }
 0x1c6   : > { %v1473_v43 = vunpack.c.1.s8 %v1449_v23  ;;  %v1474_v44 = vunpack.c.1.s8 %v1450_v25  ;;  %v1475_v45 = vunpack.c.2.s8 %v1449_v23  ;;  %vm4293_vm7 = vnez %v1528_v37 }
 0x1c7   : > { %v1129_v55 = vpack.c.bf16 %v1104_v47, %v1103_v46  ;;  %v1476_v46 = vunpack.c.2.s8 %v1450_v25  ;;  %v1451_v47 = vsel %vm1370_vm5, 16843009, %v3774_v21  ;;  %vm4299_vm8 = vnez %v1530_v38 }
 0x1c8   : > { %v1084_v56 = vpop.permute.xlu0 %1083  ;;  %v1089_v57 = vpop.permute.xlu1 %1088  ;;  %v1485_v59 = vunpack.c.3.s8 %v1451_v47 }
 0x1c9   : > { %v1121_v58 = vmul.f32 %v1084_v56, %v929_v49  ;;  %v1122_v60 = vmul.f32 %v1089_v57, %v930_v50  ;;  %v1452_v49 = vsel %vm1371_vm6, 16843009, %v3774_v21  ;;  %v1356_v56 = vld [vmem:[%s3962_s12 + $0x30] sm:$0xff]  ;;  %v1357_v57 = vld [vmem:[%s3962_s12 + $0x38] sm:$0xff] }
 0x1ca   : > { %3190 = vmatpush3.bf16.xpose.msra.mxu0 %v1129_v55  ;;  %v1478_v55 = vunpack.c.3.s8 %v1450_v25  ;;  %vm1372_vm9 = vnez %v1356_v56  ;;  %vm1373_vm10 = vnez %v1357_v57  ;;  %v1486_v4 = vunpack.c.3.s8 %v1452_v49 }
 0x1cb   : > { %v1138_v0 = vpack.c.bf16 %v1122_v60, %v1121_v58  ;;  %v1532_v60 = vpack.c.b8 %v1531_v39, %v1531_v39 }
 0x1cc   : > { %v1004_v1 = vpop.permute.xlu0 %1003  ;;  %v1009_v2 = vpop.permute.xlu1 %1008  ;;  %v1549_v30 = vpack.c.b16 %v1486_v4, %v1485_v59 }
 0x1cd   : > { %v1105_v3 = vmul.f32 %v1004_v1, %v913_v62  ;;  %v1106_v5 = vmul.f32 %v1009_v2, %v914_v63  ;;  %3191 = vmatprep.subr.bf16.mxu0 %v1138_v0  ;;  %v1534_v62 = vpack.c.b8 %v1533_v41, %v1533_v41  ;;  %v1536_v63 = vpack.c.b8 %v1535_v42, %v1535_v42 }
 0x1ce   : > { %v1537_v0 = vpack.c.b16 %v1474_v44, %v1473_v43  ;;  %v1539_v1 = vpack.c.b16 %v1476_v46, %v1475_v45  ;;  %v1479_v2 = vunpack.c.0.s8 %v1451_v47  ;;  %vm4312_vm11 = vnez %v1532_v60 }
 0x1cf   : > { %v1130_v7 = vpack.c.bf16 %v1106_v5, %v1105_v3  ;;  %v1480_v3 = vunpack.c.0.s8 %v1452_v49  ;;  %v1481_v5 = vunpack.c.1.s8 %v1451_v47  ;;  %vm4316_vm12 = vnez %v1534_v62 }
 0x1d0   : > { %vm4326_vm13 = vnez %v1536_v63  ;;  %v1625_v23 = vsel %vm4312_vm11, 16843009, %v3774_v21  ;;  %v4338_v26 = vsel %vm4316_vm12, 16843009, %v3774_v21  ;;  %v1550_v46 = vpack.c.b8 %v1549_v30, %v1549_v30 }
 0x1d1   : > { %v4343_v27 = vsel %vm4326_vm13, 16843009, %v3774_v21  ;;  %v1659_v33 = vunpack.c.0.s8 %v1625_v23  ;;  %v1660_v34 = vunpack.c.1.s8 %v1625_v23  ;;  %v1661_v37 = vunpack.c.0.s8 %v4338_v26 }
 0x1d2   : > { %3192 = vmatpush3.bf16.xpose.msra.mxu0 %v1130_v7  ;;  %v1482_v7 = vunpack.c.1.s8 %v1452_v49  ;;  %v1662_v38 = vunpack.c.1.s8 %v4338_v26  ;;  %v1663_v42 = vunpack.c.0.s8 %v4343_v27  ;;  %v1664_v50 = vunpack.c.1.s8 %v4343_v27 }
 0x1d3   : > { %vm4412_vm11 = vcmp.ne.s32.totalorder %v1660_v34, 0  ;;  %vm4419_vm13 = vcmp.ne.s32.totalorder %v1661_v37, 0 }
 0x1d9   : > { %3194 = vmatmul.mubr.bf16.vlgmr.msra.gmra.mrb[0].mxu0 %v4179_v52  ;;  %v1147_v52 = vld [vmem:[#allocation2 + $0x40] sm:$0xff] }
 0x1da   : > { %3195 = vmatprep.mubr.bf16.mxu0 %v1140_v8 }
 0x1e1   : > { %3196 = vmatmul.mubr.bf16.gmra.mrb[4].mxu0 %v1140_v8  ;;  %v1541_v8 = vpack.c.b16 %v1478_v55, %v1477_v51 }
 0x1e2   : > { %3197 = vmatprep.mubr.bf16.mxu0 %v1141_v9 }
 0x1e3   : > { %v1542_v40 = vpack.c.b8 %v1541_v8, %v1541_v8 }
 0x1e5   : > { %vm1598_vm0 = vnez %v1542_v40 }
 0x1e6   : > { %v4367_v44 = vsel %vm1598_vm0, 16843009, %v3774_v21  ;;  %vm4459_vm0 = vcmp.ne.s32.totalorder %v1663_v42, 0 }
 0x1e7   : > { %v1669_v63 = vunpack.c.0.s8 %v4367_v44 }
 0x1e9   : > { %3198 = vmatmul.mubr.bf16.gmra.mrb[8].mxu0 %v1141_v9  ;;  %v1483_v9 = vunpack.c.2.s8 %v1451_v47 }
 0x1ea   : > { %3199 = vmatprep.mubr.bf16.mxu0 %v1142_v10 }
 0x1f1   : > { %3200 = vmatmul.mubr.bf16.gmra.mrb[12].mxu0 %v1142_v10  ;;  %v1484_v10 = vunpack.c.2.s8 %v1452_v49 }
 0x1f2   : > { %3201 = vmatprep.mubr.bf16.mxu0 %v1143_v11 }
 0x1f3   : > { %v1547_v48 = vpack.c.b16 %v1484_v10, %v1483_v9  ;;  %v1359_v10 = vld [vmem:[%s3962_s12 + $0x48] sm:$0xff] }
 0x1f5   : > { %v1548_v29 = vpack.c.b8 %v1547_v48, %v1547_v48 }
 0x1f9   : > { %3202 = vmatmul.mubr.bf16.gmra.mrb[16].mxu0 %v1143_v11  ;;  %v4304_v11 = vstv %s1349_s25 }
 0x1fa   : > { %3203 = vmatprep.mubr.bf16.mxu0 %v1144_v53 }
 0x201   : > { %3204 = vmatmul.mubr.bf16.gmra.mrb[20].mxu0 %v1144_v53  ;;  %v1623_v53 = vsel %vm4293_vm7, 16843009, %v3774_v21  ;;  %vm1601_vm7 = vnez %v1548_v29 }
 0x202   : > { %3205 = vmatprep.mubr.bf16.mxu0 %v1145_v54  ;;  %v1655_v13 = vunpack.c.0.s8 %v1623_v53  ;;  %v1656_v17 = vunpack.c.1.s8 %v1623_v53 }
 0x204   : > { %vm4345_vm1 = vcmp.ne.s32.totalorder %v1655_v13, 0  ;;  %vm4349_vm2 = vcmp.ne.s32.totalorder %v1656_v17, 0 }
 0x209   : > { %3206 = vmatmul.mubr.bf16.gmra.mrb[24].mxu0 %v1145_v54  ;;  %v1624_v54 = vsel %vm4299_vm8, 16843009, %v3774_v21  ;;  %vm4395_vm8 = vnez %v1550_v46 }
 0x20a   : > { %3207 = vmatprep.mubr.bf16.mxu0 %v1146_v61  ;;  %v1657_v20 = vunpack.c.0.s8 %v1624_v54  ;;  %v1658_v22 = vunpack.c.1.s8 %v1624_v54  ;;  %v4426_v17 = vsel %vm4395_vm8, 16843009, %v3774_v21  ;;  %vm4542_vm8 = vcmp.ne.s32.totalorder %v1669_v63, 0 }
 0x20c   : > { %vm4358_vm4 = vcmp.ne.s32.totalorder %v1657_v20, 0  ;;  %vm4369_vm6 = vcmp.ne.s32.totalorder %v1658_v22, 0 }
 0x211   : > { %3208 = vmatmul.mubr.bf16.gmra.mrb[28].mxu0 %v1146_v61 }
 0x212   : > { %3209 = vmatprep.mubr.bf16.mxu0 %v1147_v52 }
 0x219   : > { %3210 = vmatmul.mubr.bf16.gmra.mrb[32].mxu0 %v1147_v52 }
 0x21a   : > { %3211 = vmatprep.mubr.bf16.mxu0 %v1148_v6 }
 0x221   : > { %3212 = vmatmul.mubr.bf16.gmra.mrb[36].mxu0 %v1148_v6  ;;  %v1543_v6 = vpack.c.b16 %v1480_v3, %v1479_v2  ;;  %v1358_v3 = vld [vmem:[%s3962_s12 + $0x40] sm:$0xff] }
 0x222   : > { %3213 = vmatprep.mubr.bf16.mxu0 %v1149_v15  ;;  %vm1374_vm12 = vnez %v1358_v3 }
 0x223   : > { %v1544_v25 = vpack.c.b8 %v1543_v6, %v1543_v6  ;;  %v4445_v31 = vsel %vm1374_vm12, 16843009, %v3774_v21 }
 0x224   : > { %v1495_v45 = vunpack.c.0.s8 %v4445_v31  ;;  %v1497_v42 = vunpack.c.1.s8 %v4445_v31 }
 0x225   : > { %vm1599_vm3 = vnez %v1544_v25 }
 0x226   : > { %v4378_v55 = vsel %vm1599_vm3, 16843009, %v3774_v21 }
 0x227   : > { %v1672_v61 = vunpack.c.1.s8 %v4378_v55 }
 0x229   : > { %3214 = vmatmul.mubr.bf16.gmra.mrb[40].mxu0 %v1149_v15  ;;  %v4321_v15 = vsel %vm1372_vm9, 16843009, %v3774_v21  ;;  %vm4400_vm9 = vcmp.ne.s32.totalorder %v1659_v33, 0 }
 0x22a   : > { %3215 = vmatprep.mubr.bf16.mxu0 %v1150_v12  ;;  %v1487_v18 = vunpack.c.0.s8 %v4321_v15  ;;  %v1489_v47 = vunpack.c.1.s8 %v4321_v15 }
 0x231   : > { %3216 = vmatmul.mubr.bf16.gmra.mrb[44].mxu0 %v1150_v12  ;;  %v4324_v12 = vsel %vm1373_vm10, 16843009, %v3774_v21 }
 0x232   : > { %3217 = vmatprep.mubr.bf16.mxu0 %v1151_v14  ;;  %v1488_v19 = vunpack.c.0.s8 %v4324_v12  ;;  %v1490_v49 = vunpack.c.1.s8 %v4324_v12  ;;  %v1492_v2 = vunpack.c.2.s8 %v4324_v12 }
 0x234   : > { %v1551_v35 = vpack.c.b16 %v1488_v19, %v1487_v18  ;;  %v1553_v9 = vpack.c.b16 %v1490_v49, %v1489_v47  ;;  %v1493_v49 = vunpack.c.3.s8 %v4321_v15 }
 0x236   : > { %v1552_v56 = vpack.c.b8 %v1551_v35, %v1551_v35  ;;  %v1554_v26 = vpack.c.b8 %v1553_v9, %v1553_v9  ;;  %v1677_v35 = vunpack.c.0.s8 %v4426_v17 }
 0x238   : > { %vm4407_vm10 = vnez %v1552_v56  ;;  %v1494_v56 = vunpack.c.3.s8 %v4324_v12 }
 0x239   : > { %3218 = vmatmul.mubr.bf16.gmra.mrb[48].mxu0 %v1151_v14  ;;  %v4438_v25 = vsel %vm4407_vm10, 16843009, %v3774_v21 }
 0x23a   : > { %3219 = vmatprep.mubr.bf16.mxu0 %v1152_v16  ;;  %v1679_v27 = vunpack.c.0.s8 %v4438_v25 }
 0x241   : > { %3220 = vmatmul.mubr.bf16.gmra.mrb[52].mxu0 %v1152_v16  ;;  %v1538_v16 = vpack.c.b8 %v1537_v0, %v1537_v0  ;;  %v4388_v0 = vsel %vm1601_vm7, 16843009, %v3774_v21 }
 0x242   : > { %3221 = vmatprep.mubr.bf16.mxu0 %v1153_v24  ;;  %v1675_v40 = vunpack.c.0.s8 %v4388_v0  ;;  %v1676_v48 = vunpack.c.1.s8 %v4388_v0 }
 0x243   : > { %vm1596_vm14 = vnez %v1538_v16 }
 0x244   : > { %v4356_v39 = vsel %vm1596_vm14, 16843009, %v3774_v21  ;;  %vm1375_vm14 = vnez %v1359_v10 }
 0x245   : > { %v1665_v51 = vunpack.c.0.s8 %v4356_v39  ;;  %v1666_v57 = vunpack.c.1.s8 %v4356_v39  ;;  %v4451_v37 = vsel %vm1375_vm14, 16843009, %v3774_v21 }
 0x246   : > { %v1496_v3 = vunpack.c.0.s8 %v4451_v37  ;;  %v1498_v9 = vunpack.c.1.s8 %v4451_v37 }
 0x247   : > { %vm4481_vm3 = vcmp.ne.s32.totalorder %v1665_v51, 0 }
 0x249   : > { %3222 = vmatmul.mubr.bf16.gmra.mrb[56].mxu0 %v1153_v24  ;;  %v1540_v24 = vpack.c.b8 %v1539_v1, %v1539_v1  ;;  %v1491_v1 = vunpack.c.2.s8 %v4321_v15 }
 0x24a   : > { %3223 = vmatprep.mubr.bf16.mxu0 %v1154_v32 }
 0x24b   : > { %vm1597_vm15 = vnez %v1540_v24  ;;  %v1555_v18 = vpack.c.b16 %v1492_v2, %v1491_v1 }
 0x24c   : > { %v4364_v43 = vsel %vm1597_vm15, 16843009, %v3774_v21  ;;  %vm4431_vm15 = vcmp.ne.s32.totalorder %v1662_v38, 0 }
 0x24d   : > { %v1667_v58 = vunpack.c.0.s8 %v4364_v43  ;;  %v1668_v60 = vunpack.c.1.s8 %v4364_v43  ;;  %v1556_v46 = vpack.c.b8 %v1555_v18, %v1555_v18  ;;  %v1557_v18 = vpack.c.b16 %v1494_v56, %v1493_v49 }
 0x24e   : > { %v1500_v43 = vunpack.c.2.s8 %v4451_v37 }
 0x24f   : > { %v1558_v49 = vpack.c.b8 %v1557_v18, %v1557_v18  ;;  %vm4532_vm7 = vcmp.ne.s32.totalorder %v1668_v60, 0 }
 0x251   : > { %3224 = vmatmul.mubr.bf16.gmra.mrb[60].mxu0 %v1154_v32  ;;  %v1545_v32 = vpack.c.b16 %v1482_v7, %v1481_v5  ;;  %v1670_v5 = vunpack.c.1.s8 %v4367_v44  ;;  %v1671_v7 = vunpack.c.0.s8 %v4378_v55  ;;  %vm4561_vm12 = vnez %v1558_v49 }
 0x252   : > { %v4586_v49 = vsel %vm4561_vm12, 16843009, %v3774_v21 }
 0x253   : > { %v1546_v28 = vpack.c.b8 %v1545_v32, %v1545_v32  ;;  %vm4552_vm10 = vcmp.ne.s32.totalorder %v1670_v5, 0 }
 0x255   : > { %vm1600_vm5 = vnez %v1546_v28 }
 0x256   : > { %v4384_v62 = vsel %vm1600_vm5, 16843009, %v3774_v21  ;;  %vm4492_vm5 = vcmp.ne.s32.totalorder %v1666_v57, 0 }
 0x257   : > { %v1673_v52 = vunpack.c.0.s8 %v4384_v62  ;;  %v1674_v6 = vunpack.c.1.s8 %v4384_v62 }
 0x2ac   : > { %v1189_v53 = vpop.f32.mrb[0].mxu0 }
 0x2ad   : > { %v1383_v16 = vsub.f32 %v1189_v53, %v4304_v11  ;;  %v1191_v24 = vpop.f32.mrb[1].mxu0 }
 0x2ae   : > { %v1384_v59 = vsub.f32 %v1191_v24, %v4304_v11  ;;  %v1193_v4 = vpop.f32.mrb[2].mxu0 }
 0x2af   : > { %v1783_v19 = vsel %vm4345_vm1, %v1383_v16, -1e+30  ;;  %v1385_v20 = vsub.f32 %v1193_v4, %v4304_v11  ;;  %v1195_v22 = vpop.f32.mrb[3].mxu0  ;;  %vm4463_vm1 = vnez %v1554_v26  ;;  %v1678_v16 = vunpack.c.1.s8 %v4426_v17 }
 0x2b0   : > { %v1847_v28 = vmul.f32 1.442695, %v1783_v19  ;;  %v1784_v29 = vsel %vm4349_vm2, %v1384_v59, -1e+30  ;;  %v1386_v30 = vsub.f32 %v1195_v22, %v4304_v11  ;;  %vm4472_vm2 = vcmp.ne.s32.totalorder %v1664_v50, 0 }
 0x2b1   : > { %v1849_v33 = vmul.f32 1.442695, %v1784_v29  ;;  %v1785_v34 = vsel %vm4358_vm4, %v1385_v20, -1e+30  ;;  %vm1605_vm4 = vnez %v1556_v46  ;;  %v4499_v51 = vsel %vm4463_vm1, 16843009, %v3774_v21 }
 0x2b2   : > { %3466 = vpow2.f32 %v1847_v28  ;;  %v1851_v38 = vmul.f32 1.442695, %v1785_v34  ;;  %v1786_v36 = vsel %vm4369_vm6, %v1386_v30, -1e+30  ;;  %v4504_v22 = vpack.c.b16 %v1496_v3, %v1495_v45 }
 0x2b3   : > { %3468 = vpow2.f32 %v1849_v33  ;;  %v1853_v47 = vmul.f32 1.442695, %v1786_v36  ;;  %v4509_v26 = vsel %vm1605_vm4, 16843009, %v3774_v21  ;;  %v4511_v28 = vpack.c.b16 %v1498_v9, %v1497_v42 }
 0x2b4   : > { %3470 = vpow2.f32 %v1851_v38  ;;  %v1199_v41 = vpop.f32.mrb[4].mxu0  ;;  %v1680_v30 = vunpack.c.1.s8 %v4438_v25  ;;  %v1681_v34 = vunpack.c.0.s8 %v4499_v51  ;;  %v1682_v13 = vunpack.c.1.s8 %v4499_v51  ;;  %v1360_v38 = vld [vmem:[%s3962_s12 + $0x50] sm:$0xff] }
 0x2b5   : > { %3472 = vpow2.f32 %v1853_v47  ;;  %v1387_v15 = vsub.f32 %v1199_v41, %v4304_v11  ;;  %v1201_v12 = vpop.f32.mrb[5].mxu0  ;;  %vm4521_vm6 = vcmp.ne.s32.totalorder %v1667_v58, 0  ;;  %v1683_v23 = vunpack.c.0.s8 %v4509_v26  ;;  %v1361_v41 = vld [vmem:[%s3962_s12 + $0x58] sm:$0xff] }
 0x2b6   : > { %v1388_v10 = vsub.f32 %v1201_v12, %v4304_v11  ;;  %v1203_v53 = vpop.f32.mrb[6].mxu0  ;;  %v1560_v56 = vpack.c.b8 %v4504_v22, %v4504_v22  ;;  %v1562_v58 = vpack.c.b8 %v4511_v28, %v4511_v28  ;;  %v1499_v12 = vunpack.c.2.s8 %v4445_v31 }
 0x2b7   : > { %v1787_v50 = vsel %vm4400_vm9, %v1387_v15, -1e+30  ;;  %v1389_v24 = vsub.f32 %v1203_v53, %v4304_v11  ;;  %v1205_v59 = vpop.f32.mrb[7].mxu0  ;;  %vm1376_vm9 = vnez %v1360_v38  ;;  %vm4608_vm1 = vcmp.ne.s32.totalorder %v1673_v52, 0 }
 0x2b8   : > { %v1855_v19 = vmul.f32 1.442695, %v1787_v50  ;;  %v1788_v54 = vsel %vm4412_vm11, %v1388_v10, -1e+30  ;;  %v1390_v20 = vsub.f32 %v1205_v59, %v4304_v11  ;;  %vm1377_vm11 = vnez %v1361_v41 }
 0x2b9   : > { %v1857_v39 = vmul.f32 1.442695, %v1788_v54  ;;  %v1789_v57 = vsel %vm4419_vm13, %v1389_v24, -1e+30  ;;  %v4567_v8 = vpack.c.b16 %v1500_v43, %v1499_v12  ;;  %v4571_v14 = vsel %vm1376_vm9, 16843009, %v3774_v21 }
 0x2ba   : > { %3474 = vpow2.f32 %v1855_v19  ;;  %v1859_v29 = vmul.f32 1.442695, %v1789_v57  ;;  %v1790_v32 = vsel %vm4431_vm15, %v1390_v20, -1e+30  ;;  %vm4579_vm13 = vcmp.ne.s32.totalorder %v1671_v7, 0 }
 0x2bb   : > { %3476 = vpow2.f32 %v1857_v39  ;;  %v1861_v33 = vmul.f32 1.442695, %v1790_v32  ;;  %vm4588_vm14 = vnez %v1560_v56  ;;  %vm4592_vm15 = vnez %v1562_v58 }
 0x2bc   : > { %v3467_v36 = vpop.eup %3466  ;;  %3478 = vpow2.f32 %v1859_v29  ;;  %v1209_v46 = vpop.f32.mrb[8].mxu0  ;;  %v1501_v56 = vunpack.c.3.s8 %v4445_v31  ;;  %v1502_v12 = vunpack.c.3.s8 %v4451_v37  ;;  %v1503_v55 = vunpack.c.0.s8 %v4571_v14 }
 0x2bd   : > { %v3469_v2 = vpop.eup %3468  ;;  %3480 = vpow2.f32 %v1861_v33  ;;  %v1391_v45 = vsub.f32 %v1209_v46, %v4304_v11  ;;  %v1211_v3 = vpop.f32.mrb[9].mxu0  ;;  %v4575_v33 = vsel %vm1377_vm11, 16843009, %v3774_v21  ;;  %v1564_v52 = vpack.c.b8 %v4567_v8, %v4567_v8 }
 0x2be   : > { %v3471_v42 = vpop.eup %3470  ;;  %v1392_v9 = vsub.f32 %v1211_v3, %v4304_v11  ;;  %v1213_v10 = vpop.f32.mrb[10].mxu0  ;;  %v2007_v53 = vadd.f32 %v3469_v2, %v3467_v36  ;;  %v1506_v44 = vunpack.c.1.s8 %v4575_v33  ;;  %v1684_v54 = vunpack.c.1.s8 %v4509_v26 }
 0x2bf   : > { %v3473_v60 = vpop.eup %3472  ;;  %v1791_v24 = vsel %vm4459_vm0, %v1391_v45, -1e+30  ;;  %v1393_v59 = vsub.f32 %v1213_v10, %v4304_v11  ;;  %v1215_v18 = vpop.f32.mrb[11].mxu0  ;;  %v2200_v19 = vpack.c.bf16 %v3471_v42, %v3467_v36  ;;  %vm4599_vm0 = vcmp.ne.s32.totalorder %v1672_v61, 0 }
 0x2c0   : > { %v1863_v63 = vmul.f32 1.442695, %v1791_v24  ;;  %v1792_v20 = vsel %vm4472_vm2, %v1392_v9, -1e+30  ;;  %v1394_v22 = vsub.f32 %v1215_v18, %v4304_v11  ;;  %2008 = vadd.xlane.f32.xlu0 %v2007_v53  ;;  %v2201_v1 = vpack.c.bf16 %v3473_v60, %v3469_v2 }
 0x2c1   : > { %v1865_v39 = vmul.f32 1.442695, %v1792_v20  ;;  %v1793_v57 = vsel %vm4481_vm3, %v1393_v59, -1e+30  ;;  %v2010_v28 = vadd.f32 %v3473_v60, %v3471_v42  ;;  %v1504_v61 = vunpack.c.0.s8 %v4575_v33 }
 0x2c2   : > { %3482 = vpow2.f32 %v1863_v63  ;;  %v1867_v5 = vmul.f32 1.442695, %v1793_v57  ;;  %v1794_v29 = vsel %vm4492_vm5, %v1394_v22, -1e+30  ;;  %2360 = vmatprep.mubr.bf16.mxu1 %v2201_v1  ;;  %vm4619_vm2 = vcmp.ne.s32.totalorder %v1674_v6, 0 }
 0x2c3   : > { %3484 = vpow2.f32 %v1865_v39  ;;  %v1869_v32 = vmul.f32 1.442695, %v1794_v29  ;;  %2011 = vadd.xlane.f32.xlu1 %v2010_v28  ;;  %2361 = vmatmul.mubr.bf16.vlgmr.msra.gmra.mrb[0].mxu1 %v2200_v19  ;;  %v4630_v6 = vpack.c.b16 %v1502_v12, %v1501_v56  ;;  %v4634_v57 = vpack.c.b16 %v1504_v61, %v1503_v55 }
 0x2c4   : > { %v3475_v36 = vpop.eup %3474  ;;  %3486 = vpow2.f32 %v1867_v5  ;;  %v1219_v46 = vpop.f32.mrb[12].mxu0  ;;  %v1505_v28 = vunpack.c.1.s8 %v4571_v14  ;;  %vm4640_vm3 = vcmp.ne.s32.totalorder %v1675_v40, 0  ;;  %v1685_v8 = vunpack.c.0.s8 %v4586_v49 }
 0x2c5   : > { %v3477_v2 = vpop.eup %3476  ;;  %3488 = vpow2.f32 %v1869_v32  ;;  %v1395_v7 = vsub.f32 %v1219_v46, %v4304_v11  ;;  %v1221_v45 = vpop.f32.mrb[13].mxu0  ;;  %v4649_v32 = vsel %vm4588_vm14, 16843009, %v3774_v21  ;;  %vm4654_vm4 = vcmp.ne.s32.totalorder %v1676_v48, 0 }
 0x2c6   : > { %v3479_v42 = vpop.eup %3478  ;;  %v1396_v58 = vsub.f32 %v1221_v45, %v4304_v11  ;;  %v1223_v9 = vpop.f32.mrb[14].mxu0  ;;  %v2013_v10 = vadd.f32 %v3477_v2, %v3475_v36  ;;  %vm4663_vm5 = vnez %v1564_v52  ;;  %v1566_v48 = vpack.c.b8 %v4630_v6, %v4630_v6 }
 0x2c7   : > { %v3481_v43 = vpop.eup %3480  ;;  %v1795_v31 = vsel %vm4521_vm6, %v1395_v7, -1e+30  ;;  %v1397_v37 = vsub.f32 %v1223_v9, %v4304_v11  ;;  %v1225_v60 = vpop.f32.mrb[15].mxu0  ;;  %v2202_v24 = vpack.c.bf16 %v3479_v42, %v3475_v36  ;;  %v4661_v7 = vsel %vm4592_vm15, 16843009, %v3774_v21 }
 0x2c8   : > { %v1871_v18 = vmul.f32 1.442695, %v1795_v31  ;;  %v1796_v19 = vsel %vm4532_vm7, %v1396_v58, -1e+30  ;;  %v1398_v47 = vsub.f32 %v1225_v60, %v4304_v11  ;;  %2014 = vadd.xlane.f32.xlu0 %v2013_v10  ;;  %v2203_v63 = vpack.c.bf16 %v3481_v43, %v3477_v2 }
 0x2c9   : > { %v1873_v20 = vmul.f32 1.442695, %v1796_v19  ;;  %v1797_v22 = vsel %vm4542_vm8, %v1397_v37, -1e+30  ;;  %v2016_v62 = vadd.f32 %v3481_v43, %v3479_v42  ;;  %vm4670_vm6 = vcmp.ne.s32.totalorder %v1677_v35, 0 }
 0x2ca   : > { %3490 = vpow2.f32 %v1871_v18  ;;  %v1875_v1 = vmul.f32 1.442695, %v1797_v22  ;;  %v1798_v39 = vsel %vm4552_vm10, %v1398_v47, -1e+30  ;;  %2368 = vmatprep.mubr.bf16.mxu1 %v2203_v63  ;;  %v1568_v41 = vpack.c.b8 %v4634_v57, %v4634_v57 }
 0x2cb   : > { %3492 = vpow2.f32 %v1873_v20  ;;  %v1877_v15 = vmul.f32 1.442695, %v1798_v39  ;;  %2369 = vmatmul.mubr.bf16.gmra.mrb[4].mxu1 %v2202_v24  ;;  %vm4683_vm7 = vcmp.ne.s32.totalorder %v1678_v16, 0  ;;  %v4687_v43 = vpack.c.b16 %v1506_v44, %v1505_v28 }
 0x2cc   : > { %v3483_v50 = vpop.eup %3482  ;;  %3494 = vpow2.f32 %v1875_v1  ;;  %2017 = vadd.xlane.f32.xlu0 %v2016_v62  ;;  %v1229_v5 = vpop.f32.mrb[16].mxu0  ;;  %v1507_v17 = vunpack.c.2.s8 %v4571_v14  ;;  %v1508_v3 = vunpack.c.2.s8 %v4575_v33  ;;  %v1686_v63 = vunpack.c.1.s8 %v4586_v49 }
 0x2cd   : > { %v3485_v36 = vpop.eup %3484  ;;  %3496 = vpow2.f32 %v1877_v15  ;;  %v1399_v46 = vsub.f32 %v1229_v5, %v4304_v11  ;;  %v1231_v2 = vpop.f32.mrb[17].mxu0  ;;  %v1687_v53 = vunpack.c.0.s8 %v4649_v32  ;;  %vm4702_vm8 = vcmp.ne.s32.totalorder %v1679_v27, 0 }
 0x2ce   : > { %v3487_v45 = vpop.eup %3486  ;;  %v1400_v56 = vsub.f32 %v1231_v2, %v4304_v11  ;;  %v1233_v12 = vpop.f32.mrb[18].mxu0  ;;  %v2019_v42 = vadd.f32 %v3485_v36, %v3483_v50  ;;  %v1688_v59 = vunpack.c.1.s8 %v4649_v32  ;;  %v1689_v6 = vunpack.c.0.s8 %v4661_v7 }
 0x2cf   : > { %v3489_v58 = vpop.eup %3488  ;;  %v1799_v9 = vsel %vm4579_vm13, %v1399_v46, -1e+30  ;;  %v1401_v10 = vsub.f32 %v1233_v12, %v4304_v11  ;;  %v1235_v55 = vpop.f32.mrb[19].mxu0  ;;  %v2204_v61 = vpack.c.bf16 %v3487_v45, %v3483_v50  ;;  %v4711_v1 = vsel %vm4663_vm5, 16843009, %v3774_v21 }
 0x2d0   : > { %v1879_v31 = vmul.f32 1.442695, %v1799_v9  ;;  %v1800_v37 = vsel %vm4599_vm0, %v1400_v56, -1e+30  ;;  %v1402_v60 = vsub.f32 %v1235_v55, %v4304_v11  ;;  %2020 = vadd.xlane.f32.xlu1 %v2019_v42  ;;  %v2205_v4 = vpack.c.bf16 %v3489_v58, %v3485_v36 }
 0x2d1   : > { %v1881_v24 = vmul.f32 1.442695, %v1800_v37  ;;  %v1801_v52 = vsel %vm4608_vm1, %v1401_v10, -1e+30  ;;  %v2022_v18 = vadd.f32 %v3489_v58, %v3487_v45  ;;  %vm4716_vm9 = vcmp.ne.s32.totalorder %v1680_v30, 0  ;;  %v1362_v37 = vld [vmem:[%s3962_s12 + $0x60] sm:$0xff] }
 0x2d2   : > { %3498 = vpow2.f32 %v1879_v31  ;;  %v1883_v16 = vmul.f32 1.442695, %v1801_v52  ;;  %v1802_v19 = vsel %vm4619_vm2, %v1402_v60, -1e+30  ;;  %2376 = vmatprep.mubr.bf16.mxu1 %v2205_v4  ;;  %vm4720_vm10 = vnez %v1566_v48 }
 0x2d3   : > { %3500 = vpow2.f32 %v1881_v24  ;;  %v1885_v47 = vmul.f32 1.442695, %v1802_v19  ;;  %2023 = vadd.xlane.f32.xlu0 %v2022_v18  ;;  %2377 = vmatmul.mubr.bf16.gmra.mrb[8].mxu1 %v2204_v61  ;;  %vm4724_vm11 = vnez %v1568_v41  ;;  %vm4731_vm12 = vcmp.ne.s32.totalorder %v1681_v34, 0  ;;  %v1363_v18 = vld [vmem:[%s3962_s12 + $0x68] sm:$0xff] }
 0x2d4   : > { %v3491_v20 = vpop.eup %3490  ;;  %3502 = vpow2.f32 %v1883_v16  ;;  %v1239_v22 = vpop.f32.mrb[20].mxu0  ;;  %v1570_v30 = vpack.c.b8 %v4687_v43, %v4687_v43  ;;  %v1571_v2 = vpack.c.b16 %v1508_v3, %v1507_v17  ;;  %vm4742_vm13 = vcmp.ne.s32.totalorder %v1682_v13, 0 }
 0x2d5   : > { %v3493_v39 = vpop.eup %3492  ;;  %3504 = vpow2.f32 %v1885_v47  ;;  %v1403_v57 = vsub.f32 %v1239_v22, %v4304_v11  ;;  %v1241_v15 = vpop.f32.mrb[21].mxu0  ;;  %v1509_v34 = vunpack.c.3.s8 %v4571_v14  ;;  %v1510_v13 = vunpack.c.3.s8 %v4575_v33 }
 0x2d6   : > { %v3495_v50 = vpop.eup %3494  ;;  %v1404_v5 = vsub.f32 %v1241_v15, %v4304_v11  ;;  %v1243_v36 = vpop.f32.mrb[22].mxu0  ;;  %v2025_v46 = vadd.f32 %v3493_v39, %v3491_v20  ;;  %v1572_v40 = vpack.c.b8 %v1571_v2, %v1571_v2  ;;  %v1690_v31 = vunpack.c.1.s8 %v4661_v7 }
 0x2d7   : > { %v3497_v38 = vpop.eup %3496  ;;  %v1803_v45 = vsel %vm4640_vm3, %v1403_v57, -1e+30  ;;  %v1405_v56 = vsub.f32 %v1243_v36, %v4304_v11  ;;  %v1245_v12 = vpop.f32.mrb[23].mxu0  ;;  %v2206_v42 = vpack.c.bf16 %v3495_v50, %v3491_v20  ;;  %v1691_v0 = vunpack.c.0.s8 %v4711_v1 }
 0x2d8   : > { %v1887_v41 = vmul.f32 1.442695, %v1803_v45  ;;  %v1804_v58 = vsel %vm4654_vm4, %v1404_v5, -1e+30  ;;  %v1406_v9 = vsub.f32 %v1245_v12, %v4304_v11  ;;  %2026 = vadd.xlane.f32.xlu1 %v2025_v46  ;;  %v2207_v29 = vpack.c.bf16 %v3497_v38, %v3493_v39 }
 0x2d9   : > { %v1889_v10 = vmul.f32 1.442695, %v1804_v58  ;;  %v1805_v55 = vsel %vm4670_vm6, %v1405_v56, -1e+30  ;;  %v2028_v51 = vadd.f32 %v3497_v38, %v3495_v50  ;;  %vm4760_vm14 = vcmp.ne.s32.totalorder %v1683_v23, 0 }
 0x2da   : > { %3506 = vpow2.f32 %v1887_v41  ;;  %v1891_v61 = vmul.f32 1.442695, %v1805_v55  ;;  %v1806_v14 = vsel %vm4683_vm7, %v1406_v9, -1e+30  ;;  %2384 = vmatprep.mubr.bf16.mxu1 %v2207_v29  ;;  %v1692_v4 = vunpack.c.1.s8 %v4711_v1 }
 0x2db   : > { %3508 = vpow2.f32 %v1889_v10  ;;  %v1893_v43 = vmul.f32 1.442695, %v1806_v14  ;;  %2029 = vadd.xlane.f32.xlu0 %v2028_v51  ;;  %2385 = vmatmul.mubr.bf16.gmra.mrb[12].mxu1 %v2206_v42  ;;  %v4768_v24 = vsel %vm4720_vm10, 16843009, %v3774_v21  ;;  %v4773_v52 = vsel %vm4724_vm11, 16843009, %v3774_v21 }
 0x2dc   : > { %v3499_v60 = vpop.eup %3498  ;;  %3510 = vpow2.f32 %v1891_v61  ;;  %v1249_v33 = vpop.f32.mrb[24].mxu0  ;;  %vm4779_vm15 = vcmp.ne.s32.totalorder %v1684_v54, 0  ;;  %vm4783_vm0 = vnez %v1570_v30  ;;  %v4787_v47 = vpack.c.b16 %v1510_v13, %v1509_v34 }
 0x2dd   : > { %v3501_v17 = vpop.eup %3500  ;;  %3512 = vpow2.f32 %v1893_v43  ;;  %v1407_v23 = vsub.f32 %v1249_v33, %v4304_v11  ;;  %v1251_v16 = vpop.f32.mrb[25].mxu0  ;;  %vm4792_vm1 = vcmp.ne.s32.totalorder %v1685_v8, 0  ;;  %vm4796_vm2 = vnez %v1572_v40 }
 0x2de   : > { %v3503_v20 = vpop.eup %3502  ;;  %v1408_v22 = vsub.f32 %v1251_v16, %v4304_v11  ;;  %v1253_v39 = vpop.f32.mrb[26].mxu0  ;;  %v2031_v57 = vadd.f32 %v3501_v17, %v3499_v60  ;;  %vm1378_vm3 = vnez %v1362_v37  ;;  %vm4805_vm4 = vcmp.ne.s32.totalorder %v1686_v63, 0 }
 0x2df   : > { %v3505_v54 = vpop.eup %3504  ;;  %v1807_v28 = vsel %vm4702_vm8, %v1407_v23, -1e+30  ;;  %v1409_v44 = vsub.f32 %v1253_v39, %v4304_v11  ;;  %v1255_v50 = vpop.f32.mrb[27].mxu0  ;;  %v2208_v5 = vpack.c.bf16 %v3503_v20, %v3499_v60  ;;  %vm1379_vm5 = vnez %v1363_v18 }
 0x2e0   : > { %v1895_v36 = vmul.f32 1.442695, %v1807_v28  ;;  %v1808_v46 = vsel %vm4716_vm9, %v1408_v22, -1e+30  ;;  %v1410_v30 = vsub.f32 %v1255_v50, %v4304_v11  ;;  %2032 = vadd.xlane.f32.xlu1 %v2031_v57  ;;  %v2209_v62 = vpack.c.bf16 %v3505_v54, %v3501_v17 }
 0x2e1   : > { %v1897_v2 = vmul.f32 1.442695, %v1808_v46  ;;  %v1809_v38 = vsel %vm4731_vm12, %v1409_v44, -1e+30  ;;  %v2034_v45 = vadd.f32 %v3505_v54, %v3503_v20  ;;  %v4816_v49 = vsel %vm1378_vm3, 16843009, %v3774_v21 }
 0x2e2   : > { %3514 = vpow2.f32 %v1895_v36  ;;  %v1899_v63 = vmul.f32 1.442695, %v1809_v38  ;;  %v1810_v56 = vsel %vm4742_vm13, %v1410_v30, -1e+30  ;;  %2392 = vmatprep.mubr.bf16.mxu1 %v2209_v62  ;;  %v4821_v27 = vsel %vm1379_vm5, 16843009, %v3774_v21 }
 0x2e3   : > { %3516 = vpow2.f32 %v1897_v2  ;;  %v1901_v12 = vmul.f32 1.442695, %v1810_v56  ;;  %2035 = vadd.xlane.f32.xlu0 %v2034_v45  ;;  %2393 = vmatmul.mubr.bf16.gmra.mrb[16].mxu1 %v2208_v5  ;;  %v1693_v25 = vunpack.c.0.s8 %v4768_v24  ;;  %v1694_v42 = vunpack.c.1.s8 %v4768_v24 }
 0x2e4   : > { %v3507_v34 = vpop.eup %3506  ;;  %3518 = vpow2.f32 %v1899_v63  ;;  %v1259_v41 = vpop.f32.mrb[28].mxu0  ;;  %vm4827_vm6 = vcmp.ne.s32.totalorder %v1687_v53, 0  ;;  %v1695_v58 = vunpack.c.0.s8 %v4773_v52  ;;  %v4835_v9 = vsel %vm4783_vm0, 16843009, %v3774_v21 }
 0x2e5   : > { %v4840_v29 = vsel %vm4796_vm2, 16843009, %v3774_v21  ;;  %v3509_v10 = vpop.eup %3508  ;;  %3520 = vpow2.f32 %v1901_v12  ;;  %v1411_v55 = vsub.f32 %v1259_v41, %v4304_v11  ;;  %v1261_v53 = vpop.f32.mrb[29].mxu0  ;;  %vm4845_vm7 = vcmp.ne.s32.totalorder %v1688_v59, 0 }
 0x2e6   : > { %v1511_v13 = vunpack.c.0.s8 %v4816_v49  ;;  %v1512_v61 = vunpack.c.0.s8 %v4821_v27  ;;  %v3511_v14 = vpop.eup %3510  ;;  %v1412_v40 = vsub.f32 %v1261_v53, %v4304_v11  ;;  %v1263_v43 = vpop.f32.mrb[30].mxu0  ;;  %v2037_v37 = vadd.f32 %v3509_v10, %v3507_v34 }
 0x2e7   : > { %vm4854_vm8 = vcmp.ne.s32.totalorder %v1689_v6, 0  ;;  %v1574_v32 = vpack.c.b8 %v4787_v47, %v4787_v47  ;;  %v1513_v59 = vunpack.c.1.s8 %v4816_v49  ;;  %v3513_v33 = vpop.eup %3512  ;;  %v1811_v18 = vsel %vm4760_vm14, %v1411_v55, -1e+30  ;;  %v1265_v23 = vpop.f32.mrb[31].mxu0 }
 0x2e8   : > { %v1413_v17 = vsub.f32 %v1263_v43, %v4304_v11  ;;  %v2210_v16 = vpack.c.bf16 %v3511_v14, %v3507_v34  ;;  %vm4866_vm9 = vcmp.ne.s32.totalorder %v1690_v31, 0  ;;  %v1514_v3 = vunpack.c.1.s8 %v4821_v27  ;;  %2038 = vadd.xlane.f32.xlu1 %v2037_v37 }
 0x2e9   : > { %v1903_v20 = vmul.f32 1.442695, %v1811_v18  ;;  %v1812_v47 = vsel %vm4779_vm15, %v1412_v40, -1e+30  ;;  %v1414_v22 = vsub.f32 %v1265_v23, %v4304_v11  ;;  %v2211_v35 = vpack.c.bf16 %v3513_v33, %v3509_v10 }
 0x2ea   : > { %v1905_v39 = vmul.f32 1.442695, %v1812_v47  ;;  %v1813_v57 = vsel %vm4792_vm1, %v1413_v17, -1e+30  ;;  %v2040_v26 = vadd.f32 %v3513_v33, %v3511_v14  ;;  %v1575_v7 = vpack.c.b16 %v1512_v61, %v1511_v13 }
 0x2eb   : > { %3522 = vpow2.f32 %v1903_v20  ;;  %v1907_v31 = vmul.f32 1.442695, %v1813_v57  ;;  %v1814_v54 = vsel %vm4805_vm4, %v1414_v22, -1e+30  ;;  %2400 = vmatprep.mubr.bf16.mxu1 %v2211_v35  ;;  %vm4878_vm10 = vnez %v1574_v32  ;;  %v1365_v57 = vld [vmem:[%s3962_s12 + $0x78] sm:$0xff] }
 0x2ec   : > { %3524 = vpow2.f32 %v1905_v39  ;;  %v1909_v19 = vmul.f32 1.442695, %v1814_v54  ;;  %2041 = vadd.xlane.f32.xlu0 %v2040_v26  ;;  %2401 = vmatmul.mubr.bf16.gmra.mrb[20].mxu1 %v2210_v16  ;;  %v1696_v44 = vunpack.c.1.s8 %v4773_v52  ;;  %v1577_v15 = vpack.c.b16 %v1514_v3, %v1513_v59  ;;  %v3515_v50 = vpop.eup %3514  ;;  %v1269_v5 = vpop.f32.mrb[32].mxu0  ;;  %v1364_v3 = vld [vmem:[%s3962_s12 + $0x70] sm:$0xff] }
 0x2ed   : > { %3526 = vpow2.f32 %v1907_v31  ;;  %vm4885_vm11 = vcmp.ne.s32.totalorder %v1691_v0, 0  ;;  %v1697_v36 = vunpack.c.0.s8 %v4835_v9  ;;  %v1698_v46 = vunpack.c.1.s8 %v4835_v9  ;;  %v3517_v62 = vpop.eup %3516  ;;  %v1271_v38 = vpop.f32.mrb[33].mxu0 }
 0x2ee   : > { %v1699_v30 = vunpack.c.0.s8 %v4840_v29  ;;  %3528 = vpow2.f32 %v1909_v19  ;;  %v1415_v2 = vsub.f32 %v1269_v5, %v4304_v11  ;;  %vm4895_vm12 = vcmp.ne.s32.totalorder %v1692_v4, 0  ;;  %v3519_v56 = vpop.eup %3518  ;;  %v1273_v34 = vpop.f32.mrb[34].mxu0 }
 0x2ef   : > { %v4902_v0 = vsel %vm4878_vm10, 16843009, %v3774_v21  ;;  %v1576_v63 = vpack.c.b8 %v1575_v7, %v1575_v7  ;;  %v1416_v12 = vsub.f32 %v1271_v38, %v4304_v11  ;;  %v2043_v41 = vadd.f32 %v3517_v62, %v3515_v50  ;;  %v3521_v55 = vpop.eup %3520  ;;  %v1275_v61 = vpop.f32.mrb[35].mxu0 }
 0x2f0   : > { %vm4907_vm13 = vcmp.ne.s32.totalorder %v1693_v25, 0  ;;  %v1515_v1 = vunpack.c.2.s8 %v4816_v49  ;;  %v1516_v4 = vunpack.c.2.s8 %v4821_v27  ;;  %v1815_v53 = vsel %vm4827_vm6, %v1415_v2, -1e+30 }
 0x2f1   : > { %v1417_v13 = vsub.f32 %v1273_v34, %v4304_v11  ;;  %v2212_v14 = vpack.c.bf16 %v3519_v56, %v3515_v50  ;;  %vm4918_vm14 = vcmp.ne.s32.totalorder %v1694_v42, 0  ;;  %v1578_v25 = vpack.c.b8 %v1577_v15, %v1577_v15  ;;  %2044 = vadd.xlane.f32.xlu1 %v2043_v41 }
 0x2f2   : > { %v1911_v43 = vmul.f32 1.442695, %v1815_v53  ;;  %v1816_v37 = vsel %vm4845_vm7, %v1416_v12, -1e+30  ;;  %v1418_v32 = vsub.f32 %v1275_v61, %v4304_v11  ;;  %v2213_v48 = vpack.c.bf16 %v3521_v55, %v3517_v62 }
 0x2f3   : > { %v1913_v59 = vmul.f32 1.442695, %v1816_v37  ;;  %v1817_v33 = vsel %vm4854_vm8, %v1417_v13, -1e+30  ;;  %v2046_v18 = vadd.f32 %v3521_v55, %v3519_v56  ;;  %vm4927_vm15 = vnez %v1576_v63 }
 0x2f4   : > { %3530 = vpow2.f32 %v1911_v43  ;;  %v1915_v42 = vmul.f32 1.442695, %v1817_v33  ;;  %v1818_v51 = vsel %vm4866_vm9, %v1418_v32, -1e+30  ;;  %2408 = vmatprep.mubr.bf16.mxu1 %v2213_v48  ;;  %v4933_v17 = vpack.c.b16 %v1516_v4, %v1515_v1  ;;  %v1279_v47 = vpop.f32.mrb[36].mxu0 }
 0x2f5   : > { %3532 = vpow2.f32 %v1913_v59  ;;  %v1917_v23 = vmul.f32 1.442695, %v1818_v51  ;;  %2047 = vadd.xlane.f32.xlu0 %v2046_v18  ;;  %2409 = vmatmul.mubr.bf16.gmra.mrb[24].mxu1 %v2212_v14  ;;  %v1700_v60 = vunpack.c.1.s8 %v4840_v29  ;;  %v1701_v16 = vunpack.c.0.s8 %v4902_v0  ;;  %v3523_v20 = vpop.eup %3522 }
 0x2f6   : > { %3534 = vpow2.f32 %v1915_v42  ;;  %vm4940_vm0 = vcmp.ne.s32.totalorder %v1695_v58, 0  ;;  %v1702_v22 = vunpack.c.1.s8 %v4902_v0  ;;  %v4948_v35 = vsel %vm4927_vm15, 16843009, %v3774_v21  ;;  %v3525_v26 = vpop.eup %3524  ;;  %v1281_v58 = vpop.f32.mrb[37].mxu0 }
 0x2f7   : > { %vm4950_vm1 = vnez %v1578_v25  ;;  %3536 = vpow2.f32 %v1917_v23  ;;  %v1419_v52 = vsub.f32 %v1279_v47, %v4304_v11  ;;  %vm4956_vm2 = vcmp.ne.s32.totalorder %v1696_v44, 0  ;;  %v3527_v28 = vpop.eup %3526  ;;  %v1283_v15 = vpop.f32.mrb[38].mxu0 }
 0x2f8   : > { %v1517_v31 = vunpack.c.3.s8 %v4816_v49  ;;  %v1518_v54 = vunpack.c.3.s8 %v4821_v27  ;;  %v1420_v19 = vsub.f32 %v1281_v58, %v4304_v11  ;;  %v2049_v50 = vadd.f32 %v3525_v26, %v3523_v20  ;;  %v3529_v62 = vpop.eup %3528  ;;  %v1285_v2 = vpop.f32.mrb[39].mxu0 }
 0x2f9   : > { %vm4965_vm3 = vcmp.ne.s32.totalorder %v1697_v36, 0  ;;  %v1580_v44 = vpack.c.b8 %v4933_v17, %v4933_v17  ;;  %vm1380_vm4 = vnez %v1364_v3  ;;  %v1819_v49 = vsel %vm4885_vm11, %v1419_v52, -1e+30 }
 0x2fa   : > { %v1421_v27 = vsub.f32 %v1283_v15, %v4304_v11  ;;  %v2214_v38 = vpack.c.bf16 %v3527_v28, %v3523_v20  ;;  %vm4976_vm5 = vcmp.ne.s32.totalorder %v1698_v46, 0  ;;  %vm1381_vm6 = vnez %v1365_v57  ;;  %2050 = vadd.xlane.f32.xlu1 %v2049_v50 }
 0x2fb   : > { %v1919_v36 = vmul.f32 1.442695, %v1819_v49  ;;  %v1820_v56 = vsel %vm4895_vm12, %v1420_v19, -1e+30  ;;  %v1422_v12 = vsub.f32 %v1285_v2, %v4304_v11  ;;  %v2215_v8 = vpack.c.bf16 %v3529_v62, %v3525_v26 }
 0x2fc   : > { %v1921_v34 = vmul.f32 1.442695, %v1820_v56  ;;  %v1821_v41 = vsel %vm4907_vm13, %v1421_v27, -1e+30  ;;  %v2052_v1 = vadd.f32 %v3529_v62, %v3527_v28  ;;  %v1581_v4 = vpack.c.b16 %v1518_v54, %v1517_v31  ;;  %v1289_v61 = vpop.f32.mrb[40].mxu0 }
 0x2fd   : > { %3538 = vpow2.f32 %v1919_v36  ;;  %v1923_v9 = vmul.f32 1.442695, %v1821_v41  ;;  %v1822_v46 = vsel %vm4918_vm14, %v1422_v12, -1e+30  ;;  %2416 = vmatprep.mubr.bf16.mxu1 %v2215_v8  ;;  %v4990_v45 = vsel %vm4950_vm1, 16843009, %v3774_v21 }
 0x2fe   : > { %3540 = vpow2.f32 %v1921_v34  ;;  %v1925_v55 = vmul.f32 1.442695, %v1822_v46  ;;  %2053 = vadd.xlane.f32.xlu0 %v2052_v1  ;;  %2417 = vmatmul.mubr.bf16.gmra.mrb[28].mxu1 %v2214_v38  ;;  %v4994_v10 = vsel %vm1380_vm4, 16843009, %v3774_v21  ;;  %v4998_v53 = vsel %vm1381_vm6, 16843009, %v3774_v21  ;;  %v3531_v13 = vpop.eup %3530 }
 0x2ff   : > { %3542 = vpow2.f32 %v1923_v9  ;;  %vm5002_vm7 = vcmp.ne.s32.totalorder %v1699_v30, 0  ;;  %v1703_v40 = vunpack.c.0.s8 %v4948_v35  ;;  %v1704_v25 = vunpack.c.1.s8 %v4948_v35  ;;  %v3533_v37 = vpop.eup %3532  ;;  %v1291_v48 = vpop.f32.mrb[41].mxu0 }
 0x300   : > { %vm5008_vm8 = vnez %v1580_v44  ;;  %3544 = vpow2.f32 %v1925_v55  ;;  %v1423_v32 = vsub.f32 %v1289_v61, %v4304_v11  ;;  %vm5013_vm9 = vcmp.ne.s32.totalorder %v1700_v60, 0  ;;  %v3535_v33 = vpop.eup %3534  ;;  %v1293_v24 = vpop.f32.mrb[42].mxu0 }
 0x301   : > { %v1705_v29 = vunpack.c.0.s8 %v4990_v45  ;;  %v1582_v30 = vpack.c.b8 %v1581_v4, %v1581_v4  ;;  %v1424_v18 = vsub.f32 %v1291_v48, %v4304_v11  ;;  %v2055_v42 = vadd.f32 %v3533_v37, %v3531_v13  ;;  %v3537_v23 = vpop.eup %3536  ;;  %v1295_v20 = vpop.f32.mrb[43].mxu0 }
 0x302   : > { %v1519_v51 = vunpack.c.0.s8 %v4994_v10  ;;  %v1520_v17 = vunpack.c.0.s8 %v4998_v53  ;;  %v1823_v3 = vsel %vm4940_vm0, %v1423_v32, -1e+30  ;;  %v1425_v60 = vsub.f32 %v1293_v24, %v4304_v11 }
 0x303   : > { %v2216_v47 = vpack.c.bf16 %v3535_v33, %v3531_v13  ;;  %v5027_v35 = vsel %vm5008_vm8, 16843009, %v3774_v21  ;;  %v1927_v39 = vmul.f32 1.442695, %v1823_v3  ;;  %v1824_v57 = vsel %vm4956_vm2, %v1424_v18, -1e+30  ;;  %2056 = vadd.xlane.f32.xlu1 %v2055_v42 }
 0x304   : > { %v1426_v26 = vsub.f32 %v1295_v20, %v4304_v11  ;;  %v2217_v52 = vpack.c.bf16 %v3537_v23, %v3533_v37  ;;  %v1929_v58 = vmul.f32 1.442695, %v1824_v57  ;;  %v1825_v6 = vsel %vm4965_vm3, %v1425_v60, -1e+30  ;;  %v1299_v62 = vpop.f32.mrb[44].mxu0 }
 0x305   : > { %v2058_v31 = vadd.f32 %v3537_v23, %v3535_v33  ;;  %vm5034_vm10 = vnez %v1582_v30  ;;  %3546 = vpow2.f32 %v1927_v39  ;;  %v1931_v28 = vmul.f32 1.442695, %v1825_v6  ;;  %v1301_v36 = vpop.f32.mrb[45].mxu0 }
 0x306   : > { %v1826_v19 = vsel %vm4976_vm5, %v1426_v26, -1e+30  ;;  %2424 = vmatprep.mubr.bf16.mxu1 %v2217_v52  ;;  %v5040_v7 = vpack.c.b16 %v1520_v17, %v1519_v51  ;;  %3548 = vpow2.f32 %v1929_v58  ;;  %v1521_v50 = vunpack.c.1.s8 %v4994_v10  ;;  %v1303_v8 = vpop.f32.mrb[46].mxu0 }
 0x307   : > { %v1933_v15 = vmul.f32 1.442695, %v1826_v19  ;;  %2059 = vadd.xlane.f32.xlu0 %v2058_v31  ;;  %2425 = vmatmul.mubr.bf16.gmra.mrb[32].mxu1 %v2216_v47  ;;  %v1522_v5 = vunpack.c.1.s8 %v4998_v53  ;;  %v3539_v44 = vpop.eup %3538  ;;  %3550 = vpow2.f32 %v1931_v28  ;;  %vm5046_vm11 = vcmp.ne.s32.totalorder %v1701_v16, 0  ;;  %v1305_v55 = vpop.f32.mrb[47].mxu0 }
 0x308   : > { %vm5052_vm12 = vcmp.ne.s32.totalorder %v1702_v22, 0  ;;  %vm5056_vm13 = vcmp.ne.s32.totalorder %v1703_v40, 0  ;;  %v3541_v38 = vpop.eup %3540  ;;  %v1427_v63 = vsub.f32 %v1299_v62, %v4304_v11  ;;  %vm5061_vm14 = vcmp.ne.s32.totalorder %v1704_v25, 0 }
 0x309   : > { %3552 = vpow2.f32 %v1933_v15  ;;  %v1706_v56 = vunpack.c.1.s8 %v4990_v45  ;;  %v1707_v0 = vunpack.c.0.s8 %v5027_v35  ;;  %v3543_v22 = vpop.eup %3542  ;;  %v1428_v12 = vsub.f32 %v1301_v36, %v4304_v11 }
 0x30a   : > { %v2061_v34 = vadd.f32 %v3541_v38, %v3539_v44  ;;  %vm5068_vm15 = vcmp.ne.s32.totalorder %v1705_v29, 0  ;;  %v5075_v1 = vsel %vm5034_vm10, 16843009, %v3774_v21  ;;  %v1584_v4 = vpack.c.b8 %v5040_v7, %v5040_v7  ;;  %v3545_v9 = vpop.eup %3544 }
 0x30b   : > { %v1827_v46 = vsel %vm5002_vm7, %v1427_v63, -1e+30  ;;  %v1429_v45 = vsub.f32 %v1303_v8, %v4304_v11  ;;  %v2218_v13 = vpack.c.bf16 %v3543_v22, %v3539_v44  ;;  %v5082_v61 = vpack.c.b16 %v1522_v5, %v1521_v50 }
 0x30c   : > { %v1935_v40 = vmul.f32 1.442695, %v1827_v46  ;;  %v1828_v25 = vsel %vm5013_vm9, %v1428_v12, -1e+30  ;;  %v1430_v43 = vsub.f32 %v1305_v55, %v4304_v11  ;;  %2062 = vadd.xlane.f32.xlu1 %v2061_v34  ;;  %v2219_v37 = vpack.c.bf16 %v3545_v9, %v3541_v38  ;;  %v1309_v17 = vpop.f32.mrb[48].mxu0 }
 0x30d   : > { %v1937_v32 = vmul.f32 1.442695, %v1828_v25  ;;  %v1829_v48 = vsel %vm5046_vm11, %v1429_v45, -1e+30  ;;  %v2064_v14 = vadd.f32 %v3545_v9, %v3543_v22  ;;  %v1523_v29 = vunpack.c.2.s8 %v4994_v10  ;;  %v1311_v39 = vpop.f32.mrb[49].mxu0 }
 0x30e   : > { %3554 = vpow2.f32 %v1935_v40  ;;  %v1939_v30 = vmul.f32 1.442695, %v1829_v48  ;;  %v1830_v33 = vsel %vm5052_vm12, %v1430_v43, -1e+30  ;;  %2432 = vmatprep.mubr.bf16.mxu1 %v2219_v37  ;;  %v1524_v59 = vunpack.c.2.s8 %v4998_v53  ;;  %v1313_v58 = vpop.f32.mrb[50].mxu0 }
 0x30f   : > { %3556 = vpow2.f32 %v1937_v32  ;;  %v1941_v18 = vmul.f32 1.442695, %v1830_v33  ;;  %2065 = vadd.xlane.f32.xlu0 %v2064_v14  ;;  %2433 = vmatmul.mubr.bf16.gmra.mrb[36].mxu1 %v2218_v13  ;;  %vm5093_vm0 = vcmp.ne.s32.totalorder %v1706_v56, 0  ;;  %v1708_v42 = vunpack.c.1.s8 %v5027_v35  ;;  %v3547_v51 = vpop.eup %3546  ;;  %v1315_v15 = vpop.f32.mrb[51].mxu0 }
 0x310   : > { %3558 = vpow2.f32 %v1939_v30  ;;  %vm5098_vm1 = vcmp.ne.s32.totalorder %v1707_v0, 0  ;;  %v1709_v3 = vunpack.c.0.s8 %v5075_v1  ;;  %v1710_v60 = vunpack.c.1.s8 %v5075_v1  ;;  %v3549_v20 = vpop.eup %3548 }
 0x311   : > { %3560 = vpow2.f32 %v1941_v18  ;;  %v1431_v47 = vsub.f32 %v1309_v17, %v4304_v11  ;;  %vm5105_vm2 = vnez %v1584_v4  ;;  %v1586_v35 = vpack.c.b8 %v5082_v61, %v5082_v61  ;;  %v3551_v26 = vpop.eup %3550 }
 0x312   : > { %v1432_v52 = vsub.f32 %v1311_v39, %v4304_v11  ;;  %v2067_v6 = vadd.f32 %v3549_v20, %v3547_v51  ;;  %v1587_v31 = vpack.c.b16 %v1524_v59, %v1523_v29  ;;  %v1525_v54 = vunpack.c.3.s8 %v4994_v10 }
 0x313   : > { %v3553_v28 = vpop.eup %3552  ;;  %v1831_v19 = vsel %vm5056_vm13, %v1431_v47, -1e+30  ;;  %v1433_v7 = vsub.f32 %v1313_v58, %v4304_v11  ;;  %v2220_v50 = vpack.c.bf16 %v3551_v26, %v3547_v51  ;;  %v1526_v5 = vunpack.c.3.s8 %v4998_v53 }
 0x314   : > { %v1943_v44 = vmul.f32 1.442695, %v1831_v19  ;;  %v1832_v62 = vsel %vm5061_vm14, %v1432_v52, -1e+30  ;;  %v1434_v49 = vsub.f32 %v1315_v15, %v4304_v11  ;;  %2068 = vadd.xlane.f32.xlu1 %v2067_v6  ;;  %v2221_v27 = vpack.c.bf16 %v3553_v28, %v3549_v20  ;;  %v1319_v8 = vpop.f32.mrb[52].mxu0 }
 0x315   : > { %v1945_v38 = vmul.f32 1.442695, %v1832_v62  ;;  %v1833_v10 = vsel %vm5068_vm15, %v1433_v7, -1e+30  ;;  %v2070_v2 = vadd.f32 %v3553_v28, %v3551_v26  ;;  %v5125_v63 = vsel %vm5105_vm2, 16843009, %v3774_v21 }
 0x316   : > { %3562 = vpow2.f32 %v1943_v44  ;;  %v1947_v53 = vmul.f32 1.442695, %v1833_v10  ;;  %v1834_v36 = vsel %vm5093_vm0, %v1434_v49, -1e+30  ;;  %2440 = vmatprep.mubr.bf16.mxu1 %v2221_v27  ;;  %v1588_v16 = vpack.c.b8 %v1587_v31, %v1587_v31  ;;  %v1321_v46 = vpop.f32.mrb[53].mxu0 }
 0x317   : > { %3564 = vpow2.f32 %v1945_v38  ;;  %v1949_v56 = vmul.f32 1.442695, %v1834_v36  ;;  %2071 = vadd.xlane.f32.xlu0 %v2070_v2  ;;  %2441 = vmatmul.mubr.bf16.gmra.mrb[40].mxu1 %v2220_v50  ;;  %vm5129_vm3 = vnez %v1586_v35  ;;  %v1589_v22 = vpack.c.b16 %v1526_v5, %v1525_v54  ;;  %v1323_v40 = vpop.f32.mrb[54].mxu0 }
 0x318   : > { %v3555_v12 = vpop.eup %3554  ;;  %3566 = vpow2.f32 %v1947_v53  ;;  %vm5133_vm4 = vcmp.ne.s32.totalorder %v1708_v42, 0  ;;  %vm5137_vm5 = vcmp.ne.s32.totalorder %v1709_v3, 0  ;;  %vm5141_vm6 = vcmp.ne.s32.totalorder %v1710_v60, 0  ;;  %v1325_v29 = vpop.f32.mrb[55].mxu0 }
 0x319   : > { %v3557_v4 = vpop.eup %3556  ;;  %3568 = vpow2.f32 %v1949_v56  ;;  %v1435_v9 = vsub.f32 %v1319_v8, %v4304_v11  ;;  %v1711_v45 = vunpack.c.0.s8 %v5125_v63  ;;  %v1712_v55 = vunpack.c.1.s8 %v5125_v63 }
 0x31a   : > { %v3559_v13 = vpop.eup %3558  ;;  %v1436_v61 = vsub.f32 %v1321_v46, %v4304_v11  ;;  %v2073_v25 = vadd.f32 %v3557_v4, %v3555_v12  ;;  %v1652_v43 = vsel %vm5129_vm3, 16843009, %v3774_v21  ;;  %vm5152_vm7 = vnez %v1588_v16 }
 0x31b   : > { %v3561_v32 = vpop.eup %3560  ;;  %v1835_v48 = vsel %vm5098_vm1, %v1435_v9, -1e+30  ;;  %v1437_v14 = vsub.f32 %v1323_v40, %v4304_v11  ;;  %v2222_v30 = vpack.c.bf16 %v3559_v13, %v3555_v12  ;;  %v1590_v33 = vpack.c.b8 %v1589_v22, %v1589_v22 }
 0x31c   : > { %v1951_v59 = vmul.f32 1.442695, %v1835_v48  ;;  %v1836_v18 = vsel %vm5133_vm4, %v1436_v61, -1e+30  ;;  %v1438_v24 = vsub.f32 %v1325_v29, %v4304_v11  ;;  %2074 = vadd.xlane.f32.xlu1 %v2073_v25  ;;  %v2223_v42 = vpack.c.bf16 %v3561_v32, %v3557_v4  ;;  %v1329_v26 = vpop.f32.mrb[56].mxu0 }
 0x31d   : > { %v1953_v51 = vmul.f32 1.442695, %v1836_v18  ;;  %v1837_v17 = vsel %vm5137_vm5, %v1437_v14, -1e+30  ;;  %v2076_v3 = vadd.f32 %v3561_v32, %v3559_v13  ;;  %v1713_v23 = vunpack.c.0.s8 %v1652_v43  ;;  %v1331_v31 = vpop.f32.mrb[57].mxu0 }
 0x31e   : > { %3570 = vpow2.f32 %v1951_v59  ;;  %v1955_v60 = vmul.f32 1.442695, %v1837_v17  ;;  %v1838_v20 = vsel %vm5141_vm6, %v1438_v24, -1e+30  ;;  %2448 = vmatprep.mubr.bf16.mxu1 %v2223_v42  ;;  %v1714_v47 = vunpack.c.1.s8 %v1652_v43  ;;  %v1333_v7 = vpop.f32.mrb[58].mxu0 }
 0x31f   : > { %3572 = vpow2.f32 %v1953_v51  ;;  %v1957_v39 = vmul.f32 1.442695, %v1838_v20  ;;  %2077 = vadd.xlane.f32.xlu0 %v2076_v3  ;;  %2449 = vmatmul.mubr.bf16.gmra.mrb[44].mxu1 %v2222_v30  ;;  %v1653_v57 = vsel %vm5152_vm7, 16843009, %v3774_v21  ;;  %vm1775_vm8 = vcmp.ne.s32.totalorder %v1711_v45, 0  ;;  %v1335_v27 = vpop.f32.mrb[59].mxu0 }
 0x320   : > { %v3563_v35 = vpop.eup %3562  ;;  %3574 = vpow2.f32 %v1955_v60  ;;  %vm5169_vm9 = vnez %v1590_v33  ;;  %v1439_v6 = vsub.f32 %v1329_v26, %v4304_v11  ;;  %vm1776_vm10 = vcmp.ne.s32.totalorder %v1712_v55, 0 }
 0x321   : > { %v3565_v58 = vpop.eup %3564  ;;  %3576 = vpow2.f32 %v1957_v39  ;;  %vm5174_vm11 = vcmp.ne.s32.totalorder %v1713_v23, 0  ;;  %v1440_v19 = vsub.f32 %v1331_v31, %v4304_v11  ;;  %vm5179_vm12 = vcmp.ne.s32.totalorder %v1714_v47, 0 }
 0x322   : > { %v3567_v28 = vpop.eup %3566  ;;  %v2079_v50 = vadd.f32 %v3565_v58, %v3563_v35  ;;  %v1715_v5 = vunpack.c.0.s8 %v1653_v57  ;;  %v1839_v62 = vsel %vm1775_vm8, %v1439_v6, -1e+30  ;;  %v1441_v49 = vsub.f32 %v1333_v7, %v4304_v11 }
 0x323   : > { %v3569_v44 = vpop.eup %3568  ;;  %v2224_v38 = vpack.c.bf16 %v3567_v28, %v3563_v35  ;;  %v1654_v10 = vsel %vm5169_vm9, 16843009, %v3774_v21  ;;  %v1959_v2 = vmul.f32 1.442695, %v1839_v62  ;;  %v1840_v63 = vsel %vm1776_vm10, %v1440_v19, -1e+30 }
 0x324   : > { %v1442_v53 = vsub.f32 %v1335_v27, %v4304_v11  ;;  %2080 = vadd.xlane.f32.xlu1 %v2079_v50  ;;  %v2225_v36 = vpack.c.bf16 %v3569_v44, %v3565_v58  ;;  %v1961_v16 = vmul.f32 1.442695, %v1840_v63  ;;  %v1841_v56 = vsel %vm5174_vm11, %v1441_v49, -1e+30  ;;  %v1339_v4 = vpop.f32.mrb[60].mxu0  ;;  %v1975_v19 = vld [vmem:[#allocation3] sm:$0xff] }
 0x325   : > { %v2082_v0 = vadd.f32 %v3569_v44, %v3567_v28  ;;  %v1716_v22 = vunpack.c.1.s8 %v1653_v57  ;;  %3578 = vpow2.f32 %v1959_v2  ;;  %v1963_v12 = vmul.f32 1.442695, %v1841_v56  ;;  %v1341_v45 = vpop.f32.mrb[61].mxu0  ;;  %v1976_v50 = vld [vmem:[#allocation3 + $0x8] sm:$0xff]  ;;  %v1977_v62 = vld [vmem:[#allocation3 + $0x10] sm:$0xff]  ;;  %v1979_v63 = vld [vmem:[#allocation3 + $0x20] sm:$0xff] }
 0x326   : > { %v1842_v8 = vsel %vm5179_vm12, %v1442_v53, -1e+30  ;;  %2456 = vmatprep.mubr.bf16.mxu1 %v2225_v36  ;;  %v1717_v34 = vunpack.c.0.s8 %v1654_v10  ;;  %3580 = vpow2.f32 %v1961_v16  ;;  %v1718_v41 = vunpack.c.1.s8 %v1654_v10  ;;  %v1343_v61 = vpop.f32.mrb[62].mxu0  ;;  %v1980_v16 = vld [vmem:[#allocation3 + $0x28] sm:$0xff] }
 0x327   : > { %v1965_v21 = vmul.f32 1.442695, %v1842_v8  ;;  %2083 = vadd.xlane.f32.xlu0 %v2082_v0  ;;  %2457 = vmatmul.mubr.bf16.gmra.mrb[48].mxu1 %v2224_v38  ;;  %3582 = vpow2.f32 %v1963_v12  ;;  %vm1779_vm13 = vcmp.ne.s32.totalorder %v1715_v5, 0  ;;  %v1443_v46 = vsub.f32 %v1339_v4, %v4304_v11  ;;  %v1345_v32 = vpop.f32.mrb[63].mxu0  ;;  %v1978_v38 = vld [vmem:[#allocation3 + $0x18] sm:$0xff] }
 0x328   : > { %v3571_v1 = vpop.eup %3570  ;;  %vm1780_vm14 = vcmp.ne.s32.totalorder %v1716_v22, 0  ;;  %v1444_v13 = vsub.f32 %v1341_v45, %v4304_v11  ;;  %vm1781_vm15 = vcmp.ne.s32.totalorder %v1717_v34, 0  ;;  %v1445_v37 = vsub.f32 %v1343_v61, %v4304_v11  ;;  %v1981_v22 = vld [vmem:[#allocation3 + $0x30] sm:$0xff]  ;;  %v1982_v34 = vld [vmem:[#allocation3 + $0x38] sm:$0xff] }
 0x329   : > { %v3573_v9 = vpop.eup %3572  ;;  %3584 = vpow2.f32 %v1965_v21  ;;  %v1843_v43 = vsel %vm1779_vm13, %v1443_v46, -1e+30  ;;  %vm1782_vm0 = vcmp.ne.s32.totalorder %v1718_v41, 0  ;;  %v1446_v30 = vsub.f32 %v1345_v32, %v4304_v11  ;;  %v1984_v46 = vld [vmem:[#allocation3 + $0x48] sm:$0xff]  ;;  %v1987_v32 = vld [vmem:[#allocation3 + $0x60] sm:$0xff] }
 0x32a   : > { %v3575_v55 = vpop.eup %3574  ;;  %v2085_v40 = vadd.f32 %v3573_v9, %v3571_v1  ;;  %v1967_v14 = vmul.f32 1.442695, %v1843_v43  ;;  %v1844_v29 = vsel %vm1780_vm14, %v1444_v13, -1e+30  ;;  %v1845_v18 = vsel %vm1781_vm15, %v1445_v37, -1e+30 }
 0x32b   : > { %v3577_v25 = vpop.eup %3576  ;;  %v2226_v48 = vpack.c.bf16 %v3575_v55, %v3571_v1  ;;  %v1969_v59 = vmul.f32 1.442695, %v1844_v29  ;;  %v1971_v42 = vmul.f32 1.442695, %v1845_v18  ;;  %v1846_v51 = vsel %vm1782_vm0, %v1446_v30, -1e+30 }
 0x32c   : > { %2086 = vadd.xlane.f32.xlu1 %v2085_v40  ;;  %v2227_v33 = vpack.c.bf16 %v3577_v25, %v3573_v9  ;;  %v2088_v24 = vadd.f32 %v3577_v25, %v3575_v55  ;;  %3586 = vpow2.f32 %v1967_v14  ;;  %v1973_v17 = vmul.f32 1.442695, %v1846_v51  ;;  %v1983_v1 = vld [vmem:[#allocation3 + $0x40] sm:$0xff]  ;;  %v1985_v13 = vld [vmem:[#allocation3 + $0x50] sm:$0xff]  ;;  %v1986_v25 = vld [vmem:[#allocation3 + $0x58] sm:$0xff] }
 0x32d   : > { %3588 = vpow2.f32 %v1969_v59  ;;  %vm2135_vm1 = vcmask 7168   ;;  %v1988_v29 = vld [vmem:[#allocation3 + $0x68] sm:$0xff]  ;;  %v1989_v59 = vld [vmem:[#allocation3 + $0x70] sm:$0xff] }
 0x32e   : > { %2464 = vmatprep.mubr.bf16.mxu1 %v2227_v33  ;;  %2089 = vadd.xlane.f32.xlu0 %v2088_v24  ;;  %3590 = vpow2.f32 %v1971_v42  ;;  %v1990_v42 = vld [vmem:[#allocation3 + $0x78] sm:$0xff] }
 0x32f   : > { %2465 = vmatmul.mubr.bf16.gmra.mrb[52].mxu1 %v2226_v48  ;;  %v3579_v3 = vpop.eup %3578  ;;  %3592 = vpow2.f32 %v1973_v17 }
 0x330   : > { %v3581_v23 = vpop.eup %3580 }
 0x331   : > { %v3583_v60 = vpop.eup %3582  ;;  %v2091_v20 = vadd.f32 %v3581_v23, %v3579_v3 }
 0x332   : > { %v2228_v47 = vpack.c.bf16 %v3583_v60, %v3579_v3  ;;  %v1991_v3 = vld [vmem:[#allocation3 + $0x80] sm:$0xff] }
 0x333   : > { %v3585_v11 = vpop.eup %3584  ;;  %2092 = vadd.xlane.f32.xlu1 %v2091_v20  ;;  %v1992_v20 = vld [vmem:[#allocation3 + $0x88] sm:$0xff] }
 0x334   : > { %v2229_v39 = vpack.c.bf16 %v3585_v11, %v3581_v23  ;;  %v2094_v57 = vadd.f32 %v3585_v11, %v3583_v60 }
 0x336   : > { %2472 = vmatprep.mubr.bf16.mxu1 %v2229_v39  ;;  %2095 = vadd.xlane.f32.xlu0 %v2094_v57  ;;  %v3587_v35 = vpop.eup %3586  ;;  %v1993_v39 = vld [vmem:[#allocation3 + $0x90] sm:$0xff] }
 0x337   : > { %2473 = vmatmul.mubr.bf16.gmra.mrb[56].mxu1 %v2228_v47  ;;  %v3589_v26 = vpop.eup %3588 }
 0x338   : > { %v3591_v52 = vpop.eup %3590  ;;  %v2097_v58 = vadd.f32 %v3589_v26, %v3587_v35 }
 0x339   : > { %v3593_v6 = vpop.eup %3592  ;;  %v2230_v31 = vpack.c.bf16 %v3591_v52, %v3587_v35 }
 0x33a   : > { %2098 = vadd.xlane.f32.xlu1 %v2097_v58  ;;  %v2231_v54 = vpack.c.bf16 %v3593_v6, %v3589_v26  ;;  %v2100_v28 = vadd.f32 %v3593_v6, %v3591_v52  ;;  %v1994_v52 = vld [vmem:[#allocation3 + $0x98] sm:$0xff]  ;;  %v2168_v58 = vld [vmem:[#allocation4] sm:$0xff] }
 0x33c   : > { %2480 = vmatprep.mubr.bf16.mxu1 %v2231_v54  ;;  %2101 = vadd.xlane.f32.xlu0 %v2100_v28 }
 0x33f   : > { %2481 = vmatmul.mubr.bf16.gmra.mrb[60].mxu1 %v2230_v31 }
 0x34d   : > { %v2009_v7 = vpop.xlane.xlu0 %2008 }
 0x34e   : > { %v2103_v15 = vadd.f32 %v2009_v7, %v1975_v19  ;;  %v2169_v7 = vld [vmem:[#allocation4 + $0x8] sm:$0xff] }
 0x350   : > { %2136 = vst.msk [vmem:[#allocation3] sm:$0xff] %vm2135_vm1, %v2103_v15  ;;  %v2012_v5 = vpop.xlane.xlu1 %2011 }
 0x351   : > { %v2104_v44 = vadd.f32 %v2012_v5, %v1976_v50 }
 0x353   : > { %2137 = vst.msk [vmem:[#allocation3 + $0x8] sm:$0xff] %vm2135_vm1, %v2104_v44  ;;  %v1995_v44 = vld [vmem:[#allocation3 + $0xa0] sm:$0xff] }
 0x355   : > { %v2015_v49 = vpop.xlane.xlu0 %2014 }
 0x356   : > { %v2105_v27 = vadd.f32 %v2015_v49, %v1977_v62 }
 0x358   : > { %2138 = vst.msk [vmem:[#allocation3 + $0x10] sm:$0xff] %vm2135_vm1, %v2105_v27 }
 0x359   : > { %v2018_v10 = vpop.xlane.xlu0 %2017 }
 0x35a   : > { %v2106_v2 = vadd.f32 %v2018_v10, %v1978_v38  ;;  %v1996_v10 = vld [vmem:[#allocation3 + $0xa8] sm:$0xff] }
 0x35c   : > { %2139 = vst.msk [vmem:[#allocation3 + $0x18] sm:$0xff] %vm2135_vm1, %v2106_v2  ;;  %v2170_v2 = vld [vmem:[#allocation4 + $0x10] sm:$0xff] }
 0x35d   : > { %v2021_v53 = vpop.xlane.xlu1 %2020 }
 0x35e   : > { %v2107_v36 = vadd.f32 %v2021_v53, %v1979_v63 }
 0x360   : > { %2140 = vst.msk [vmem:[#allocation3 + $0x20] sm:$0xff] %vm2135_vm1, %v2107_v36  ;;  %v2024_v56 = vpop.xlane.xlu0 %2023 }
 0x361   : > { %v2108_v0 = vadd.f32 %v2024_v56, %v1980_v16 }
 0x363   : > { %2141 = vst.msk [vmem:[#allocation3 + $0x28] sm:$0xff] %vm2135_vm1, %v2108_v0  ;;  %v2171_v0 = vld [vmem:[#allocation4 + $0x18] sm:$0xff] }
 0x365   : > { %v2027_v12 = vpop.xlane.xlu1 %2026 }
 0x366   : > { %v2109_v8 = vadd.f32 %v2027_v12, %v1981_v22 }
 0x368   : > { %2142 = vst.msk [vmem:[#allocation3 + $0x30] sm:$0xff] %vm2135_vm1, %v2109_v8  ;;  %v2030_v21 = vpop.xlane.xlu0 %2029 }
 0x369   : > { %v2110_v41 = vadd.f32 %v2030_v21, %v1982_v34  ;;  %v1997_v34 = vld [vmem:[#allocation3 + $0xb0] sm:$0xff] }
 0x36b   : > { %2143 = vst.msk [vmem:[#allocation3 + $0x38] sm:$0xff] %vm2135_vm1, %v2110_v41 }
 0x36d   : > { %v2033_v4 = vpop.xlane.xlu1 %2032 }
 0x36e   : > { %v2111_v9 = vadd.f32 %v2033_v4, %v1983_v1 }
 0x370   : > { %2144 = vst.msk [vmem:[#allocation3 + $0x40] sm:$0xff] %vm2135_vm1, %v2111_v9  ;;  %v2036_v45 = vpop.xlane.xlu0 %2035  ;;  %v1998_v9 = vld [vmem:[#allocation3 + $0xb8] sm:$0xff] }
 0x371   : > { %v2112_v55 = vadd.f32 %v2036_v45, %v1984_v46  ;;  %v2172_v46 = vld [vmem:[#allocation4 + $0x20] sm:$0xff] }
 0x373   : > { %2145 = vst.msk [vmem:[#allocation3 + $0x48] sm:$0xff] %vm2135_vm1, %v2112_v55 }
 0x375   : > { %v2039_v61 = vpop.xlane.xlu1 %2038 }
 0x376   : > { %v2113_v40 = vadd.f32 %v2039_v61, %v1985_v13 }
 0x378   : > { %2146 = vst.msk [vmem:[#allocation3 + $0x50] sm:$0xff] %vm2135_vm1, %v2113_v40 }
 0x379   : > { %v2042_v43 = vpop.xlane.xlu0 %2041 }
 0x37a   : > { %v2114_v37 = vadd.f32 %v2042_v43, %v1986_v25  ;;  %v2173_v25 = vld [vmem:[#allocation4 + $0x28] sm:$0xff] }
 0x37c   : > { %2147 = vst.msk [vmem:[#allocation3 + $0x58] sm:$0xff] %vm2135_vm1, %v2114_v37 }
 0x37e   : > { %v2045_v48 = vpop.xlane.xlu1 %2044 }
 0x37f   : > { %v2115_v14 = vadd.f32 %v2045_v48, %v1987_v32  ;;  %v1999_v48 = vld [vmem:[#allocation3 + $0xc0] sm:$0xff] }
 0x381   : > { %2148 = vst.msk [vmem:[#allocation3 + $0x60] sm:$0xff] %vm2135_vm1, %v2115_v14 }
 0x382   : > { %v2048_v30 = vpop.xlane.xlu0 %2047 }
 0x383   : > { %v2116_v33 = vadd.f32 %v2048_v30, %v1988_v29 }
 0x385   : > { %2149 = vst.msk [vmem:[#allocation3 + $0x68] sm:$0xff] %vm2135_vm1, %v2116_v33 }
 0x387   : > { %v2051_v18 = vpop.xlane.xlu1 %2050 }
 0x388   : > { %v2117_v24 = vadd.f32 %v2051_v18, %v1989_v59  ;;  %v2000_v59 = vld [vmem:[#allocation3 + $0xc8] sm:$0xff]  ;;  %v2174_v18 = vld [vmem:[#allocation4 + $0x30] sm:$0xff] }
 0x38a   : > { %2150 = vst.msk [vmem:[#allocation3 + $0x70] sm:$0xff] %vm2135_vm1, %v2117_v24 }
 0x38b   : > { %v2054_v51 = vpop.xlane.xlu0 %2053 }
 0x38c   : > { %v2118_v17 = vadd.f32 %v2054_v51, %v1990_v42 }
 0x38e   : > { %2151 = vst.msk [vmem:[#allocation3 + $0x78] sm:$0xff] %vm2135_vm1, %v2118_v17 }
 0x390   : > { %v2057_v23 = vpop.xlane.xlu1 %2056 }
 0x391   : > { %v2119_v60 = vadd.f32 %v2057_v23, %v1991_v3  ;;  %v2175_v23 = vld [vmem:[#allocation4 + $0x38] sm:$0xff] }
 0x393   : > { %2152 = vst.msk [vmem:[#allocation3 + $0x80] sm:$0xff] %vm2135_vm1, %v2119_v60 }
 0x394   : > { %v2060_v11 = vpop.xlane.xlu0 %2059 }
 0x395   : > { %v2120_v47 = vadd.f32 %v2060_v11, %v1992_v20 }
 0x396   : > { %v3241_v26 = vpop.f32.mrb[0].mxu1 }
 0x397   : > { %2153 = vst.msk [vmem:[#allocation3 + $0x88] sm:$0xff] %vm2135_vm1, %v2120_v47  ;;  %v3242_v6 = vpop.f32.mrb[1].mxu1  ;;  %v2001_v47 = vld [vmem:[#allocation3 + $0xd0] sm:$0xff] }
 0x398   : > { %v3243_v31 = vadd.f32 %v3242_v6, %v3241_v26  ;;  %v3244_v28 = vpop.f32.mrb[2].mxu1 }
 0x399   : > { %v2063_v57 = vpop.xlane.xlu1 %2062  ;;  %v3245_v15 = vpop.f32.mrb[3].mxu1 }
 0x39a   : > { %v2121_v35 = vadd.f32 %v2063_v57, %v1993_v39  ;;  %v2489_v50 = vadd.f32 %v3243_v31, %v2168_v58  ;;  %v3246_v5 = vadd.f32 %v3245_v15, %v3244_v28  ;;  %v2176_v58 = vld [vmem:[#allocation4 + $0x40] sm:$0xff] }
 0x39c   : > { %2154 = vst.msk [vmem:[#allocation3 + $0x90] sm:$0xff] %vm2135_vm1, %v2121_v35  ;;  %v2066_v54 = vpop.xlane.xlu0 %2065  ;;  %2521 = vst [vmem:[#allocation4] sm:$0xff] %v2489_v50  ;;  %v2490_v62 = vadd.f32 %v3246_v5, %v2169_v7  ;;  %v2177_v7 = vld [vmem:[#allocation4 + $0x48] sm:$0xff] }
 0x39d   : > { %v2122_v19 = vadd.f32 %v2066_v54, %v1994_v52  ;;  %v2002_v52 = vld [vmem:[#allocation3 + $0xd8] sm:$0xff] }
 0x39e   : > { %2522 = vst [vmem:[#allocation4 + $0x8] sm:$0xff] %v2490_v62  ;;  %v3247_v38 = vpop.f32.mrb[4].mxu1 }
 0x39f   : > { %2155 = vst.msk [vmem:[#allocation3 + $0x98] sm:$0xff] %vm2135_vm1, %v2122_v19  ;;  %v3248_v63 = vpop.f32.mrb[5].mxu1 }
 0x3a0   : > { %v3249_v53 = vadd.f32 %v3248_v63, %v3247_v38  ;;  %v3250_v16 = vpop.f32.mrb[6].mxu1 }
 0x3a1   : > { %v2069_v49 = vpop.xlane.xlu1 %2068  ;;  %v3251_v22 = vpop.f32.mrb[7].mxu1 }
 0x3a2   : > { %v2123_v27 = vadd.f32 %v2069_v49, %v1995_v44  ;;  %v2491_v12 = vadd.f32 %v3249_v53, %v2170_v2  ;;  %v3252_v8 = vadd.f32 %v3251_v22, %v3250_v16  ;;  %v2003_v44 = vld [vmem:[#allocation3 + $0xe0] sm:$0xff]  ;;  %v2178_v2 = vld [vmem:[#allocation4 + $0x50] sm:$0xff] }
 0x3a4   : > { %2156 = vst.msk [vmem:[#allocation3 + $0xa0] sm:$0xff] %vm2135_vm1, %v2123_v27  ;;  %v2072_v36 = vpop.xlane.xlu0 %2071  ;;  %2523 = vst [vmem:[#allocation4 + $0x10] sm:$0xff] %v2491_v12  ;;  %v2492_v21 = vadd.f32 %v3252_v8, %v2171_v0  ;;  %v2004_v27 = vld [vmem:[#allocation3 + $0xe8] sm:$0xff]  ;;  %v2179_v0 = vld [vmem:[#allocation4 + $0x58] sm:$0xff] }
 0x3a5   : > { %v2124_v56 = vadd.f32 %v2072_v36, %v1996_v10 }
 0x3a6   : > { %2524 = vst [vmem:[#allocation4 + $0x18] sm:$0xff] %v2492_v21  ;;  %v3253_v4 = vpop.f32.mrb[8].mxu1 }
 0x3a7   : > { %2157 = vst.msk [vmem:[#allocation3 + $0xa8] sm:$0xff] %vm2135_vm1, %v2124_v56  ;;  %v3254_v45 = vpop.f32.mrb[9].mxu1 }
 0x3a8   : > { %v3255_v55 = vadd.f32 %v3254_v45, %v3253_v4  ;;  %v3256_v61 = vpop.f32.mrb[10].mxu1 }
 0x3a9   : > { %v2075_v41 = vpop.xlane.xlu1 %2074  ;;  %v3257_v43 = vpop.f32.mrb[11].mxu1 }
 0x3aa   : > { %v2125_v1 = vadd.f32 %v2075_v41, %v1997_v34  ;;  %v2493_v37 = vadd.f32 %v3255_v55, %v2172_v46  ;;  %v3258_v32 = vadd.f32 %v3257_v43, %v3256_v61  ;;  %v2005_v34 = vld [vmem:[#allocation3 + $0xf0] sm:$0xff]  ;;  %v2180_v46 = vld [vmem:[#allocation4 + $0x60] sm:$0xff] }
 0x3ac   : > { %2158 = vst.msk [vmem:[#allocation3 + $0xb0] sm:$0xff] %vm2135_vm1, %v2125_v1  ;;  %v2078_v13 = vpop.xlane.xlu0 %2077  ;;  %2525 = vst [vmem:[#allocation4 + $0x20] sm:$0xff] %v2493_v37  ;;  %v2494_v14 = vadd.f32 %v3258_v32, %v2173_v25  ;;  %v2006_v1 = vld [vmem:[#allocation3 + $0xf8] sm:$0xff]  ;;  %v2181_v25 = vld [vmem:[#allocation4 + $0x68] sm:$0xff] }
 0x3ad   : > { %v2126_v40 = vadd.f32 %v2078_v13, %v1998_v9 }
 0x3ae   : > { %2526 = vst [vmem:[#allocation4 + $0x28] sm:$0xff] %v2494_v14  ;;  %v3259_v33 = vpop.f32.mrb[12].mxu1 }
 0x3af   : > { %2159 = vst.msk [vmem:[#allocation3 + $0xb8] sm:$0xff] %vm2135_vm1, %v2126_v40  ;;  %v3260_v24 = vpop.f32.mrb[13].mxu1 }
 0x3b0   : > { %v3261_v42 = vadd.f32 %v3260_v24, %v3259_v33  ;;  %v3262_v17 = vpop.f32.mrb[14].mxu1 }
 0x3b1   : > { %v2081_v29 = vpop.xlane.xlu1 %2080  ;;  %v3263_v60 = vpop.f32.mrb[15].mxu1 }
 0x3b2   : > { %v2127_v30 = vadd.f32 %v2081_v29, %v1999_v48  ;;  %v2495_v20 = vadd.f32 %v3261_v42, %v2174_v18  ;;  %v3264_v11 = vadd.f32 %v3263_v60, %v3262_v17  ;;  %v2182_v29 = vld [vmem:[#allocation4 + $0x70] sm:$0xff]  ;;  %v2183_v18 = vld [vmem:[#allocation4 + $0x78] sm:$0xff] }
 0x3b4   : > { %2160 = vst.msk [vmem:[#allocation3 + $0xc0] sm:$0xff] %vm2135_vm1, %v2127_v30  ;;  %v2084_v51 = vpop.xlane.xlu0 %2083  ;;  %2527 = vst [vmem:[#allocation4 + $0x30] sm:$0xff] %v2495_v20  ;;  %v2496_v39 = vadd.f32 %v3264_v11, %v2175_v23  ;;  %v2184_v23 = vld [vmem:[#allocation4 + $0x80] sm:$0xff] }
 0x3b5   : > { %v2128_v3 = vadd.f32 %v2084_v51, %v2000_v59 }
 0x3b6   : > { %2528 = vst [vmem:[#allocation4 + $0x38] sm:$0xff] %v2496_v39  ;;  %v3265_v26 = vpop.f32.mrb[16].mxu1 }
 0x3b7   : > { %2161 = vst.msk [vmem:[#allocation3 + $0xc8] sm:$0xff] %vm2135_vm1, %v2128_v3  ;;  %v3266_v6 = vpop.f32.mrb[17].mxu1 }
 0x3b8   : > { %v3267_v31 = vadd.f32 %v3266_v6, %v3265_v26  ;;  %v3268_v28 = vpop.f32.mrb[18].mxu1 }
 0x3b9   : > { %v2087_v57 = vpop.xlane.xlu1 %2086  ;;  %v3269_v15 = vpop.f32.mrb[19].mxu1 }
 0x3ba   : > { %v2129_v35 = vadd.f32 %v2087_v57, %v2001_v47  ;;  %v2497_v50 = vadd.f32 %v3267_v31, %v2176_v58  ;;  %v3270_v5 = vadd.f32 %v3269_v15, %v3268_v28  ;;  %v2185_v47 = vld [vmem:[#allocation4 + $0x88] sm:$0xff]  ;;  %v2186_v58 = vld [vmem:[#allocation4 + $0x90] sm:$0xff]  ;;  %v2187_v28 = vld [vmem:[#allocation4 + $0x98] sm:$0xff] }
 0x3bb   : > { %v2090_v54 = vpop.xlane.xlu0 %2089 }
 0x3bc   : > { %2162 = vst.msk [vmem:[#allocation3 + $0xd0] sm:$0xff] %vm2135_vm1, %v2129_v35  ;;  %v2130_v19 = vadd.f32 %v2090_v54, %v2002_v52  ;;  %2529 = vst [vmem:[#allocation4 + $0x40] sm:$0xff] %v2497_v50  ;;  %v2498_v62 = vadd.f32 %v3270_v5, %v2177_v7 }
 0x3be   : > { %2163 = vst.msk [vmem:[#allocation3 + $0xd8] sm:$0xff] %vm2135_vm1, %v2130_v19  ;;  %2530 = vst [vmem:[#allocation4 + $0x48] sm:$0xff] %v2498_v62 }
 0x3bf   : > { %v3271_v10 = vpop.f32.mrb[20].mxu1 }
 0x3c0   : > { %v2093_v49 = vpop.xlane.xlu1 %2092  ;;  %v3272_v63 = vpop.f32.mrb[21].mxu1 }
 0x3c1   : > { %v2131_v38 = vadd.f32 %v2093_v49, %v2003_v44  ;;  %v3273_v36 = vadd.f32 %v3272_v63, %v3271_v10  ;;  %v3274_v56 = vpop.f32.mrb[22].mxu1  ;;  %v2188_v44 = vld [vmem:[#allocation4 + $0xa0] sm:$0xff] }
 0x3c2   : > { %v3275_v22 = vpop.f32.mrb[23].mxu1 }
 0x3c3   : > { %v2096_v53 = vpop.xlane.xlu0 %2095  ;;  %2164 = vst.msk [vmem:[#allocation3 + $0xe0] sm:$0xff] %vm2135_vm1, %v2131_v38  ;;  %v2499_v12 = vadd.f32 %v3273_v36, %v2178_v2  ;;  %v3276_v8 = vadd.f32 %v3275_v22, %v3274_v56  ;;  %v2189_v38 = vld [vmem:[#allocation4 + $0xa8] sm:$0xff] }
 0x3c4   : > { %v2132_v16 = vadd.f32 %v2096_v53, %v2004_v27 }
 0x3c5   : > { %2531 = vst [vmem:[#allocation4 + $0x50] sm:$0xff] %v2499_v12  ;;  %v2500_v21 = vadd.f32 %v3276_v8, %v2179_v0  ;;  %v2191_v12 = vld [vmem:[#allocation4 + $0xb8] sm:$0xff] }
 0x3c6   : > { %2165 = vst.msk [vmem:[#allocation3 + $0xe8] sm:$0xff] %vm2135_vm1, %v2132_v16  ;;  %v2190_v16 = vld [vmem:[#allocation4 + $0xb0] sm:$0xff] }
 0x3c7   : > { %v2099_v41 = vpop.xlane.xlu1 %2098  ;;  %2532 = vst [vmem:[#allocation4 + $0x58] sm:$0xff] %v2500_v21 }
 0x3c8   : > { %v2133_v4 = vadd.f32 %v2099_v41, %v2005_v34  ;;  %v3277_v9 = vpop.f32.mrb[24].mxu1 }
 0x3c9   : > { %v3278_v45 = vpop.f32.mrb[25].mxu1  ;;  %v2102_v55 = vpop.xlane.xlu0 %2101 }
 0x3ca   : > { %2166 = vst.msk [vmem:[#allocation3 + $0xf0] sm:$0xff] %vm2135_vm1, %v2133_v4  ;;  %v3279_v13 = vadd.f32 %v3278_v45, %v3277_v9  ;;  %v2134_v61 = vadd.f32 %v2102_v55, %v2006_v1  ;;  %v3280_v40 = vpop.f32.mrb[26].mxu1  ;;  %v2192_v4 = vld [vmem:[#allocation4 + $0xc0] sm:$0xff]  ;;  %v2193_v55 = vld [vmem:[#allocation4 + $0xc8] sm:$0xff] }
 0x3cb   : > { %v3281_v43 = vpop.f32.mrb[27].mxu1 }
 0x3cc   : > { %v2501_v37 = vadd.f32 %v3279_v13, %v2180_v46  ;;  %2167 = vst.msk [vmem:[#allocation3 + $0xf8] sm:$0xff] %vm2135_vm1, %v2134_v61  ;;  %v3282_v32 = vadd.f32 %v3281_v43, %v3280_v40 }
 0x3ce   : > { %2533 = vst [vmem:[#allocation4 + $0x60] sm:$0xff] %v2501_v37  ;;  %v2502_v48 = vadd.f32 %v3282_v32, %v2181_v25  ;;  %v2194_v37 = vld [vmem:[#allocation4 + $0xd0] sm:$0xff] }
 0x3d0   : > { %2534 = vst [vmem:[#allocation4 + $0x68] sm:$0xff] %v2502_v48 }
 0x3d1   : > { %v3283_v14 = vpop.f32.mrb[28].mxu1 }
 0x3d2   : > { %v3284_v30 = vpop.f32.mrb[29].mxu1 }
 0x3d3   : > { %v3285_v33 = vadd.f32 %v3284_v30, %v3283_v14  ;;  %v3286_v59 = vpop.f32.mrb[30].mxu1 }
 0x3d4   : > { %v3287_v24 = vpop.f32.mrb[31].mxu1 }
 0x3d5   : > { %v2503_v42 = vadd.f32 %v3285_v33, %v2182_v29  ;;  %v3288_v51 = vadd.f32 %v3287_v24, %v3286_v59  ;;  %v2195_v29 = vld [vmem:[#allocation4 + $0xd8] sm:$0xff] }
 0x3d7   : > { %2535 = vst [vmem:[#allocation4 + $0x70] sm:$0xff] %v2503_v42  ;;  %v2504_v17 = vadd.f32 %v3288_v51, %v2183_v18  ;;  %v2196_v42 = vld [vmem:[#allocation4 + $0xe0] sm:$0xff] }
 0x3d9   : > { %2536 = vst [vmem:[#allocation4 + $0x78] sm:$0xff] %v2504_v17 }
 0x3da   : > { %v3289_v3 = vpop.f32.mrb[32].mxu1 }
 0x3db   : > { %v3290_v60 = vpop.f32.mrb[33].mxu1 }
 0x3dc   : > { %v3291_v20 = vadd.f32 %v3290_v60, %v3289_v3  ;;  %v3292_v11 = vpop.f32.mrb[34].mxu1 }
 0x3dd   : > { %v3293_v39 = vpop.f32.mrb[35].mxu1 }
 0x3de   : > { %v2505_v57 = vadd.f32 %v3291_v20, %v2184_v23  ;;  %v3294_v35 = vadd.f32 %v3293_v39, %v3292_v11  ;;  %v2197_v23 = vld [vmem:[#allocation4 + $0xe8] sm:$0xff] }
 0x3e0   : > { %2537 = vst [vmem:[#allocation4 + $0x80] sm:$0xff] %v2505_v57  ;;  %v2506_v26 = vadd.f32 %v3294_v35, %v2185_v47  ;;  %v2198_v57 = vld [vmem:[#allocation4 + $0xf0] sm:$0xff] }
 0x3e2   : > { %2538 = vst [vmem:[#allocation4 + $0x88] sm:$0xff] %v2506_v26  ;;  %v3295_v52 = vpop.f32.mrb[36].mxu1 }
 0x3e3   : > { %v3296_v6 = vpop.f32.mrb[37].mxu1 }
 0x3e4   : > { %v3297_v31 = vadd.f32 %v3296_v6, %v3295_v52  ;;  %v3298_v54 = vpop.f32.mrb[38].mxu1 }
 0x3e5   : > { %v3299_v19 = vpop.f32.mrb[39].mxu1 }
 0x3e6   : > { %v2507_v7 = vadd.f32 %v3297_v31, %v2186_v58  ;;  %v3300_v15 = vadd.f32 %v3299_v19, %v3298_v54  ;;  %v2199_v58 = vld [vmem:[#allocation4 + $0xf8] sm:$0xff]  ;;  %v2559_v19 = vld [vmem:[#allocation3 + $0x10] sm:$0xff] (!%p3090_p6) }
 0x3e8   : > { %2539 = vst [vmem:[#allocation4 + $0x90] sm:$0xff] %v2507_v7  ;;  %v2508_v50 = vadd.f32 %v3300_v15, %v2187_v28  ;;  %v2557_v7 = vld [vmem:[#allocation3] sm:$0xff] (!%p3090_p6)  ;;  %v2560_v15 = vld [vmem:[#allocation3 + $0x18] sm:$0xff] (!%p3090_p6) }
 0x3ea   : > { %2540 = vst [vmem:[#allocation4 + $0x98] sm:$0xff] %v2508_v50  ;;  %v3301_v5 = vpop.f32.mrb[40].mxu1  ;;  %v3775_v50 = vmov (!%p3090_p6), 0  }
 0x3eb   : > { %v3302_v62 = vpop.f32.mrb[41].mxu1  ;;  %3595 = vset.pattern.permute.xlu1 (!%p3090_p6), %v3775_v50  ;;  %3594 = vset.pattern.permute.xlu0 (!%p3090_p6), %v3775_v50  ;;  %v2581_v50 = vld [vmem:[#allocation3 + $0xc0] sm:$0xff] (!%p3090_p6) }
 0x3ec   : > { %v3303_v49 = vadd.f32 %v3302_v62, %v3301_v5  ;;  %v3304_v27 = vpop.f32.mrb[42].mxu1  ;;  %v2591_v5 = vmax.f32 (!%p3090_p6), %v2559_v19, 1e-30  ;;  %v2592_v62 = vmax.f32 (!%p3090_p6), %v2560_v15, 1e-30 }
 0x3ed   : > { %v3305_v10 = vpop.f32.mrb[43].mxu1 }
 0x3ee   : > { %v2509_v2 = vadd.f32 %v3303_v49, %v2188_v44  ;;  %v3306_v63 = vadd.f32 %v3305_v10, %v3304_v27  ;;  %v2589_v44 = vmax.f32 (!%p3090_p6), %v2557_v7, 1e-30  ;;  %v2558_v49 = vld [vmem:[#allocation3 + $0x8] sm:$0xff] (!%p3090_p6)  ;;  %3596 = vrcp.f32 (!%p3090_p6), %v2591_v5  ;;  %v2561_v10 = vld [vmem:[#allocation3 + $0x20] sm:$0xff] (!%p3090_p6) }
 0x3ef   : > { %v2562_v27 = vld [vmem:[#allocation3 + $0x28] sm:$0xff] (!%p3090_p6) }
 0x3f0   : > { %2541 = vst [vmem:[#allocation4 + $0xa0] sm:$0xff] %v2509_v2  ;;  %v2510_v53 = vadd.f32 %v3306_v63, %v2189_v38  ;;  %v2590_v38 = vmax.f32 (!%p3090_p6), %v2558_v49, 1e-30  ;;  %3598 = vrcp.f32 (!%p3090_p6), %v2589_v44  ;;  %v2594_v2 = vmax.f32 (!%p3090_p6), %v2562_v27, 1e-30  ;;  %v2582_v7 = vld [vmem:[#allocation3 + $0xc8] sm:$0xff] (!%p3090_p6) }
 0x3f1   : > { %3600 = vrcp.f32 (!%p3090_p6), %v2592_v62  ;;  %v2593_v63 = vmax.f32 (!%p3090_p6), %v2561_v10, 1e-30  ;;  %v2614_v44 = vmax.f32 (!%p3090_p6), %v2582_v7, 1e-30  ;;  %v2613_v62 = vmax.f32 (!%p3090_p6), %v2581_v50, 1e-30 }
 0x3f2   : > { %2542 = vst [vmem:[#allocation4 + $0xa8] sm:$0xff] %v2510_v53  ;;  %v3307_v36 = vpop.f32.mrb[44].mxu1  ;;  %3602 = vrcp.f32 (!%p3090_p6), %v2590_v38  ;;  %v2564_v53 = vld [vmem:[#allocation3 + $0x38] sm:$0xff] (!%p3090_p6)  ;;  %v2583_v38 = vld [vmem:[#allocation3 + $0xd0] sm:$0xff] (!%p3090_p6) }
 0x3f3   : > { %v3308_v56 = vpop.f32.mrb[45].mxu1  ;;  %3604 = vrcp.f32 (!%p3090_p6), %v2594_v2  ;;  %v2584_v49 = vld [vmem:[#allocation3 + $0xd8] sm:$0xff] (!%p3090_p6) }
 0x3f4   : > { %v3309_v0 = vadd.f32 %v3308_v56, %v3307_v36  ;;  %v3310_v22 = vpop.f32.mrb[46].mxu1  ;;  %v2563_v36 = vld [vmem:[#allocation3 + $0x30] sm:$0xff] (!%p3090_p6)  ;;  %3606 = vrcp.f32 (!%p3090_p6), %v2593_v63  ;;  %v2616_v2 = vmax.f32 (!%p3090_p6), %v2584_v49, 1e-30  ;;  %v2615_v63 = vmax.f32 (!%p3090_p6), %v2583_v38, 1e-30 }
 0x3f5   : > { %v3311_v8 = vpop.f32.mrb[47].mxu1  ;;  %v2595_v56 = vmax.f32 (!%p3090_p6), %v2563_v36, 1e-30 }
 0x3f6   : > { %v2511_v34 = vadd.f32 %v3309_v0, %v2190_v16  ;;  %v3312_v21 = vadd.f32 %v3311_v8, %v3310_v22  ;;  %v2596_v16 = vmax.f32 (!%p3090_p6), %v2564_v53, 1e-30  ;;  %v2566_v0 = vld [vmem:[#allocation3 + $0x48] sm:$0xff] (!%p3090_p6)  ;;  %v2565_v22 = vld [vmem:[#allocation3 + $0x40] sm:$0xff] (!%p3090_p6) }
 0x3f7   : > { %v2598_v8 = vmax.f32 (!%p3090_p6), %v2566_v0, 1e-30  ;;  %v2586_v53 = vld [vmem:[#allocation3 + $0xe8] sm:$0xff] (!%p3090_p6) }
 0x3f8   : > { %2543 = vst [vmem:[#allocation4 + $0xb0] sm:$0xff] %v2511_v34  ;;  %v2512_v41 = vadd.f32 %v3312_v21, %v2191_v12  ;;  %v3597_v12 = vpop.eup (!%p3090_p6), %3596  ;;  %3608 = vrcp.f32 (!%p3090_p6), %v2596_v16  ;;  %v2597_v21 = vmax.f32 (!%p3090_p6), %v2565_v22, 1e-30  ;;  %v2585_v16 = vld [vmem:[#allocation3 + $0xe0] sm:$0xff] (!%p3090_p6)  ;;  %v2618_v0 = vmax.f32 (!%p3090_p6), %v2586_v53, 1e-30 }
 0x3f9   : > { %2697 = vperm.xlu1 (!%p3090_p6), %3595, %v3597_v12   ;;  %3610 = vrcp.f32 (!%p3090_p6), %v2595_v56  ;;  %v2617_v22 = vmax.f32 (!%p3090_p6), %v2585_v16, 1e-30  ;;  %v2588_v12 = vld [vmem:[#allocation3 + $0xf8] sm:$0xff] (!%p3090_p6) }
 0x3fa   : > { %2544 = vst [vmem:[#allocation4 + $0xb8] sm:$0xff] %v2512_v41  ;;  %v3313_v1 = vpop.f32.mrb[48].mxu1  ;;  %v3599_v34 = vpop.eup (!%p3090_p6), %3598  ;;  %v2568_v41 = vld [vmem:[#allocation3 + $0x58] sm:$0xff] (!%p3090_p6)  ;;  %3612 = vrcp.f32 (!%p3090_p6), %v2598_v8 }
 0x3fb   : > { %v3314_v9 = vpop.f32.mrb[49].mxu1  ;;  %2687 = vperm.xlu0 (!%p3090_p6), %3594, %v3599_v34   ;;  %3614 = vrcp.f32 (!%p3090_p6), %v2597_v21  ;;  %v2587_v34 = vld [vmem:[#allocation3 + $0xf0] sm:$0xff] (!%p3090_p6) }
 0x3fc   : > { %v3315_v46 = vadd.f32 %v3314_v9, %v3313_v1  ;;  %v3316_v45 = vpop.f32.mrb[50].mxu1  ;;  %v3601_v1 = vpop.eup (!%p3090_p6), %3600 }
 0x3fd   : > { %v3317_v13 = vpop.f32.mrb[51].mxu1  ;;  %v3603_v9 = vpop.eup (!%p3090_p6), %3602  ;;  %2702 = vperm.xlu1 (!%p3090_p6), %3595, %v3601_v1   ;;  %v2619_v1 = vmax.f32 (!%p3090_p6), %v2587_v34, 1e-30 }
 0x3fe   : > { %v2513_v61 = vadd.f32 %v3315_v46, %v2192_v4  ;;  %v3318_v40 = vadd.f32 %v3317_v13, %v3316_v45  ;;  %v2567_v4 = vld [vmem:[#allocation3 + $0x50] sm:$0xff] (!%p3090_p6)  ;;  %v2600_v46 = vmax.f32 (!%p3090_p6), %v2568_v41, 1e-30  ;;  %v3605_v13 = vpop.eup (!%p3090_p6), %3604  ;;  %v2620_v41 = vmax.f32 (!%p3090_p6), %v2588_v12, 1e-30 }
 0x3ff   : > { %v2599_v45 = vmax.f32 (!%p3090_p6), %v2567_v4, 1e-30  ;;  %2692 = vperm.xlu0 (!%p3090_p6), %3594, %v3603_v9  }
 0x400   : > { %2545 = vst [vmem:[#allocation4 + $0xc0] sm:$0xff] %v2513_v61  ;;  %v2514_v25 = vadd.f32 %v3318_v40, %v2193_v55  ;;  %v2570_v55 = vld [vmem:[#allocation3 + $0x68] sm:$0xff] (!%p3090_p6)  ;;  %v2569_v61 = vld [vmem:[#allocation3 + $0x60] sm:$0xff] (!%p3090_p6)  ;;  %v3607_v40 = vpop.eup (!%p3090_p6), %3606  ;;  %3616 = vrcp.f32 (!%p3090_p6), %v2600_v46 }
 0x401   : > { %2712 = vperm.xlu1 (!%p3090_p6), %3595, %v3605_v13   ;;  %3618 = vrcp.f32 (!%p3090_p6), %v2599_v45 }
 0x402   : > { %2546 = vst [vmem:[#allocation4 + $0xc8] sm:$0xff] %v2514_v25  ;;  %v3319_v43 = vpop.f32.mrb[52].mxu1  ;;  %v2602_v25 = vmax.f32 (!%p3090_p6), %v2570_v55, 1e-30 }
 0x403   : > { %v3320_v32 = vpop.f32.mrb[53].mxu1  ;;  %2707 = vperm.xlu0 (!%p3090_p6), %3594, %v3607_v40  }
 0x404   : > { %v3321_v48 = vadd.f32 %v3320_v32, %v3319_v43  ;;  %v3322_v14 = vpop.f32.mrb[54].mxu1  ;;  %v2601_v43 = vmax.f32 (!%p3090_p6), %v2569_v61, 1e-30  ;;  %v3609_v32 = vpop.eup (!%p3090_p6), %3608  ;;  %3620 = vrcp.f32 (!%p3090_p6), %v2602_v25  ;;  %v2655_v25 = vld [vmem:[#allocation4 + $0x10] sm:$0xff] (!%p3090_p6) }
 0x405   : > { %v3323_v30 = vpop.f32.mrb[55].mxu1  ;;  %2722 = vperm.xlu1 (!%p3090_p6), %3595, %v3609_v32  }
 0x406   : > { %v2515_v33 = vadd.f32 %v3321_v48, %v2194_v37  ;;  %v3324_v59 = vadd.f32 %v3323_v30, %v3322_v14  ;;  %v2572_v37 = vld [vmem:[#allocation3 + $0x78] sm:$0xff] (!%p3090_p6)  ;;  %v2571_v48 = vld [vmem:[#allocation3 + $0x70] sm:$0xff] (!%p3090_p6)  ;;  %v3611_v14 = vpop.eup (!%p3090_p6), %3610  ;;  %3622 = vrcp.f32 (!%p3090_p6), %v2601_v43  ;;  %v2653_v43 = vld [vmem:[#allocation4] sm:$0xff] (!%p3090_p6) }
 0x407   : > { %v2603_v30 = vmax.f32 (!%p3090_p6), %v2571_v48, 1e-30  ;;  %2717 = vperm.xlu0 (!%p3090_p6), %3594, %v3611_v14  }
 0x408   : > { %2547 = vst [vmem:[#allocation4 + $0xd0] sm:$0xff] %v2515_v33  ;;  %v2516_v18 = vadd.f32 %v3324_v59, %v2195_v29  ;;  %v2604_v29 = vmax.f32 (!%p3090_p6), %v2572_v37, 1e-30  ;;  %v2574_v33 = vld [vmem:[#allocation3 + $0x88] sm:$0xff] (!%p3090_p6)  ;;  %v3613_v59 = vpop.eup (!%p3090_p6), %3612 }
 0x409   : > { %2732 = vperm.xlu1 (!%p3090_p6), %3595, %v3613_v59  }
 0x40a   : > { %2548 = vst [vmem:[#allocation4 + $0xd8] sm:$0xff] %v2516_v18  ;;  %v3325_v24 = vpop.f32.mrb[56].mxu1  ;;  %v2573_v18 = vld [vmem:[#allocation3 + $0x80] sm:$0xff] (!%p3090_p6)  ;;  %3624 = vrcp.f32 (!%p3090_p6), %v2604_v29  ;;  %v2656_v29 = vld [vmem:[#allocation4 + $0x18] sm:$0xff] (!%p3090_p6) }
 0x40b   : > { %v3326_v51 = vpop.f32.mrb[57].mxu1  ;;  %3626 = vrcp.f32 (!%p3090_p6), %v2603_v30  ;;  %v2654_v30 = vld [vmem:[#allocation4 + $0x8] sm:$0xff] (!%p3090_p6) }
 0x40c   : > { %v3327_v17 = vadd.f32 %v3326_v51, %v3325_v24  ;;  %v3328_v3 = vpop.f32.mrb[58].mxu1  ;;  %v3615_v24 = vpop.eup (!%p3090_p6), %3614  ;;  %v2605_v51 = vmax.f32 (!%p3090_p6), %v2573_v18, 1e-30 }
 0x40d   : > { %v3329_v60 = vpop.f32.mrb[59].mxu1  ;;  %2727 = vperm.xlu0 (!%p3090_p6), %3594, %v3615_v24  }
 0x40e   : > { %v2517_v20 = vadd.f32 %v3327_v17, %v2196_v42  ;;  %v3330_v11 = vadd.f32 %v3329_v60, %v3328_v3  ;;  %v2606_v42 = vmax.f32 (!%p3090_p6), %v2574_v33, 1e-30  ;;  %v2576_v17 = vld [vmem:[#allocation3 + $0x98] sm:$0xff] (!%p3090_p6)  ;;  %v3617_v3 = vpop.eup (!%p3090_p6), %3616 }
 0x40f   : > { %v3619_v60 = vpop.eup (!%p3090_p6), %3618  ;;  %2742 = vperm.xlu1 (!%p3090_p6), %3595, %v3617_v3  }
 0x410   : > { %2549 = vst [vmem:[#allocation4 + $0xe0] sm:$0xff] %v2517_v20  ;;  %v2518_v47 = vadd.f32 %v3330_v11, %v2197_v23  ;;  %v2575_v23 = vld [vmem:[#allocation3 + $0x90] sm:$0xff] (!%p3090_p6)  ;;  %3628 = vrcp.f32 (!%p3090_p6), %v2606_v42  ;;  %v2608_v20 = vmax.f32 (!%p3090_p6), %v2576_v17, 1e-30  ;;  %v2658_v42 = vld [vmem:[#allocation4 + $0x28] sm:$0xff] (!%p3090_p6) }
 0x411   : > { %3630 = vrcp.f32 (!%p3090_p6), %v2605_v51  ;;  %v2607_v11 = vmax.f32 (!%p3090_p6), %v2575_v23, 1e-30  ;;  %2737 = vperm.xlu0 (!%p3090_p6), %3594, %v3619_v60   ;;  %v2657_v51 = vld [vmem:[#allocation4 + $0x20] sm:$0xff] (!%p3090_p6) }
 0x412   : > { %2550 = vst [vmem:[#allocation4 + $0xe8] sm:$0xff] %v2518_v47  ;;  %v3331_v39 = vpop.f32.mrb[60].mxu1  ;;  %v2578_v47 = vld [vmem:[#allocation3 + $0xa8] sm:$0xff] (!%p3090_p6)  ;;  %3632 = vrcp.f32 (!%p3090_p6), %v2608_v20  ;;  %v2660_v20 = vld [vmem:[#allocation4 + $0x38] sm:$0xff] (!%p3090_p6) }
 0x413   : > { %v3332_v35 = vpop.f32.mrb[61].mxu1  ;;  %3634 = vrcp.f32 (!%p3090_p6), %v2607_v11  ;;  %v2659_v11 = vld [vmem:[#allocation4 + $0x30] sm:$0xff] (!%p3090_p6) }
 0x414   : > { %v3333_v26 = vadd.f32 %v3332_v35, %v3331_v39  ;;  %v3334_v52 = vpop.f32.mrb[62].mxu1  ;;  %2556 = sbr.rel (%p3090_p6) target bundleno = 1213 (0x4bd), region = 75  ;;  %v3621_v39 = vpop.eup (!%p3090_p6), %3620 }
 0x415   : > { %v3335_v6 = vpop.f32.mrb[63].mxu1  ;;  %v3623_v35 = vpop.eup (!%p3090_p6), %3622  ;;  %2752 = vperm.xlu1 (!%p3090_p6), %3595, %v3621_v39  }
 0x416   : > { %v2519_v31 = vadd.f32 %v3333_v26, %v2198_v57  ;;  %v3336_v54 = vadd.f32 %v3335_v6, %v3334_v52  ;;  %v2577_v57 = vld [vmem:[#allocation3 + $0xa0] sm:$0xff] (!%p3090_p6)  ;;  %v2610_v26 = vmax.f32 (!%p3090_p6), %v2578_v47, 1e-30  ;;  %v3625_v6 = vpop.eup (!%p3090_p6), %3624  ;;  %2747 = vperm.xlu0 (!%p3090_p6), %3594, %v3623_v35  }
 0x417   : > { %v2609_v52 = vmax.f32 (!%p3090_p6), %v2577_v57, 1e-30 }
 0x418   : > { %2551 = vst [vmem:[#allocation4 + $0xf0] sm:$0xff] %v2519_v31  ;;  %v2520_v28 = vadd.f32 %v3336_v54, %v2199_v58  ;;  %v2580_v58 = vld [vmem:[#allocation3 + $0xb8] sm:$0xff] (!%p3090_p6)  ;;  %v2579_v31 = vld [vmem:[#allocation3 + $0xb0] sm:$0xff] (!%p3090_p6)  ;;  %v3627_v54 = vpop.eup (!%p3090_p6), %3626  ;;  %3636 = vrcp.f32 (!%p3090_p6), %v2610_v26  ;;  %v2662_v26 = vld [vmem:[#allocation4 + $0x48] sm:$0xff] (!%p3090_p6) }
 0x419   : > { %2762 = vperm.xlu1 (!%p3090_p6), %3595, %v3625_v6   ;;  %3638 = vrcp.f32 (!%p3090_p6), %v2609_v52  ;;  %v2611_v19 = vmax.f32 (!%p3090_p6), %v2579_v31, 1e-30  ;;  %v2661_v52 = vld [vmem:[#allocation4 + $0x40] sm:$0xff] (!%p3090_p6) }
 0x41a   : > { %2552 = vst [vmem:[#allocation4 + $0xf8] sm:$0xff] %v2520_v28  ;;  %v2612_v28 = vmax.f32 (!%p3090_p6), %v2580_v58, 1e-30  ;;  %v3629_v15 = vpop.eup (!%p3090_p6), %3628  ;;  %2757 = vperm.xlu0 (!%p3090_p6), %3594, %v3627_v54  }
 0x41b   : > { %v3631_v5 = vpop.eup %3630 }
 0x41c   : > { %3640 = vrcp.f32 %v2612_v28  ;;  %v3633_v27 = vpop.eup %3632  ;;  %v2664_v28 = vld [vmem:[#allocation4 + $0x58] sm:$0xff] }
 0x41d   : > { %2772 = vperm.xlu1 %3595, %v3629_v15   ;;  %3642 = vrcp.f32 %v2611_v19  ;;  %v3635_v10 = vpop.eup %3634  ;;  %v2663_v19 = vld [vmem:[#allocation4 + $0x50] sm:$0xff] }
 0x41e   : > { %2767 = vperm.xlu0 %3594, %v3631_v5   ;;  %3644 = vrcp.f32 %v2614_v44  ;;  %v2666_v44 = vld [vmem:[#allocation4 + $0x68] sm:$0xff] }
 0x41f   : > { %3646 = vrcp.f32 %v2613_v62  ;;  %v2665_v62 = vld [vmem:[#allocation4 + $0x60] sm:$0xff] }
 0x420   : > { %3648 = vrcp.f32 %v2616_v2  ;;  %v2668_v2 = vld [vmem:[#allocation4 + $0x78] sm:$0xff] }
 0x421   : > { %2782 = vperm.xlu1 %3595, %v3633_v27   ;;  %3650 = vrcp.f32 %v2615_v63  ;;  %v2667_v63 = vld [vmem:[#allocation4 + $0x70] sm:$0xff] }
 0x422   : > { %v3637_v36 = vpop.eup %3636  ;;  %2777 = vperm.xlu0 %3594, %v3635_v10   ;;  %3652 = vrcp.f32 %v2618_v0  ;;  %v2670_v0 = vld [vmem:[#allocation4 + $0x88] sm:$0xff] }
 0x423   : > { %v3639_v56 = vpop.eup %3638  ;;  %3654 = vrcp.f32 %v2617_v22  ;;  %v2669_v22 = vld [vmem:[#allocation4 + $0x80] sm:$0xff] }
 0x424   : > { %3656 = vrcp.f32 %v2620_v41  ;;  %v2672_v41 = vld [vmem:[#allocation4 + $0x98] sm:$0xff] }
 0x425   : > { %2792 = vperm.xlu1 %3595, %v3637_v36   ;;  %3658 = vrcp.f32 %v2619_v1  ;;  %v2671_v1 = vld [vmem:[#allocation4 + $0x90] sm:$0xff] }
 0x426   : > { %v3641_v8 = vpop.eup %3640  ;;  %2787 = vperm.xlu0 %3594, %v3639_v56  }
 0x427   : > { %v3643_v21 = vpop.eup %3642 }
 0x428   : > { %v3645_v4 = vpop.eup %3644 }
 0x429   : > { %2802 = vperm.xlu1 %3595, %v3641_v8   ;;  %v3647_v9 = vpop.eup %3646 }
 0x42a   : > { %2797 = vperm.xlu0 %3594, %v3643_v21   ;;  %v3649_v46 = vpop.eup %3648 }
 0x42b   : > { %v3651_v45 = vpop.eup %3650 }
 0x42c   : > { %v3653_v55 = vpop.eup %3652 }
 0x42d   : > { %2812 = vperm.xlu1 %3595, %v3645_v4   ;;  %v3655_v13 = vpop.eup %3654 }
 0x42e   : > { %2807 = vperm.xlu0 %3594, %v3647_v9   ;;  %v3657_v61 = vpop.eup %3656 }
 0x42f   : > { %v3659_v40 = vpop.eup %3658 }
 0x431   : > { %2822 = vperm.xlu1 %3595, %v3649_v46  }
 0x432   : > { %2817 = vperm.xlu0 %3594, %v3651_v45  }
 0x435   : > { %2832 = vperm.xlu1 %3595, %v3653_v55   ;;  %v2674_v55 = vld [vmem:[#allocation4 + $0xa8] sm:$0xff] }
 0x436   : > { %2827 = vperm.xlu0 %3594, %v3655_v13   ;;  %v2673_v13 = vld [vmem:[#allocation4 + $0xa0] sm:$0xff] }
 0x439   : > { %2842 = vperm.xlu1 %3595, %v3657_v61  }
 0x43a   : > { %2837 = vperm.xlu0 %3594, %v3659_v40  }
 0x478   : > { %v2698_v37 = vpop.permute.xlu1 %2697 }
 0x479   : > { %v2847_v32 = vmul.f32 %v2698_v37, %v2655_v25  ;;  %v2676_v37 = vld [vmem:[#allocation4 + $0xb8] sm:$0xff] }
 0x47a   : > { %v2688_v48 = vpop.permute.xlu0 %2687 }
 0x47b   : > { %v2845_v14 = vmul.f32 %v2688_v48, %v2653_v43  ;;  %2879 = vst [vmem:[%s3964_s18 + $0x10] sm:$0xff] %v2847_v32  ;;  %v2675_v32 = vld [vmem:[#allocation4 + $0xb0] sm:$0xff] }
 0x47c   : > { %v2703_v33 = vpop.permute.xlu1 %2702 }
 0x47d   : > { %2877 = vst [vmem:[%s3964_s18] sm:$0xff] %v2845_v14  ;;  %v2848_v59 = vmul.f32 %v2703_v33, %v2656_v29  ;;  %v2678_v33 = vld [vmem:[#allocation4 + $0xc8] sm:$0xff] }
 0x47e   : > { %v2693_v18 = vpop.permute.xlu0 %2692 }
 0x47f   : > { %v2846_v24 = vmul.f32 %v2693_v18, %v2654_v30  ;;  %2880 = vst [vmem:[%s3964_s18 + $0x18] sm:$0xff] %v2848_v59  ;;  %v2677_v59 = vld [vmem:[#allocation4 + $0xc0] sm:$0xff] }
 0x480   : > { %v2713_v17 = vpop.permute.xlu1 %2712 }
 0x481   : > { %2878 = vst [vmem:[%s3964_s18 + $0x8] sm:$0xff] %v2846_v24  ;;  %v2850_v3 = vmul.f32 %v2713_v17, %v2658_v42  ;;  %v2680_v17 = vld [vmem:[#allocation4 + $0xd8] sm:$0xff] }
 0x482   : > { %v2708_v23 = vpop.permute.xlu0 %2707 }
 0x483   : > { %v2849_v60 = vmul.f32 %v2708_v23, %v2657_v51  ;;  %2882 = vst [vmem:[%s3964_s18 + $0x28] sm:$0xff] %v2850_v3  ;;  %v2679_v3 = vld [vmem:[#allocation4 + $0xd0] sm:$0xff] }
 0x484   : > { %v2723_v47 = vpop.permute.xlu1 %2722 }
 0x485   : > { %2881 = vst [vmem:[%s3964_s18 + $0x20] sm:$0xff] %v2849_v60  ;;  %v2852_v39 = vmul.f32 %v2723_v47, %v2660_v20  ;;  %v2682_v47 = vld [vmem:[#allocation4 + $0xe8] sm:$0xff] }
 0x486   : > { %v2718_v57 = vpop.permute.xlu0 %2717 }
 0x487   : > { %v2851_v35 = vmul.f32 %v2718_v57, %v2659_v11  ;;  %2884 = vst [vmem:[%s3964_s18 + $0x38] sm:$0xff] %v2852_v39  ;;  %v2681_v39 = vld [vmem:[#allocation4 + $0xe0] sm:$0xff] }
 0x488   : > { %v2733_v58 = vpop.permute.xlu1 %2732 }
 0x489   : > { %2883 = vst [vmem:[%s3964_s18 + $0x30] sm:$0xff] %v2851_v35  ;;  %v2854_v6 = vmul.f32 %v2733_v58, %v2662_v26  ;;  %v2684_v58 = vld [vmem:[#allocation4 + $0xf8] sm:$0xff] }
 0x48b   : > { %2886 = vst [vmem:[%s3964_s18 + $0x48] sm:$0xff] %v2854_v6  ;;  %v2683_v6 = vld [vmem:[#allocation4 + $0xf0] sm:$0xff] }
 0x48c   : > { %v2728_v31 = vpop.permute.xlu0 %2727 }
 0x48d   : > { %v2853_v54 = vmul.f32 %v2728_v31, %v2661_v52 }
 0x48e   : > { %v2743_v7 = vpop.permute.xlu1 %2742 }
 0x48f   : > { %2885 = vst [vmem:[%s3964_s18 + $0x40] sm:$0xff] %v2853_v54  ;;  %v2856_v15 = vmul.f32 %v2743_v7, %v2664_v28 }
 0x490   : > { %v2738_v50 = vpop.permute.xlu0 %2737 }
 0x491   : > { %v2855_v5 = vmul.f32 %v2738_v50, %v2663_v19  ;;  %2888 = vst [vmem:[%s3964_s18 + $0x58] sm:$0xff] %v2856_v15 }
 0x493   : > { %2887 = vst [vmem:[%s3964_s18 + $0x50] sm:$0xff] %v2855_v5 }
 0x494   : > { %v2753_v49 = vpop.permute.xlu1 %2752 }
 0x495   : > { %v2858_v27 = vmul.f32 %v2753_v49, %v2666_v44  ;;  %v2748_v38 = vpop.permute.xlu0 %2747 }
 0x496   : > { %v2857_v10 = vmul.f32 %v2748_v38, %v2665_v62 }
 0x497   : > { %2890 = vst [vmem:[%s3964_s18 + $0x68] sm:$0xff] %v2858_v27 }
 0x498   : > { %2889 = vst [vmem:[%s3964_s18 + $0x60] sm:$0xff] %v2857_v10  ;;  %v2763_v53 = vpop.permute.xlu1 %2762 }
 0x499   : > { %v2860_v36 = vmul.f32 %v2763_v53, %v2668_v2  ;;  %v2758_v16 = vpop.permute.xlu0 %2757 }
 0x49a   : > { %v2859_v56 = vmul.f32 %v2758_v16, %v2667_v63 }
 0x49b   : > { %2892 = vst [vmem:[%s3964_s18 + $0x78] sm:$0xff] %v2860_v36 }
 0x49c   : > { %2891 = vst [vmem:[%s3964_s18 + $0x70] sm:$0xff] %v2859_v56  ;;  %v2773_v12 = vpop.permute.xlu1 %2772 }
 0x49d   : > { %v2862_v8 = vmul.f32 %v2773_v12, %v2670_v0  ;;  %v2768_v34 = vpop.permute.xlu0 %2767 }
 0x49e   : > { %v2861_v21 = vmul.f32 %v2768_v34, %v2669_v22 }
 0x49f   : > { %2894 = vst [vmem:[%s3964_s18 + $0x88] sm:$0xff] %v2862_v8 }
 0x4a0   : > { %2893 = vst [vmem:[%s3964_s18 + $0x80] sm:$0xff] %v2861_v21  ;;  %v2783_v4 = vpop.permute.xlu1 %2782 }
 0x4a1   : > { %v2864_v9 = vmul.f32 %v2783_v4, %v2672_v41  ;;  %v2778_v46 = vpop.permute.xlu0 %2777 }
 0x4a2   : > { %v2863_v45 = vmul.f32 %v2778_v46, %v2671_v1 }
 0x4a3   : > { %2896 = vst [vmem:[%s3964_s18 + $0x98] sm:$0xff] %v2864_v9 }
 0x4a4   : > { %2895 = vst [vmem:[%s3964_s18 + $0x90] sm:$0xff] %v2863_v45  ;;  %v2793_v61 = vpop.permute.xlu1 %2792 }
 0x4a5   : > { %v2866_v40 = vmul.f32 %v2793_v61, %v2674_v55  ;;  %v2788_v25 = vpop.permute.xlu0 %2787 }
 0x4a6   : > { %v2865_v43 = vmul.f32 %v2788_v25, %v2673_v13 }
 0x4a7   : > { %2898 = vst [vmem:[%s3964_s18 + $0xa8] sm:$0xff] %v2866_v40 }
 0x4a8   : > { %2897 = vst [vmem:[%s3964_s18 + $0xa0] sm:$0xff] %v2865_v43  ;;  %v2803_v48 = vpop.permute.xlu1 %2802 }
 0x4a9   : > { %v2868_v14 = vmul.f32 %v2803_v48, %v2676_v37  ;;  %v2798_v29 = vpop.permute.xlu0 %2797 }
 0x4aa   : > { %v2867_v30 = vmul.f32 %v2798_v29, %v2675_v32 }
 0x4ab   : > { %2900 = vst [vmem:[%s3964_s18 + $0xb8] sm:$0xff] %v2868_v14 }
 0x4ac   : > { %2899 = vst [vmem:[%s3964_s18 + $0xb0] sm:$0xff] %v2867_v30  ;;  %v2813_v18 = vpop.permute.xlu1 %2812 }
 0x4ad   : > { %v2870_v24 = vmul.f32 %v2813_v18, %v2678_v33  ;;  %v2808_v42 = vpop.permute.xlu0 %2807 }
 0x4ae   : > { %v2869_v51 = vmul.f32 %v2808_v42, %v2677_v59 }
 0x4af   : > { %2902 = vst [vmem:[%s3964_s18 + $0xc8] sm:$0xff] %v2870_v24 }
 0x4b0   : > { %2901 = vst [vmem:[%s3964_s18 + $0xc0] sm:$0xff] %v2869_v51  ;;  %v2823_v23 = vpop.permute.xlu1 %2822 }
 0x4b1   : > { %v2872_v60 = vmul.f32 %v2823_v23, %v2680_v17  ;;  %v2818_v20 = vpop.permute.xlu0 %2817 }
 0x4b2   : > { %v2871_v11 = vmul.f32 %v2818_v20, %v2679_v3 }
 0x4b3   : > { %2904 = vst [vmem:[%s3964_s18 + $0xd8] sm:$0xff] %v2872_v60 }
 0x4b4   : > { %2903 = vst [vmem:[%s3964_s18 + $0xd0] sm:$0xff] %v2871_v11  ;;  %v2833_v57 = vpop.permute.xlu1 %2832 }
 0x4b5   : > { %v2874_v35 = vmul.f32 %v2833_v57, %v2682_v47  ;;  %v2828_v26 = vpop.permute.xlu0 %2827 }
 0x4b6   : > { %v2873_v52 = vmul.f32 %v2828_v26, %v2681_v39 }
 0x4b7   : > { %2906 = vst [vmem:[%s3964_s18 + $0xe8] sm:$0xff] %v2874_v35 }
 0x4b8   : > { %2905 = vst [vmem:[%s3964_s18 + $0xe0] sm:$0xff] %v2873_v52  ;;  %v2843_v31 = vpop.permute.xlu1 %2842 }
 0x4b9   : > { %v2876_v54 = vmul.f32 %v2843_v31, %v2684_v58  ;;  %v2838_v28 = vpop.permute.xlu0 %2837 }
 0x4ba   : > { %v2875_v19 = vmul.f32 %v2838_v28, %v2683_v6 }
 0x4bb   : > { %2908 = vst [vmem:[%s3964_s18 + $0xf8] sm:$0xff] %v2876_v54 }
 0x4bc   : > { %2907 = vst [vmem:[%s3964_s18 + $0xf0] sm:$0xff] %v2875_v19 }
 0x4bd PF: > { %s3097_s27 = sshll.u32 %s3758_s29, 12  ;;  %s2923_s20 = sshll.u32 %s3964_s18, 4  ;;  %s5268_s20 = int_to_ptr.vmem [resolvable:$true] %s2923_s20 }
 0x4be   : > { %s5265_s10 = scalar_lea.hbm %s5336_s6, %s3097_s27  ;;  %s5523_s21 = sand.u32 1, %s3738_s24  }
 0x4bf   : > { %s5272_s22 = scalar_lea.sflag [#allocation8], %s5523_s21  ;;  %s3660_s8 = scalar_lea.vmem %s5268_s20, 4096 }
 0x4c0   : > { %p3661_p8 = scmp.ne.s32.totalorder %s5268_s20, %s3660_s8  ;;  %s3776_s29 = smov [#allocation7]  }
 0x4c1   : > { %s3664_s9 = sshll.u32 %s3776_s29, 4  ;;  %s3665_s9 = int_to_ptr.vmem [resolvable:$false] %s3664_s9 }
 0x4c2   : > { %p3662_p9 = pnand %p3661_p8, %p3889_p7  ;;  %s3666_s17 = scalar_lea.vmem %s3665_s9, 8192 }
 0x4c3   : > { %p3667_p11 = scmp.lt.s32.totalorder %s5268_s20, %s3665_s9  ;;  %p3668_p13 = scmp.lt.s32.totalorder %s3666_s17, %s3660_s8 }
 0x4c4   : > { %p3663_p10 = pneg %p3662_p9 }
 0x4c5   : > { %p3669_p0 = por %p3668_p13, %p3667_p11 }
 0x4c7   : > { %p3670_p1 = pnand %p3669_p0, %p3663_p10 }
 0x4c9   : > { %3673 = shalt.err (!%p3670_p1)
}
 0x4ca   : > { %s3674_s15 = scalar_lea.hbm %s5265_s10, 4096  ;;  %s3678_s11 = scalar_lea.hbm %s5336_s6, 8192 }
 0x4cb   : > { %p3675_p2 = scmp.ne.s32.totalorder %s5265_s10, %s3674_s15  ;;  %p3679_p5 = scmp.lt.u32.totalorder %s5265_s10, %s5336_s6 }
 0x4cc   : > { %p3680_p6 = scmp.lt.u32.totalorder %s3678_s11, %s3674_s15  ;;  %p3682_p9 = scmp.lt.u32.totalorder %s3674_s15, %s5265_s10 }
 0x4cd   : > { %p3676_p3 = pnand %p3675_p2, %p3889_p7 }
 0x4ce   : > { %p3681_p8 = por %p3680_p6, %p3679_p5 }
 0x4cf   : > { %p3677_p4 = pneg %p3676_p3 }
 0x4d0   : > { %p3683_p10 = por %p3682_p9, %p3681_p8 }
 0x4d2   : > { %p3684_p11 = pnand %p3683_p10, %p3677_p4 }
 0x4d4   : > { %3687 = shalt.err (!%p3684_p11)
}
 0x4d5   : > { %s3777_s18 = smov 128   ;;  %s3778_s7 = smov 8  }
 0x4d6   : > { %3337 = dma.vmem_to_hbm [thread:$0]  (%p3889_p7), %s5268_s20, 4096, %s5265_s10, %s5272_s22, %s3777_s18, %s3777_s18, %s3778_s7  }
 0x4d7 PF: > { %p3343_p13 = scmp.ge.s32.totalorder %s3770_s5, 2  ;;  %s2938_s4 = sand.u32 1, %s3734_s23  }
 0x4d8   : > { %s2939_s25 = scalar_lea.sflag [#allocation8], %s2938_s4 }
 0x4d9   : > { %p3340_p0 = pnand %p3343_p13, %p3897_p12 }
 0x4db   : > { %3729 = dma.done.wait (!%p3340_p0), %s2939_s25, 4096  }
 0x4dc   : > { %3731 = vsyncadd (!%p3340_p0), %s2939_s25, 4294963200  ;;  %s20_s5 = sadd.s32 1, %s3770_s5   ;;  %s5524_s27 = sld [smem:[#allocation10_spill]] }
 0x4dd   : > { %p17_p1 = scmp.ge.s32.totalorder %s20_s5, 6   ;;  %s5525_s25 = sld [smem:[#allocation16_spill]] }
 0x4de   : > { %s5526_s26 = sld [smem:[#allocation11_spill]]  ;;  %s5527_s16 = sld [smem:[#allocation17_spill]] }
 0x4df   : > { %s5528_s28 = sld [smem:[#allocation12_spill]]  ;;  %s5529_s29 = sld [smem:[#allocation13_spill]] }
 0x4e0   : > { %s5530_s30 = sld [smem:[#allocation14_spill]]  ;;  %s5531_s7 = sld [smem:[#allocation15_spill]] }
 0x4e1   : > { %s5532_s23 = smov %s3738_s24  ;;  %19 = sbr.rel (!%p17_p1) target bundleno = 9 (0x9), region = 127 }
 0x4e2   : > { %s5533_s24 = smov %s5524_s27 }
 0x4e4   : > { %s5534_s27 = smov %s5527_s16 }
 0x4e8   :  { %2944 = vsyncpa [#allocation8], 1 }
 0x4e9   :  { %2946 = vsyncpa [#allocation8 + $0x1], 1 }

</bundles_post_ra>
